<compile_context>
chip_gen: v7x
topology: tpu7x:2x2x1
jax: 0.10.0
libtpu: 0.0.40
codegen_flags: <defaults>
</compile_context>

<pallas_src>
import functools
import math

import jax
import jax.numpy as jnp
from jax.experimental import pallas as pl
from jax.experimental.pallas import tpu as pltpu

LAMDA = 0.1        # self.lamda in the PyTorch module
LN_EPS = 1e-12     # HF ViT layer_norm_eps default (plain nn.LayerNorm would be 1e-5)


def _erf(x):
    # Abramowitz & Stegun 7.1.26 rational approximation, |err| <= 1.5e-7.
    # Built only from ops guaranteed to lower in Mosaic (exp/abs/where/poly).
    a1, a2, a3, a4, a5 = 0.254829592, -0.284496736, 1.421413741, -1.453152027, 1.061405429
    p = 0.3275911
    ax = jnp.abs(x)
    t = 1.0 / (1.0 + p * ax)
    poly = ((((a5 * t + a4) * t + a3) * t + a2) * t + a1) * t
    y = 1.0 - poly * jnp.exp(-ax * ax)
    return jnp.where(x >= 0, y, -y)


def _gelu_exact(x):
    # Exact (erf) GELU, matching torch.nn.GELU default / HF ViT "gelu".
    return 0.5 * x * (1.0 + _erf(x * 0.7071067811865475))


def vit_cada_kernel(num_heads, mlp_hidden,
                    x_ref, sns_g_ref, sns_b_ref,
                    wqkv_ref, bqkv_ref, wo_ref, bo_ref,
                    wd1_ref, bd1_ref, wu1_ref, bu1_ref,
                    ln_g_ref, ln_b_ref,
                    w1c_ref, b1c_ref, w2_ref, b2_ref,
                    wu2_ref, bu2_ref,
                    out_ref):
    bf16 = jnp.bfloat16
    f32 = jnp.float32

    x = x_ref[0].astype(f32)                             # (S, D)
    S, D = x.shape
    hd = D // num_heads
    scale = 1.0 / math.sqrt(hd)

    # --- ScailingAndShifting (per-channel affine, f32) ---
    x = x * sns_g_ref[0] + sns_b_ref[0]
    xb = x.astype(bf16)

    # --- Multi-head self-attention: fused QKV projection ---
    qkv = jnp.dot(xb, wqkv_ref[...], preferred_element_type=f32) + bqkv_ref[0]   # (S, 3D)
    q = qkv[:, :D]
    k = qkv[:, D:2 * D]
    v = qkv[:, 2 * D:]

    # Per-head attention; accumulate the output projection per head so every
    # MXU op has N=D (no lane-axis concatenate of narrow head slices).
    sa = jnp.zeros((S, D), f32)
    for h in range(num_heads):                           # static unrolled loop
        lo, hi = h * hd, (h + 1) * hd
        qh = (q[:, lo:hi] * scale).astype(bf16)          # fold 1/sqrt(hd) into Q
        kh = k[:, lo:hi].astype(bf16)
        vh = v[:, lo:hi].astype(bf16)
        s = jnp.dot(qh, kh.T, preferred_element_type=f32)               # (S, S)
        s = s - jnp.max(s, axis=-1, keepdims=True)
        p = jnp.exp(s)
        p = p * pl.reciprocal(jnp.sum(p, axis=-1, keepdims=True), approx=True)
        ctx = jnp.dot(p.astype(bf16), vh, preferred_element_type=f32)   # (S, hd)
        sa = sa + jnp.dot(ctx.astype(bf16), wo_ref[lo:hi, :],
                          preferred_element_type=f32)                   # (S, D)
    sa_hidden = sa + bo_ref[0]

    # --- cal_msha: ContinualAdapterLayer (down -> ReLU -> up), hidden padded to 128 ---
    a1 = jnp.maximum(
        jnp.dot(sa_hidden.astype(bf16), wd1_ref[...], preferred_element_type=f32)
        + bd1_ref[0], 0.0)
    cal1 = jnp.dot(a1.astype(bf16), wu1_ref[...], preferred_element_type=f32) + bu1_ref[0]

    x_prime = sa_hidden + LAMDA * cal1

    # --- layernorm_before_mlp (f32) ---
    mu = jnp.mean(x_prime, axis=-1, keepdims=True)
    xc = x_prime - mu
    var = jnp.mean(xc * xc, axis=-1, keepdims=True)
    x_prime = xc * jax.lax.rsqrt(var + LN_EPS) * ln_g_ref[0] + ln_b_ref[0]

    # --- fused MLP fc1 + cal_mlp down-projection (both consume x_prime) ---
    xpb = x_prime.astype(bf16)
    fused = jnp.dot(xpb, w1c_ref[...], preferred_element_type=f32) + b1c_ref[0]  # (S, Hm+Ha)
    h1 = _gelu_exact(fused[:, :mlp_hidden])              # MLP hidden, exact GELU
    a2 = jnp.maximum(fused[:, mlp_hidden:], 0.0)         # adapter hidden, ReLU

    mlp_out = jnp.dot(h1.astype(bf16), w2_ref[...], preferred_element_type=f32) + b2_ref[0]
    cal2 = jnp.dot(a2.astype(bf16), wu2_ref[...], preferred_element_type=f32) + bu2_ref[0]

    out_ref[0] = (mlp_out + LAMDA * cal2).astype(out_ref.dtype)


def _prep_kernel_params(params, *, lane=128):
    """Fuse / pad / downcast raw module params into the kernel's parameter list.

    Raw params are in x @ W layout, i.e. W has shape (in, out). Real PyTorch
    nn.Linear checkpoints (out, in) must be transposed before calling this.
    """
    (sns_g, sns_b,
     wq, bq, wk, bk, wv, bv, wo, bo,
     wd1, bd1, wu1, bu1,
     ln_g, ln_b,
     w1, b1, w2, b2,
     wd2, bd2, wu2, bu2) = params

    f32, bf16 = jnp.float32, jnp.bfloat16
    Hm = w1.shape[1]
    Ha = wd1.shape[1]
    Ha_p = ((Ha + lane - 1) // lane) * lane              # pad adapter hidden to lane multiple

    pad_cols = lambda w, n: jnp.pad(w, ((0, 0), (0, n - w.shape[1])))
    pad_rows = lambda w, n: jnp.pad(w, ((0, n - w.shape[0]), (0, 0)))

    # Fused QKV projection.
    wqkv = jnp.concatenate([wq, wk, wv], axis=1).astype(bf16)        # (D, 3D)
    bqkv = jnp.concatenate([bq, bk, bv], axis=1).astype(f32)         # (1, 3D)

    # Adapter 1 (msha), zero-padded hidden (exact: padded lanes produce zeros).
    wd1p = pad_cols(wd1, Ha_p).astype(bf16)
    bd1p = pad_cols(bd1, Ha_p).astype(f32)
    wu1p = pad_rows(wu1, Ha_p).astype(bf16)

    # Adapter 2 (mlp) down-proj fused with fc1; up-proj padded to match.
    wd2p = pad_cols(wd2, Ha_p)
    bd2p = pad_cols(bd2, Ha_p)
    wu2p = pad_rows(wu2, Ha_p).astype(bf16)
    w1cat = jnp.concatenate([w1, wd2p], axis=1).astype(bf16)          # (D, Hm + Ha_p)
    b1cat = jnp.concatenate([b1, bd2p], axis=1).astype(f32)           # (1, Hm + Ha_p)

    kparams = [
        sns_g.astype(f32), sns_b.astype(f32),
        wqkv, bqkv,
        wo.astype(bf16), bo.astype(f32),
        wd1p, bd1p, wu1p, bu1.astype(f32),
        ln_g.astype(f32), ln_b.astype(f32),
        w1cat, b1cat,
        w2.astype(bf16), b2.astype(f32),
        wu2p, bu2.astype(f32),
    ]
    return kparams, Hm


def _build_pallas_call(x_shape, x_dtype, kparams, num_heads, mlp_hidden,
                       single_buffer_weights):
    B, S, D = x_shape

    def weight_spec(arr):
        nd = arr.ndim
        idx = lambda b, _nd=nd: (0,) * _nd
        if single_buffer_weights:
            # Weights/biases are grid-invariant: keep a single resident VMEM copy
            # instead of the default double buffer (halves weight VMEM footprint).
            return pl.BlockSpec(arr.shape, idx, pipeline_mode=pl.Buffered(1))
        return pl.BlockSpec(arr.shape, idx)

    in_specs = [pl.BlockSpec((1, S, D), lambda b: (b, 0, 0))]
    in_specs += [weight_spec(p) for p in kparams]
    out_spec = pl.BlockSpec((1, S, D), lambda b: (b, 0, 0))

    # Explicit scoped-VMEM budget: weights (once) + double-buffered x/out +
    # the f32 activation chain (qkv, per-head scores, fused fc1/adapter, temps).
    weight_bytes = sum(int(p.size) * p.dtype.itemsize for p in kparams)
    ha_pad = kparams[6].shape[1]           # padded adapter hidden
    fused_cols = kparams[12].shape[1]      # Hm + Ha_pad
    act_bytes = 4 * S * (3 * D + fused_cols + S + 8 * D)
    weight_mult = 1 if single_buffer_weights else 2
    vmem_limit = weight_mult * weight_bytes + 4 * (S * D * 4) + 2 * act_bytes + (8 << 20)
    vmem_limit = max(int(vmem_limit), 32 * 1024 * 1024)

    flops = 2 * B * S * (3 * D * D + 2 * S * D + D * D
                         + 2 * D * ha_pad + D * fused_cols + mlp_hidden * D + ha_pad * D)
    transcendentals = B * S * (num_heads * S + mlp_hidden)
    bytes_accessed = weight_bytes + 2 * B * S * D * 4

    kernel = functools.partial(vit_cada_kernel, num_heads, mlp_hidden)
    return pl.pallas_call(
        kernel,
        out_shape=jax.ShapeDtypeStruct((B, S, D), x_dtype),
        grid_spec=pltpu.PrefetchScalarGridSpec(
            num_scalar_prefetch=0,
            grid=(B,),
            in_specs=in_specs,
            out_specs=out_spec,
        ),
        compiler_params=pltpu.CompilerParams(
            dimension_semantics=("parallel",),
            vmem_limit_bytes=vmem_limit,
        ),
        cost_estimate=pl.CostEstimate(
            flops=int(flops),
            transcendentals=int(transcendentals),
            bytes_accessed=int(bytes_accessed),
        ),
    )


def vit_block_with_cada(x, params, *, num_heads):
    """x: (B, S, D) float32. params: raw module parameter list (see init_params)."""
    kparams, mlp_hidden = _prep_kernel_params(params)
    try:
        fn = _build_pallas_call(x.shape, x.dtype, kparams, num_heads, mlp_hidden,
                                single_buffer_weights=True)
        return fn(x, *kparams)
    except Exception:
        # Fallback: if this JAX build rejects pipeline_mode=pl.Buffered(1) on a
        # top-level pallas_call BlockSpec, run with default double buffering.
        fn = _build_pallas_call(x.shape, x.dtype, kparams, num_heads, mlp_hidden,
                                single_buffer_weights=False)
        return fn(x, *kparams)


def init_params(key, embed_dim, adapter_hidden, mlp_hidden):
    """Deterministic synthetic parameters (module.__init__ shapes), x @ W layout."""
    D, Ha, Hm = embed_dim, adapter_hidden, mlp_hidden
    keys = jax.random.split(key, 32)
    nrm = lambda k, shape: (0.02 * jax.random.normal(k, shape)).astype(jnp.float32)

    params = [
        # ScailingAndShifting: scale (init ~1) and shift (init ~0), as (1, D) rows
        1.0 + nrm(keys[0], (1, D)), nrm(keys[1], (1, D)),
        # attention: Wq, bq, Wk, bk, Wv, bv, Wo, bo
        nrm(keys[2], (D, D)), nrm(keys[3], (1, D)),
        nrm(keys[4], (D, D)), nrm(keys[5], (1, D)),
        nrm(keys[6], (D, D)), nrm(keys[7], (1, D)),
        nrm(keys[8], (D, D)), nrm(keys[9], (1, D)),
        # cal_msha adapter: down (D,Ha)+bias, up (Ha,D)+bias
        nrm(keys[10], (D, Ha)), nrm(keys[11], (1, Ha)),
        nrm(keys[12], (Ha, D)), nrm(keys[13], (1, D)),
        # layernorm_before_mlp: gamma (init ~1), beta (init ~0)
        1.0 + nrm(keys[14], (1, D)), nrm(keys[15], (1, D)),
        # MLP: fc1 (D,Hm)+bias, fc2 (Hm,D)+bias
        nrm(keys[16], (D, Hm)), nrm(keys[17], (1, Hm)),
        nrm(keys[18], (Hm, D)), nrm(keys[19], (1, D)),
        # cal_mlp adapter: down (D,Ha)+bias, up (Ha,D)+bias
        nrm(keys[20], (D, Ha)), nrm(keys[21], (1, Ha)),
        nrm(keys[22], (Ha, D)), nrm(keys[23], (1, D)),
    ]
    return params


if __name__ == "__main__":
    # Small shapes consistent with the module's forward.
    B, S, D = 2, 8, 32          # batch, seq, embed_dim
    NUM_HEADS = 4               # head_dim = 8
    ADAPTER_HIDDEN = 16         # hidden_dim of ContinualAdapterLayer
    MLP_HIDDEN = 4 * D          # standard ViT MLP ratio

    key = jax.random.PRNGKey(0)
    kx, kp = jax.random.split(key)
    x = jax.random.normal(kx, (B, S, D), dtype=jnp.float32)
    params = init_params(kp, D, ADAPTER_HIDDEN, MLP_HIDDEN)

    out = vit_block_with_cada(x, params, num_heads=NUM_HEADS)
    jax.block_until_ready(out)
    assert out.shape == (B, S, D)
    print("KERNEL_OK")
</pallas_src>

<mosaic_0001>
module attributes {stable_mosaic.version = 11 : i64} {
  func.func @vit_cada_kernel(%arg0: i32, %arg1: memref<1x8x32xf32, #tpu.memory_space<vmem>>, %arg2: memref<1x32xf32, #tpu.memory_space<vmem>>, %arg3: memref<1x32xf32, #tpu.memory_space<vmem>>, %arg4: memref<32x96xbf16, #tpu.memory_space<vmem>>, %arg5: memref<1x96xf32, #tpu.memory_space<vmem>>, %arg6: memref<32x32xbf16, #tpu.memory_space<vmem>>, %arg7: memref<1x32xf32, #tpu.memory_space<vmem>>, %arg8: memref<32x128xbf16, #tpu.memory_space<vmem>>, %arg9: memref<1x128xf32, #tpu.memory_space<vmem>>, %arg10: memref<128x32xbf16, #tpu.memory_space<vmem>>, %arg11: memref<1x32xf32, #tpu.memory_space<vmem>>, %arg12: memref<1x32xf32, #tpu.memory_space<vmem>>, %arg13: memref<1x32xf32, #tpu.memory_space<vmem>>, %arg14: memref<32x256xbf16, #tpu.memory_space<vmem>>, %arg15: memref<1x256xf32, #tpu.memory_space<vmem>>, %arg16: memref<128x32xbf16, #tpu.memory_space<vmem>>, %arg17: memref<1x32xf32, #tpu.memory_space<vmem>>, %arg18: memref<128x32xbf16, #tpu.memory_space<vmem>>, %arg19: memref<1x32xf32, #tpu.memory_space<vmem>>, %arg20: memref<1x8x32xf32, #tpu.memory_space<vmem>>) attributes {dimension_semantics = [#tpu.dimension_semantics<parallel>], iteration_bounds = array<i64: 2>, scalar_prefetch = 0 : i64, scratch_operands = 0 : i64, tpu.core_type = #tpu.core_type<tc>, window_params = [{transform_indices = @transform_0, window_bounds = array<i64: 1, 8, 32>}, {pipeline_mode = #tpu.pipeline_mode<synchronous>, transform_indices = @transform_1, window_bounds = array<i64: 1, 32>}, {pipeline_mode = #tpu.pipeline_mode<synchronous>, transform_indices = @transform_2, window_bounds = array<i64: 1, 32>}, {pipeline_mode = #tpu.pipeline_mode<synchronous>, transform_indices = @transform_3, window_bounds = array<i64: 32, 96>}, {pipeline_mode = #tpu.pipeline_mode<synchronous>, transform_indices = @transform_4, window_bounds = array<i64: 1, 96>}, {pipeline_mode = #tpu.pipeline_mode<synchronous>, transform_indices = @transform_5, window_bounds = array<i64: 32, 32>}, {pipeline_mode = #tpu.pipeline_mode<synchronous>, transform_indices = @transform_6, window_bounds = array<i64: 1, 32>}, {pipeline_mode = #tpu.pipeline_mode<synchronous>, transform_indices = @transform_7, window_bounds = array<i64: 32, 128>}, {pipeline_mode = #tpu.pipeline_mode<synchronous>, transform_indices = @transform_8, window_bounds = array<i64: 1, 128>}, {pipeline_mode = #tpu.pipeline_mode<synchronous>, transform_indices = @transform_9, window_bounds = array<i64: 128, 32>}, {pipeline_mode = #tpu.pipeline_mode<synchronous>, transform_indices = @transform_10, window_bounds = array<i64: 1, 32>}, {pipeline_mode = #tpu.pipeline_mode<synchronous>, transform_indices = @transform_11, window_bounds = array<i64: 1, 32>}, {pipeline_mode = #tpu.pipeline_mode<synchronous>, transform_indices = @transform_12, window_bounds = array<i64: 1, 32>}, {pipeline_mode = #tpu.pipeline_mode<synchronous>, transform_indices = @transform_13, window_bounds = array<i64: 32, 256>}, {pipeline_mode = #tpu.pipeline_mode<synchronous>, transform_indices = @transform_14, window_bounds = array<i64: 1, 256>}, {pipeline_mode = #tpu.pipeline_mode<synchronous>, transform_indices = @transform_15, window_bounds = array<i64: 128, 32>}, {pipeline_mode = #tpu.pipeline_mode<synchronous>, transform_indices = @transform_16, window_bounds = array<i64: 1, 32>}, {pipeline_mode = #tpu.pipeline_mode<synchronous>, transform_indices = @transform_17, window_bounds = array<i64: 128, 32>}, {pipeline_mode = #tpu.pipeline_mode<synchronous>, transform_indices = @transform_18, window_bounds = array<i64: 1, 32>}, {transform_indices = @transform_19, window_bounds = array<i64: 1, 8, 32>}]} {
    %c0 = arith.constant 0 : index
    %c0_0 = arith.constant 0 : index
    %c0_1 = arith.constant 0 : index
    %0 = vector.load %arg1[%c0, %c0_0, %c0_1] : memref<1x8x32xf32, #tpu.memory_space<vmem>>, vector<1x8x32xf32>
    %1 = vector.shape_cast %0 : vector<1x8x32xf32> to vector<8x32xf32>
    %c0_2 = arith.constant 0 : index
    %c0_3 = arith.constant 0 : index
    %2 = vector.load %arg2[%c0_2, %c0_3] : memref<1x32xf32, #tpu.memory_space<vmem>>, vector<1x32xf32>
    %3 = vector.shape_cast %2 : vector<1x32xf32> to vector<32xf32>
    %4 = vector.shape_cast %3 : vector<32xf32> to vector<1x32xf32>
    %5 = vector.broadcast %4 : vector<1x32xf32> to vector<8x32xf32>
    %6 = arith.mulf %1, %5 : vector<8x32xf32>
    %c0_4 = arith.constant 0 : index
    %c0_5 = arith.constant 0 : index
    %7 = vector.load %arg3[%c0_4, %c0_5] : memref<1x32xf32, #tpu.memory_space<vmem>>, vector<1x32xf32>
    %8 = vector.shape_cast %7 : vector<1x32xf32> to vector<32xf32>
    %9 = vector.shape_cast %8 : vector<32xf32> to vector<1x32xf32>
    %10 = vector.broadcast %9 : vector<1x32xf32> to vector<8x32xf32>
    %11 = arith.addf %6, %10 : vector<8x32xf32>
    %12 = arith.truncf %11 : vector<8x32xf32> to vector<8x32xbf16>
    %c0_6 = arith.constant 0 : index
    %c0_7 = arith.constant 0 : index
    %13 = vector.load %arg4[%c0_6, %c0_7] : memref<32x96xbf16, #tpu.memory_space<vmem>>, vector<32x96xbf16>
    %cst = arith.constant dense<0.000000e+00> : vector<8x96xf32>
    %14 = tpu.matmul %12, %13, %cst {dimension_numbers = #tpu.dot_dimension_numbers<[1], [0], [0], [1], [0, 0, 1, 1], [], []>} : vector<8x32xbf16>, vector<32x96xbf16>, vector<8x96xf32> -> vector<8x96xf32>
    %c0_8 = arith.constant 0 : index
    %c0_9 = arith.constant 0 : index
    %15 = vector.load %arg5[%c0_8, %c0_9] : memref<1x96xf32, #tpu.memory_space<vmem>>, vector<1x96xf32>
    %16 = vector.shape_cast %15 : vector<1x96xf32> to vector<96xf32>
    %17 = vector.shape_cast %16 : vector<96xf32> to vector<1x96xf32>
    %18 = vector.broadcast %17 : vector<1x96xf32> to vector<8x96xf32>
    %19 = arith.addf %14, %18 : vector<8x96xf32>
    %20 = vector.extract_strided_slice %19 {offsets = [0, 0], sizes = [8, 32], strides = [1, 1]} : vector<8x96xf32> to vector<8x32xf32>
    %21 = vector.extract_strided_slice %19 {offsets = [0, 32], sizes = [8, 32], strides = [1, 1]} : vector<8x96xf32> to vector<8x32xf32>
    %22 = vector.extract_strided_slice %19 {offsets = [0, 64], sizes = [8, 32], strides = [1, 1]} : vector<8x96xf32> to vector<8x32xf32>
    %cst_10 = arith.constant 0.000000e+00 : f32
    %23 = vector.broadcast %cst_10 : f32 to vector<8x32xf32>
    %24 = vector.extract_strided_slice %20 {offsets = [0, 0], sizes = [8, 8], strides = [1, 1]} : vector<8x32xf32> to vector<8x8xf32>
    %cst_11 = arith.constant 0.353553385 : f32
    %25 = vector.broadcast %cst_11 : f32 to vector<8x8xf32>
    %26 = arith.mulf %24, %25 : vector<8x8xf32>
    %27 = arith.truncf %26 : vector<8x8xf32> to vector<8x8xbf16>
    %28 = vector.extract_strided_slice %21 {offsets = [0, 0], sizes = [8, 8], strides = [1, 1]} : vector<8x32xf32> to vector<8x8xf32>
    %29 = arith.truncf %28 : vector<8x8xf32> to vector<8x8xbf16>
    %30 = vector.extract_strided_slice %22 {offsets = [0, 0], sizes = [8, 8], strides = [1, 1]} : vector<8x32xf32> to vector<8x8xf32>
    %31 = arith.truncf %30 : vector<8x8xf32> to vector<8x8xbf16>
    %32 = tpu.transpose %29, [1, 0] : vector<8x8xbf16> -> vector<8x8xbf16>
    %cst_12 = arith.constant dense<0.000000e+00> : vector<8x8xf32>
    %33 = tpu.matmul %27, %32, %cst_12 {dimension_numbers = #tpu.dot_dimension_numbers<[1], [0], [0], [1], [0, 0, 1, 1], [], []>} : vector<8x8xbf16>, vector<8x8xbf16>, vector<8x8xf32> -> vector<8x8xf32>
    %cst_13 = arith.constant dense<0xFF800000> : vector<8xf32>
    %34 = vector.multi_reduction <maximumf>, %33, %cst_13 [1] : vector<8x8xf32> to vector<8xf32>
    %35 = vector.shape_cast %34 : vector<8xf32> to vector<8x1xf32>
    %36 = vector.broadcast %35 : vector<8x1xf32> to vector<8x8xf32>
    %37 = arith.subf %33, %36 : vector<8x8xf32>
    %38 = math.exp %37 : vector<8x8xf32>
    %cst_14 = arith.constant dense<0.000000e+00> : vector<8xf32>
    %39 = vector.multi_reduction <add>, %38, %cst_14 [1] : vector<8x8xf32> to vector<8xf32>
    %40 = vector.shape_cast %39 : vector<8xf32> to vector<8x1xf32>
    %41 = tpu.reciprocal %40 {approx = true} : vector<8x1xf32> -> vector<8x1xf32>
    %42 = vector.broadcast %41 : vector<8x1xf32> to vector<8x8xf32>
    %43 = arith.mulf %38, %42 : vector<8x8xf32>
    %44 = arith.truncf %43 : vector<8x8xf32> to vector<8x8xbf16>
    %cst_15 = arith.constant dense<0.000000e+00> : vector<8x8xf32>
    %45 = tpu.matmul %44, %31, %cst_15 {dimension_numbers = #tpu.dot_dimension_numbers<[1], [0], [0], [1], [0, 0, 1, 1], [], []>} : vector<8x8xbf16>, vector<8x8xbf16>, vector<8x8xf32> -> vector<8x8xf32>
    %46 = arith.truncf %45 : vector<8x8xf32> to vector<8x8xbf16>
    %c0_16 = arith.constant 0 : index
    %c0_17 = arith.constant 0 : index
    %47 = vector.load %arg6[%c0_16, %c0_17] : memref<32x32xbf16, #tpu.memory_space<vmem>>, vector<8x32xbf16>
    %cst_18 = arith.constant dense<0.000000e+00> : vector<8x32xf32>
    %48 = tpu.matmul %46, %47, %cst_18 {dimension_numbers = #tpu.dot_dimension_numbers<[1], [0], [0], [1], [0, 0, 1, 1], [], []>} : vector<8x8xbf16>, vector<8x32xbf16>, vector<8x32xf32> -> vector<8x32xf32>
    %49 = arith.addf %23, %48 : vector<8x32xf32>
    %50 = vector.extract_strided_slice %20 {offsets = [0, 8], sizes = [8, 8], strides = [1, 1]} : vector<8x32xf32> to vector<8x8xf32>
    %cst_19 = arith.constant 0.353553385 : f32
    %51 = vector.broadcast %cst_19 : f32 to vector<8x8xf32>
    %52 = arith.mulf %50, %51 : vector<8x8xf32>
    %53 = arith.truncf %52 : vector<8x8xf32> to vector<8x8xbf16>
    %54 = vector.extract_strided_slice %21 {offsets = [0, 8], sizes = [8, 8], strides = [1, 1]} : vector<8x32xf32> to vector<8x8xf32>
    %55 = arith.truncf %54 : vector<8x8xf32> to vector<8x8xbf16>
    %56 = vector.extract_strided_slice %22 {offsets = [0, 8], sizes = [8, 8], strides = [1, 1]} : vector<8x32xf32> to vector<8x8xf32>
    %57 = arith.truncf %56 : vector<8x8xf32> to vector<8x8xbf16>
    %58 = tpu.transpose %55, [1, 0] : vector<8x8xbf16> -> vector<8x8xbf16>
    %cst_20 = arith.constant dense<0.000000e+00> : vector<8x8xf32>
    %59 = tpu.matmul %53, %58, %cst_20 {dimension_numbers = #tpu.dot_dimension_numbers<[1], [0], [0], [1], [0, 0, 1, 1], [], []>} : vector<8x8xbf16>, vector<8x8xbf16>, vector<8x8xf32> -> vector<8x8xf32>
    %cst_21 = arith.constant dense<0xFF800000> : vector<8xf32>
    %60 = vector.multi_reduction <maximumf>, %59, %cst_21 [1] : vector<8x8xf32> to vector<8xf32>
    %61 = vector.shape_cast %60 : vector<8xf32> to vector<8x1xf32>
    %62 = vector.broadcast %61 : vector<8x1xf32> to vector<8x8xf32>
    %63 = arith.subf %59, %62 : vector<8x8xf32>
    %64 = math.exp %63 : vector<8x8xf32>
    %cst_22 = arith.constant dense<0.000000e+00> : vector<8xf32>
    %65 = vector.multi_reduction <add>, %64, %cst_22 [1] : vector<8x8xf32> to vector<8xf32>
    %66 = vector.shape_cast %65 : vector<8xf32> to vector<8x1xf32>
    %67 = tpu.reciprocal %66 {approx = true} : vector<8x1xf32> -> vector<8x1xf32>
    %68 = vector.broadcast %67 : vector<8x1xf32> to vector<8x8xf32>
    %69 = arith.mulf %64, %68 : vector<8x8xf32>
    %70 = arith.truncf %69 : vector<8x8xf32> to vector<8x8xbf16>
    %cst_23 = arith.constant dense<0.000000e+00> : vector<8x8xf32>
    %71 = tpu.matmul %70, %57, %cst_23 {dimension_numbers = #tpu.dot_dimension_numbers<[1], [0], [0], [1], [0, 0, 1, 1], [], []>} : vector<8x8xbf16>, vector<8x8xbf16>, vector<8x8xf32> -> vector<8x8xf32>
    %72 = arith.truncf %71 : vector<8x8xf32> to vector<8x8xbf16>
    %c8 = arith.constant 8 : index
    %c0_24 = arith.constant 0 : index
    %73 = vector.load %arg6[%c8, %c0_24] : memref<32x32xbf16, #tpu.memory_space<vmem>>, vector<8x32xbf16>
    %cst_25 = arith.constant dense<0.000000e+00> : vector<8x32xf32>
    %74 = tpu.matmul %72, %73, %cst_25 {dimension_numbers = #tpu.dot_dimension_numbers<[1], [0], [0], [1], [0, 0, 1, 1], [], []>} : vector<8x8xbf16>, vector<8x32xbf16>, vector<8x32xf32> -> vector<8x32xf32>
    %75 = arith.addf %49, %74 : vector<8x32xf32>
    %76 = vector.extract_strided_slice %20 {offsets = [0, 16], sizes = [8, 8], strides = [1, 1]} : vector<8x32xf32> to vector<8x8xf32>
    %cst_26 = arith.constant 0.353553385 : f32
    %77 = vector.broadcast %cst_26 : f32 to vector<8x8xf32>
    %78 = arith.mulf %76, %77 : vector<8x8xf32>
    %79 = arith.truncf %78 : vector<8x8xf32> to vector<8x8xbf16>
    %80 = vector.extract_strided_slice %21 {offsets = [0, 16], sizes = [8, 8], strides = [1, 1]} : vector<8x32xf32> to vector<8x8xf32>
    %81 = arith.truncf %80 : vector<8x8xf32> to vector<8x8xbf16>
    %82 = vector.extract_strided_slice %22 {offsets = [0, 16], sizes = [8, 8], strides = [1, 1]} : vector<8x32xf32> to vector<8x8xf32>
    %83 = arith.truncf %82 : vector<8x8xf32> to vector<8x8xbf16>
    %84 = tpu.transpose %81, [1, 0] : vector<8x8xbf16> -> vector<8x8xbf16>
    %cst_27 = arith.constant dense<0.000000e+00> : vector<8x8xf32>
    %85 = tpu.matmul %79, %84, %cst_27 {dimension_numbers = #tpu.dot_dimension_numbers<[1], [0], [0], [1], [0, 0, 1, 1], [], []>} : vector<8x8xbf16>, vector<8x8xbf16>, vector<8x8xf32> -> vector<8x8xf32>
    %cst_28 = arith.constant dense<0xFF800000> : vector<8xf32>
    %86 = vector.multi_reduction <maximumf>, %85, %cst_28 [1] : vector<8x8xf32> to vector<8xf32>
    %87 = vector.shape_cast %86 : vector<8xf32> to vector<8x1xf32>
    %88 = vector.broadcast %87 : vector<8x1xf32> to vector<8x8xf32>
    %89 = arith.subf %85, %88 : vector<8x8xf32>
    %90 = math.exp %89 : vector<8x8xf32>
    %cst_29 = arith.constant dense<0.000000e+00> : vector<8xf32>
    %91 = vector.multi_reduction <add>, %90, %cst_29 [1] : vector<8x8xf32> to vector<8xf32>
    %92 = vector.shape_cast %91 : vector<8xf32> to vector<8x1xf32>
    %93 = tpu.reciprocal %92 {approx = true} : vector<8x1xf32> -> vector<8x1xf32>
    %94 = vector.broadcast %93 : vector<8x1xf32> to vector<8x8xf32>
    %95 = arith.mulf %90, %94 : vector<8x8xf32>
    %96 = arith.truncf %95 : vector<8x8xf32> to vector<8x8xbf16>
    %cst_30 = arith.constant dense<0.000000e+00> : vector<8x8xf32>
    %97 = tpu.matmul %96, %83, %cst_30 {dimension_numbers = #tpu.dot_dimension_numbers<[1], [0], [0], [1], [0, 0, 1, 1], [], []>} : vector<8x8xbf16>, vector<8x8xbf16>, vector<8x8xf32> -> vector<8x8xf32>
    %98 = arith.truncf %97 : vector<8x8xf32> to vector<8x8xbf16>
    %c16 = arith.constant 16 : index
    %c0_31 = arith.constant 0 : index
    %99 = vector.load %arg6[%c16, %c0_31] : memref<32x32xbf16, #tpu.memory_space<vmem>>, vector<8x32xbf16>
    %cst_32 = arith.constant dense<0.000000e+00> : vector<8x32xf32>
    %100 = tpu.matmul %98, %99, %cst_32 {dimension_numbers = #tpu.dot_dimension_numbers<[1], [0], [0], [1], [0, 0, 1, 1], [], []>} : vector<8x8xbf16>, vector<8x32xbf16>, vector<8x32xf32> -> vector<8x32xf32>
    %101 = arith.addf %75, %100 : vector<8x32xf32>
    %102 = vector.extract_strided_slice %20 {offsets = [0, 24], sizes = [8, 8], strides = [1, 1]} : vector<8x32xf32> to vector<8x8xf32>
    %cst_33 = arith.constant 0.353553385 : f32
    %103 = vector.broadcast %cst_33 : f32 to vector<8x8xf32>
    %104 = arith.mulf %102, %103 : vector<8x8xf32>
    %105 = arith.truncf %104 : vector<8x8xf32> to vector<8x8xbf16>
    %106 = vector.extract_strided_slice %21 {offsets = [0, 24], sizes = [8, 8], strides = [1, 1]} : vector<8x32xf32> to vector<8x8xf32>
    %107 = arith.truncf %106 : vector<8x8xf32> to vector<8x8xbf16>
    %108 = vector.extract_strided_slice %22 {offsets = [0, 24], sizes = [8, 8], strides = [1, 1]} : vector<8x32xf32> to vector<8x8xf32>
    %109 = arith.truncf %108 : vector<8x8xf32> to vector<8x8xbf16>
    %110 = tpu.transpose %107, [1, 0] : vector<8x8xbf16> -> vector<8x8xbf16>
    %cst_34 = arith.constant dense<0.000000e+00> : vector<8x8xf32>
    %111 = tpu.matmul %105, %110, %cst_34 {dimension_numbers = #tpu.dot_dimension_numbers<[1], [0], [0], [1], [0, 0, 1, 1], [], []>} : vector<8x8xbf16>, vector<8x8xbf16>, vector<8x8xf32> -> vector<8x8xf32>
    %cst_35 = arith.constant dense<0xFF800000> : vector<8xf32>
    %112 = vector.multi_reduction <maximumf>, %111, %cst_35 [1] : vector<8x8xf32> to vector<8xf32>
    %113 = vector.shape_cast %112 : vector<8xf32> to vector<8x1xf32>
    %114 = vector.broadcast %113 : vector<8x1xf32> to vector<8x8xf32>
    %115 = arith.subf %111, %114 : vector<8x8xf32>
    %116 = math.exp %115 : vector<8x8xf32>
    %cst_36 = arith.constant dense<0.000000e+00> : vector<8xf32>
    %117 = vector.multi_reduction <add>, %116, %cst_36 [1] : vector<8x8xf32> to vector<8xf32>
    %118 = vector.shape_cast %117 : vector<8xf32> to vector<8x1xf32>
    %119 = tpu.reciprocal %118 {approx = true} : vector<8x1xf32> -> vector<8x1xf32>
    %120 = vector.broadcast %119 : vector<8x1xf32> to vector<8x8xf32>
    %121 = arith.mulf %116, %120 : vector<8x8xf32>
    %122 = arith.truncf %121 : vector<8x8xf32> to vector<8x8xbf16>
    %cst_37 = arith.constant dense<0.000000e+00> : vector<8x8xf32>
    %123 = tpu.matmul %122, %109, %cst_37 {dimension_numbers = #tpu.dot_dimension_numbers<[1], [0], [0], [1], [0, 0, 1, 1], [], []>} : vector<8x8xbf16>, vector<8x8xbf16>, vector<8x8xf32> -> vector<8x8xf32>
    %124 = arith.truncf %123 : vector<8x8xf32> to vector<8x8xbf16>
    %c24 = arith.constant 24 : index
    %c0_38 = arith.constant 0 : index
    %125 = vector.load %arg6[%c24, %c0_38] : memref<32x32xbf16, #tpu.memory_space<vmem>>, vector<8x32xbf16>
    %cst_39 = arith.constant dense<0.000000e+00> : vector<8x32xf32>
    %126 = tpu.matmul %124, %125, %cst_39 {dimension_numbers = #tpu.dot_dimension_numbers<[1], [0], [0], [1], [0, 0, 1, 1], [], []>} : vector<8x8xbf16>, vector<8x32xbf16>, vector<8x32xf32> -> vector<8x32xf32>
    %127 = arith.addf %101, %126 : vector<8x32xf32>
    %c0_40 = arith.constant 0 : index
    %c0_41 = arith.constant 0 : index
    %128 = vector.load %arg7[%c0_40, %c0_41] : memref<1x32xf32, #tpu.memory_space<vmem>>, vector<1x32xf32>
    %129 = vector.shape_cast %128 : vector<1x32xf32> to vector<32xf32>
    %130 = vector.shape_cast %129 : vector<32xf32> to vector<1x32xf32>
    %131 = vector.broadcast %130 : vector<1x32xf32> to vector<8x32xf32>
    %132 = arith.addf %127, %131 : vector<8x32xf32>
    %133 = arith.truncf %132 : vector<8x32xf32> to vector<8x32xbf16>
    %c0_42 = arith.constant 0 : index
    %c0_43 = arith.constant 0 : index
    %134 = vector.load %arg8[%c0_42, %c0_43] : memref<32x128xbf16, #tpu.memory_space<vmem>>, vector<32x128xbf16>
    %cst_44 = arith.constant dense<0.000000e+00> : vector<8x128xf32>
    %135 = tpu.matmul %133, %134, %cst_44 {dimension_numbers = #tpu.dot_dimension_numbers<[1], [0], [0], [1], [0, 0, 1, 1], [], []>} : vector<8x32xbf16>, vector<32x128xbf16>, vector<8x128xf32> -> vector<8x128xf32>
    %c0_45 = arith.constant 0 : index
    %c0_46 = arith.constant 0 : index
    %136 = vector.load %arg9[%c0_45, %c0_46] : memref<1x128xf32, #tpu.memory_space<vmem>>, vector<1x128xf32>
    %137 = vector.shape_cast %136 : vector<1x128xf32> to vector<128xf32>
    %138 = vector.shape_cast %137 : vector<128xf32> to vector<1x128xf32>
    %139 = vector.broadcast %138 : vector<1x128xf32> to vector<8x128xf32>
    %140 = arith.addf %135, %139 : vector<8x128xf32>
    %cst_47 = arith.constant 0.000000e+00 : f32
    %141 = vector.broadcast %cst_47 : f32 to vector<8x128xf32>
    %142 = arith.maximumf %140, %141 : vector<8x128xf32>
    %143 = arith.truncf %142 : vector<8x128xf32> to vector<8x128xbf16>
    %c0_48 = arith.constant 0 : index
    %c0_49 = arith.constant 0 : index
    %144 = vector.load %arg10[%c0_48, %c0_49] : memref<128x32xbf16, #tpu.memory_space<vmem>>, vector<128x32xbf16>
    %cst_50 = arith.constant dense<0.000000e+00> : vector<8x32xf32>
    %145 = tpu.matmul %143, %144, %cst_50 {dimension_numbers = #tpu.dot_dimension_numbers<[1], [0], [0], [1], [0, 0, 1, 1], [], []>} : vector<8x128xbf16>, vector<128x32xbf16>, vector<8x32xf32> -> vector<8x32xf32>
    %c0_51 = arith.constant 0 : index
    %c0_52 = arith.constant 0 : index
    %146 = vector.load %arg11[%c0_51, %c0_52] : memref<1x32xf32, #tpu.memory_space<vmem>>, vector<1x32xf32>
    %147 = vector.shape_cast %146 : vector<1x32xf32> to vector<32xf32>
    %148 = vector.shape_cast %147 : vector<32xf32> to vector<1x32xf32>
    %149 = vector.broadcast %148 : vector<1x32xf32> to vector<8x32xf32>
    %150 = arith.addf %145, %149 : vector<8x32xf32>
    %cst_53 = arith.constant 1.000000e-01 : f32
    %151 = vector.broadcast %cst_53 : f32 to vector<8x32xf32>
    %152 = arith.mulf %151, %150 : vector<8x32xf32>
    %153 = arith.addf %132, %152 : vector<8x32xf32>
    %cst_54 = arith.constant dense<0.000000e+00> : vector<8xf32>
    %154 = vector.multi_reduction <add>, %153, %cst_54 [1] : vector<8x32xf32> to vector<8xf32>
    %155 = vector.shape_cast %154 : vector<8xf32> to vector<8x1xf32>
    %cst_55 = arith.constant 3.200000e+01 : f32
    %156 = vector.broadcast %cst_55 : f32 to vector<8x1xf32>
    %157 = arith.divf %155, %156 : vector<8x1xf32>
    %158 = vector.broadcast %157 : vector<8x1xf32> to vector<8x32xf32>
    %159 = arith.subf %153, %158 : vector<8x32xf32>
    %160 = arith.mulf %159, %159 : vector<8x32xf32>
    %cst_56 = arith.constant dense<0.000000e+00> : vector<8xf32>
    %161 = vector.multi_reduction <add>, %160, %cst_56 [1] : vector<8x32xf32> to vector<8xf32>
    %162 = vector.shape_cast %161 : vector<8xf32> to vector<8x1xf32>
    %cst_57 = arith.constant 3.200000e+01 : f32
    %163 = vector.broadcast %cst_57 : f32 to vector<8x1xf32>
    %164 = arith.divf %162, %163 : vector<8x1xf32>
    %cst_58 = arith.constant 9.99999996E-13 : f32
    %165 = vector.broadcast %cst_58 : f32 to vector<8x1xf32>
    %166 = arith.addf %164, %165 : vector<8x1xf32>
    %167 = math.rsqrt %166 : vector<8x1xf32>
    %168 = vector.broadcast %167 : vector<8x1xf32> to vector<8x32xf32>
    %169 = arith.mulf %159, %168 : vector<8x32xf32>
    %c0_59 = arith.constant 0 : index
    %c0_60 = arith.constant 0 : index
    %170 = vector.load %arg12[%c0_59, %c0_60] : memref<1x32xf32, #tpu.memory_space<vmem>>, vector<1x32xf32>
    %171 = vector.shape_cast %170 : vector<1x32xf32> to vector<32xf32>
    %172 = vector.shape_cast %171 : vector<32xf32> to vector<1x32xf32>
    %173 = vector.broadcast %172 : vector<1x32xf32> to vector<8x32xf32>
    %174 = arith.mulf %169, %173 : vector<8x32xf32>
    %c0_61 = arith.constant 0 : index
    %c0_62 = arith.constant 0 : index
    %175 = vector.load %arg13[%c0_61, %c0_62] : memref<1x32xf32, #tpu.memory_space<vmem>>, vector<1x32xf32>
    %176 = vector.shape_cast %175 : vector<1x32xf32> to vector<32xf32>
    %177 = vector.shape_cast %176 : vector<32xf32> to vector<1x32xf32>
    %178 = vector.broadcast %177 : vector<1x32xf32> to vector<8x32xf32>
    %179 = arith.addf %174, %178 : vector<8x32xf32>
    %180 = arith.truncf %179 : vector<8x32xf32> to vector<8x32xbf16>
    %c0_63 = arith.constant 0 : index
    %c0_64 = arith.constant 0 : index
    %181 = vector.load %arg14[%c0_63, %c0_64] : memref<32x256xbf16, #tpu.memory_space<vmem>>, vector<32x256xbf16>
    %cst_65 = arith.constant dense<0.000000e+00> : vector<8x256xf32>
    %182 = tpu.matmul %180, %181, %cst_65 {dimension_numbers = #tpu.dot_dimension_numbers<[1], [0], [0], [1], [0, 0, 1, 1], [], []>} : vector<8x32xbf16>, vector<32x256xbf16>, vector<8x256xf32> -> vector<8x256xf32>
    %c0_66 = arith.constant 0 : index
    %c0_67 = arith.constant 0 : index
    %183 = vector.load %arg15[%c0_66, %c0_67] : memref<1x256xf32, #tpu.memory_space<vmem>>, vector<1x256xf32>
    %184 = vector.shape_cast %183 : vector<1x256xf32> to vector<256xf32>
    %185 = vector.shape_cast %184 : vector<256xf32> to vector<1x256xf32>
    %186 = vector.broadcast %185 : vector<1x256xf32> to vector<8x256xf32>
    %187 = arith.addf %182, %186 : vector<8x256xf32>
    %188 = vector.extract_strided_slice %187 {offsets = [0, 0], sizes = [8, 128], strides = [1, 1]} : vector<8x256xf32> to vector<8x128xf32>
    %cst_68 = arith.constant 5.000000e-01 : f32
    %189 = vector.broadcast %cst_68 : f32 to vector<8x128xf32>
    %190 = arith.mulf %189, %188 : vector<8x128xf32>
    %cst_69 = arith.constant 0.707106769 : f32
    %191 = vector.broadcast %cst_69 : f32 to vector<8x128xf32>
    %192 = arith.mulf %188, %191 : vector<8x128xf32>
    %193 = math.absf %192 : vector<8x128xf32>
    %cst_70 = arith.constant 0.327591091 : f32
    %194 = vector.broadcast %cst_70 : f32 to vector<8x128xf32>
    %195 = arith.mulf %194, %193 : vector<8x128xf32>
    %cst_71 = arith.constant 1.000000e+00 : f32
    %196 = vector.broadcast %cst_71 : f32 to vector<8x128xf32>
    %197 = arith.addf %196, %195 : vector<8x128xf32>
    %cst_72 = arith.constant 1.000000e+00 : f32
    %198 = vector.broadcast %cst_72 : f32 to vector<8x128xf32>
    %199 = arith.divf %198, %197 : vector<8x128xf32>
    %cst_73 = arith.constant 1.06140542 : f32
    %200 = vector.broadcast %cst_73 : f32 to vector<8x128xf32>
    %201 = arith.mulf %200, %199 : vector<8x128xf32>
    %cst_74 = arith.constant -1.45315206 : f32
    %202 = vector.broadcast %cst_74 : f32 to vector<8x128xf32>
    %203 = arith.addf %201, %202 : vector<8x128xf32>
    %204 = arith.mulf %203, %199 : vector<8x128xf32>
    %cst_75 = arith.constant 1.42141378 : f32
    %205 = vector.broadcast %cst_75 : f32 to vector<8x128xf32>
    %206 = arith.addf %204, %205 : vector<8x128xf32>
    %207 = arith.mulf %206, %199 : vector<8x128xf32>
    %cst_76 = arith.constant -0.284496725 : f32
    %208 = vector.broadcast %cst_76 : f32 to vector<8x128xf32>
    %209 = arith.addf %207, %208 : vector<8x128xf32>
    %210 = arith.mulf %209, %199 : vector<8x128xf32>
    %cst_77 = arith.constant 0.254829586 : f32
    %211 = vector.broadcast %cst_77 : f32 to vector<8x128xf32>
    %212 = arith.addf %210, %211 : vector<8x128xf32>
    %213 = arith.mulf %212, %199 : vector<8x128xf32>
    %cst_78 = arith.constant 0.000000e+00 : f32
    %214 = vector.broadcast %cst_78 : f32 to vector<8x128xf32>
    %215 = arith.subf %214, %193 : vector<8x128xf32>
    %216 = arith.mulf %215, %193 : vector<8x128xf32>
    %217 = math.exp %216 : vector<8x128xf32>
    %218 = arith.mulf %213, %217 : vector<8x128xf32>
    %cst_79 = arith.constant 1.000000e+00 : f32
    %219 = vector.broadcast %cst_79 : f32 to vector<8x128xf32>
    %220 = arith.subf %219, %218 : vector<8x128xf32>
    %cst_80 = arith.constant 0.000000e+00 : f32
    %221 = vector.broadcast %cst_80 : f32 to vector<8x128xf32>
    %222 = arith.cmpf oge, %192, %221 : vector<8x128xf32>
    %cst_81 = arith.constant 0.000000e+00 : f32
    %223 = vector.broadcast %cst_81 : f32 to vector<8x128xf32>
    %224 = arith.subf %223, %220 : vector<8x128xf32>
    %225 = arith.select %222, %220, %224 : vector<8x128xi1>, vector<8x128xf32>
    %cst_82 = arith.constant 1.000000e+00 : f32
    %226 = vector.broadcast %cst_82 : f32 to vector<8x128xf32>
    %227 = arith.addf %226, %225 : vector<8x128xf32>
    %228 = arith.mulf %190, %227 : vector<8x128xf32>
    %229 = vector.extract_strided_slice %187 {offsets = [0, 128], sizes = [8, 128], strides = [1, 1]} : vector<8x256xf32> to vector<8x128xf32>
    %cst_83 = arith.constant 0.000000e+00 : f32
    %230 = vector.broadcast %cst_83 : f32 to vector<8x128xf32>
    %231 = arith.maximumf %229, %230 : vector<8x128xf32>
    %232 = arith.truncf %228 : vector<8x128xf32> to vector<8x128xbf16>
    %c0_84 = arith.constant 0 : index
    %c0_85 = arith.constant 0 : index
    %233 = vector.load %arg16[%c0_84, %c0_85] : memref<128x32xbf16, #tpu.memory_space<vmem>>, vector<128x32xbf16>
    %cst_86 = arith.constant dense<0.000000e+00> : vector<8x32xf32>
    %234 = tpu.matmul %232, %233, %cst_86 {dimension_numbers = #tpu.dot_dimension_numbers<[1], [0], [0], [1], [0, 0, 1, 1], [], []>} : vector<8x128xbf16>, vector<128x32xbf16>, vector<8x32xf32> -> vector<8x32xf32>
    %c0_87 = arith.constant 0 : index
    %c0_88 = arith.constant 0 : index
    %235 = vector.load %arg17[%c0_87, %c0_88] : memref<1x32xf32, #tpu.memory_space<vmem>>, vector<1x32xf32>
    %236 = vector.shape_cast %235 : vector<1x32xf32> to vector<32xf32>
    %237 = vector.shape_cast %236 : vector<32xf32> to vector<1x32xf32>
    %238 = vector.broadcast %237 : vector<1x32xf32> to vector<8x32xf32>
    %239 = arith.addf %234, %238 : vector<8x32xf32>
    %240 = arith.truncf %231 : vector<8x128xf32> to vector<8x128xbf16>
    %c0_89 = arith.constant 0 : index
    %c0_90 = arith.constant 0 : index
    %241 = vector.load %arg18[%c0_89, %c0_90] : memref<128x32xbf16, #tpu.memory_space<vmem>>, vector<128x32xbf16>
    %cst_91 = arith.constant dense<0.000000e+00> : vector<8x32xf32>
    %242 = tpu.matmul %240, %241, %cst_91 {dimension_numbers = #tpu.dot_dimension_numbers<[1], [0], [0], [1], [0, 0, 1, 1], [], []>} : vector<8x128xbf16>, vector<128x32xbf16>, vector<8x32xf32> -> vector<8x32xf32>
    %c0_92 = arith.constant 0 : index
    %c0_93 = arith.constant 0 : index
    %243 = vector.load %arg19[%c0_92, %c0_93] : memref<1x32xf32, #tpu.memory_space<vmem>>, vector<1x32xf32>
    %244 = vector.shape_cast %243 : vector<1x32xf32> to vector<32xf32>
    %245 = vector.shape_cast %244 : vector<32xf32> to vector<1x32xf32>
    %246 = vector.broadcast %245 : vector<1x32xf32> to vector<8x32xf32>
    %247 = arith.addf %242, %246 : vector<8x32xf32>
    %cst_94 = arith.constant 1.000000e-01 : f32
    %248 = vector.broadcast %cst_94 : f32 to vector<8x32xf32>
    %249 = arith.mulf %248, %247 : vector<8x32xf32>
    %250 = arith.addf %239, %249 : vector<8x32xf32>
    %c0_95 = arith.constant 0 : index
    %c0_96 = arith.constant 0 : index
    %c0_97 = arith.constant 0 : index
    %251 = vector.load %arg20[%c0_95, %c0_96, %c0_97] : memref<1x8x32xf32, #tpu.memory_space<vmem>>, vector<1x8x32xf32>
    %252 = vector.shape_cast %251 : vector<1x8x32xf32> to vector<8x32xf32>
    %253 = vector.shape_cast %250 : vector<8x32xf32> to vector<1x8x32xf32>
    tpu.vector_store %arg20[%c0_95, %c0_96, %c0_97], %253 {strides = array<i32>} : memref<1x8x32xf32, #tpu.memory_space<vmem>>, vector<1x8x32xf32>,
    return
  }
  func.func @transform_0(%arg0: i32) -> (i32, i32, i32) {
    %c0_i32 = arith.constant 0 : i32
    %c0_i32_0 = arith.constant 0 : i32
    %c0_i32_1 = arith.constant 0 : i32
    return %arg0, %c0_i32, %c0_i32_0 : i32, i32, i32
  }
  func.func @transform_1(%arg0: i32) -> (i32, i32) {
    %c0_i32 = arith.constant 0 : i32
    %c0_i32_0 = arith.constant 0 : i32
    %c0_i32_1 = arith.constant 0 : i32
    return %c0_i32, %c0_i32_0 : i32, i32
  }
  func.func @transform_2(%arg0: i32) -> (i32, i32) {
    %c0_i32 = arith.constant 0 : i32
    %c0_i32_0 = arith.constant 0 : i32
    %c0_i32_1 = arith.constant 0 : i32
    return %c0_i32, %c0_i32_0 : i32, i32
  }
  func.func @transform_3(%arg0: i32) -> (i32, i32) {
    %c0_i32 = arith.constant 0 : i32
    %c0_i32_0 = arith.constant 0 : i32
    %c0_i32_1 = arith.constant 0 : i32
    return %c0_i32, %c0_i32_0 : i32, i32
  }
  func.func @transform_4(%arg0: i32) -> (i32, i32) {
    %c0_i32 = arith.constant 0 : i32
    %c0_i32_0 = arith.constant 0 : i32
    %c0_i32_1 = arith.constant 0 : i32
    return %c0_i32, %c0_i32_0 : i32, i32
  }
  func.func @transform_5(%arg0: i32) -> (i32, i32) {
    %c0_i32 = arith.constant 0 : i32
    %c0_i32_0 = arith.constant 0 : i32
    %c0_i32_1 = arith.constant 0 : i32
    return %c0_i32, %c0_i32_0 : i32, i32
  }
  func.func @transform_6(%arg0: i32) -> (i32, i32) {
    %c0_i32 = arith.constant 0 : i32
    %c0_i32_0 = arith.constant 0 : i32
    %c0_i32_1 = arith.constant 0 : i32
    return %c0_i32, %c0_i32_0 : i32, i32
  }
  func.func @transform_7(%arg0: i32) -> (i32, i32) {
    %c0_i32 = arith.constant 0 : i32
    %c0_i32_0 = arith.constant 0 : i32
    %c0_i32_1 = arith.constant 0 : i32
    return %c0_i32, %c0_i32_0 : i32, i32
  }
  func.func @transform_8(%arg0: i32) -> (i32, i32) {
    %c0_i32 = arith.constant 0 : i32
    %c0_i32_0 = arith.constant 0 : i32
    %c0_i32_1 = arith.constant 0 : i32
    return %c0_i32, %c0_i32_0 : i32, i32
  }
  func.func @transform_9(%arg0: i32) -> (i32, i32) {
    %c0_i32 = arith.constant 0 : i32
    %c0_i32_0 = arith.constant 0 : i32
    %c0_i32_1 = arith.constant 0 : i32
    return %c0_i32, %c0_i32_0 : i32, i32
  }
  func.func @transform_10(%arg0: i32) -> (i32, i32) {
    %c0_i32 = arith.constant 0 : i32
    %c0_i32_0 = arith.constant 0 : i32
    %c0_i32_1 = arith.constant 0 : i32
    return %c0_i32, %c0_i32_0 : i32, i32
  }
  func.func @transform_11(%arg0: i32) -> (i32, i32) {
    %c0_i32 = arith.constant 0 : i32
    %c0_i32_0 = arith.constant 0 : i32
    %c0_i32_1 = arith.constant 0 : i32
    return %c0_i32, %c0_i32_0 : i32, i32
  }
  func.func @transform_12(%arg0: i32) -> (i32, i32) {
    %c0_i32 = arith.constant 0 : i32
    %c0_i32_0 = arith.constant 0 : i32
    %c0_i32_1 = arith.constant 0 : i32
    return %c0_i32, %c0_i32_0 : i32, i32
  }
  func.func @transform_13(%arg0: i32) -> (i32, i32) {
    %c0_i32 = arith.constant 0 : i32
    %c0_i32_0 = arith.constant 0 : i32
    %c0_i32_1 = arith.constant 0 : i32
    return %c0_i32, %c0_i32_0 : i32, i32
  }
  func.func @transform_14(%arg0: i32) -> (i32, i32) {
    %c0_i32 = arith.constant 0 : i32
    %c0_i32_0 = arith.constant 0 : i32
    %c0_i32_1 = arith.constant 0 : i32
    return %c0_i32, %c0_i32_0 : i32, i32
  }
  func.func @transform_15(%arg0: i32) -> (i32, i32) {
    %c0_i32 = arith.constant 0 : i32
    %c0_i32_0 = arith.constant 0 : i32
    %c0_i32_1 = arith.constant 0 : i32
    return %c0_i32, %c0_i32_0 : i32, i32
  }
  func.func @transform_16(%arg0: i32) -> (i32, i32) {
    %c0_i32 = arith.constant 0 : i32
    %c0_i32_0 = arith.constant 0 : i32
    %c0_i32_1 = arith.constant 0 : i32
    return %c0_i32, %c0_i32_0 : i32, i32
  }
  func.func @transform_17(%arg0: i32) -> (i32, i32) {
    %c0_i32 = arith.constant 0 : i32
    %c0_i32_0 = arith.constant 0 : i32
    %c0_i32_1 = arith.constant 0 : i32
    return %c0_i32, %c0_i32_0 : i32, i32
  }
  func.func @transform_18(%arg0: i32) -> (i32, i32) {
    %c0_i32 = arith.constant 0 : i32
    %c0_i32_0 = arith.constant 0 : i32
    %c0_i32_1 = arith.constant 0 : i32
    return %c0_i32, %c0_i32_0 : i32, i32
  }
  func.func @transform_19(%arg0: i32) -> (i32, i32, i32) {
    %c0_i32 = arith.constant 0 : i32
    %c0_i32_0 = arith.constant 0 : i32
    %c0_i32_1 = arith.constant 0 : i32
    return %arg0, %c0_i32, %c0_i32_0 : i32, i32, i32
  }
}

module attributes {stable_mosaic.version = 11 : i64} {
  func.func @vit_cada_kernel(%arg0: i32, %arg1: memref<1x8x32xf32, #tpu.memory_space<vmem>>, %arg2: memref<1x32xf32, #tpu.memory_space<vmem>>, %arg3: memref<1x32xf32, #tpu.memory_space<vmem>>, %arg4: memref<32x96xbf16, #tpu.memory_space<vmem>>, %arg5: memref<1x96xf32, #tpu.memory_space<vmem>>, %arg6: memref<32x32xbf16, #tpu.memory_space<vmem>>, %arg7: memref<1x32xf32, #tpu.memory_space<vmem>>, %arg8: memref<32x128xbf16, #tpu.memory_space<vmem>>, %arg9: memref<1x128xf32, #tpu.memory_space<vmem>>, %arg10: memref<128x32xbf16, #tpu.memory_space<vmem>>, %arg11: memref<1x32xf32, #tpu.memory_space<vmem>>, %arg12: memref<1x32xf32, #tpu.memory_space<vmem>>, %arg13: memref<1x32xf32, #tpu.memory_space<vmem>>, %arg14: memref<32x256xbf16, #tpu.memory_space<vmem>>, %arg15: memref<1x256xf32, #tpu.memory_space<vmem>>, %arg16: memref<128x32xbf16, #tpu.memory_space<vmem>>, %arg17: memref<1x32xf32, #tpu.memory_space<vmem>>, %arg18: memref<128x32xbf16, #tpu.memory_space<vmem>>, %arg19: memref<1x32xf32, #tpu.memory_space<vmem>>, %arg20: memref<1x8x32xf32, #tpu.memory_space<vmem>>) attributes {dimension_semantics = [#tpu.dimension_semantics<parallel>], iteration_bounds = array<i64: 2>, scalar_prefetch = 0 : i64, scratch_operands = 0 : i64, tpu.core_type = #tpu.core_type<tc>, window_params = [{transform_indices = @transform_0, window_bounds = array<i64: 1, 8, 32>}, {pipeline_mode = #tpu.pipeline_mode<synchronous>, transform_indices = @transform_1, window_bounds = array<i64: 1, 32>}, {pipeline_mode = #tpu.pipeline_mode<synchronous>, transform_indices = @transform_2, window_bounds = array<i64: 1, 32>}, {pipeline_mode = #tpu.pipeline_mode<synchronous>, transform_indices = @transform_3, window_bounds = array<i64: 32, 96>}, {pipeline_mode = #tpu.pipeline_mode<synchronous>, transform_indices = @transform_4, window_bounds = array<i64: 1, 96>}, {pipeline_mode = #tpu.pipeline_mode<synchronous>, transform_indices = @transform_5, window_bounds = array<i64: 32, 32>}, {pipeline_mode = #tpu.pipeline_mode<synchronous>, transform_indices = @transform_6, window_bounds = array<i64: 1, 32>}, {pipeline_mode = #tpu.pipeline_mode<synchronous>, transform_indices = @transform_7, window_bounds = array<i64: 32, 128>}, {pipeline_mode = #tpu.pipeline_mode<synchronous>, transform_indices = @transform_8, window_bounds = array<i64: 1, 128>}, {pipeline_mode = #tpu.pipeline_mode<synchronous>, transform_indices = @transform_9, window_bounds = array<i64: 128, 32>}, {pipeline_mode = #tpu.pipeline_mode<synchronous>, transform_indices = @transform_10, window_bounds = array<i64: 1, 32>}, {pipeline_mode = #tpu.pipeline_mode<synchronous>, transform_indices = @transform_11, window_bounds = array<i64: 1, 32>}, {pipeline_mode = #tpu.pipeline_mode<synchronous>, transform_indices = @transform_12, window_bounds = array<i64: 1, 32>}, {pipeline_mode = #tpu.pipeline_mode<synchronous>, transform_indices = @transform_13, window_bounds = array<i64: 32, 256>}, {pipeline_mode = #tpu.pipeline_mode<synchronous>, transform_indices = @transform_14, window_bounds = array<i64: 1, 256>}, {pipeline_mode = #tpu.pipeline_mode<synchronous>, transform_indices = @transform_15, window_bounds = array<i64: 128, 32>}, {pipeline_mode = #tpu.pipeline_mode<synchronous>, transform_indices = @transform_16, window_bounds = array<i64: 1, 32>}, {pipeline_mode = #tpu.pipeline_mode<synchronous>, transform_indices = @transform_17, window_bounds = array<i64: 128, 32>}, {pipeline_mode = #tpu.pipeline_mode<synchronous>, transform_indices = @transform_18, window_bounds = array<i64: 1, 32>}, {transform_indices = @transform_19, window_bounds = array<i64: 1, 8, 32>}]} {
    %c0 = arith.constant 0 : index
    %c0_0 = arith.constant 0 : index
    %c0_1 = arith.constant 0 : index
    %0 = vector.load %arg1[%c0, %c0_0, %c0_1] : memref<1x8x32xf32, #tpu.memory_space<vmem>>, vector<1x8x32xf32>
    %1 = vector.shape_cast %0 : vector<1x8x32xf32> to vector<8x32xf32>
    %c0_2 = arith.constant 0 : index
    %c0_3 = arith.constant 0 : index
    %2 = vector.load %arg2[%c0_2, %c0_3] : memref<1x32xf32, #tpu.memory_space<vmem>>, vector<1x32xf32>
    %3 = vector.shape_cast %2 : vector<1x32xf32> to vector<32xf32>
    %4 = vector.shape_cast %3 : vector<32xf32> to vector<1x32xf32>
    %5 = vector.broadcast %4 : vector<1x32xf32> to vector<8x32xf32>
    %6 = arith.mulf %1, %5 : vector<8x32xf32>
    %c0_4 = arith.constant 0 : index
    %c0_5 = arith.constant 0 : index
    %7 = vector.load %arg3[%c0_4, %c0_5] : memref<1x32xf32, #tpu.memory_space<vmem>>, vector<1x32xf32>
    %8 = vector.shape_cast %7 : vector<1x32xf32> to vector<32xf32>
    %9 = vector.shape_cast %8 : vector<32xf32> to vector<1x32xf32>
    %10 = vector.broadcast %9 : vector<1x32xf32> to vector<8x32xf32>
    %11 = arith.addf %6, %10 : vector<8x32xf32>
    %12 = arith.truncf %11 : vector<8x32xf32> to vector<8x32xbf16>
    %c0_6 = arith.constant 0 : index
    %c0_7 = arith.constant 0 : index
    %13 = vector.load %arg4[%c0_6, %c0_7] : memref<32x96xbf16, #tpu.memory_space<vmem>>, vector<32x96xbf16>
    %cst = arith.constant dense<0.000000e+00> : vector<8x96xf32>
    %14 = tpu.matmul %12, %13, %cst {dimension_numbers = #tpu.dot_dimension_numbers<[1], [0], [0], [1], [0, 0, 1, 1], [], []>} : vector<8x32xbf16>, vector<32x96xbf16>, vector<8x96xf32> -> vector<8x96xf32>
    %c0_8 = arith.constant 0 : index
    %c0_9 = arith.constant 0 : index
    %15 = vector.load %arg5[%c0_8, %c0_9] : memref<1x96xf32, #tpu.memory_space<vmem>>, vector<1x96xf32>
    %16 = vector.shape_cast %15 : vector<1x96xf32> to vector<96xf32>
    %17 = vector.shape_cast %16 : vector<96xf32> to vector<1x96xf32>
    %18 = vector.broadcast %17 : vector<1x96xf32> to vector<8x96xf32>
    %19 = arith.addf %14, %18 : vector<8x96xf32>
    %20 = vector.extract_strided_slice %19 {offsets = [0, 0], sizes = [8, 32], strides = [1, 1]} : vector<8x96xf32> to vector<8x32xf32>
    %21 = vector.extract_strided_slice %19 {offsets = [0, 32], sizes = [8, 32], strides = [1, 1]} : vector<8x96xf32> to vector<8x32xf32>
    %22 = vector.extract_strided_slice %19 {offsets = [0, 64], sizes = [8, 32], strides = [1, 1]} : vector<8x96xf32> to vector<8x32xf32>
    %cst_10 = arith.constant 0.000000e+00 : f32
    %23 = vector.broadcast %cst_10 : f32 to vector<8x32xf32>
    %24 = vector.extract_strided_slice %20 {offsets = [0, 0], sizes = [8, 8], strides = [1, 1]} : vector<8x32xf32> to vector<8x8xf32>
    %cst_11 = arith.constant 0.353553385 : f32
    %25 = vector.broadcast %cst_11 : f32 to vector<8x8xf32>
    %26 = arith.mulf %24, %25 : vector<8x8xf32>
    %27 = arith.truncf %26 : vector<8x8xf32> to vector<8x8xbf16>
    %28 = vector.extract_strided_slice %21 {offsets = [0, 0], sizes = [8, 8], strides = [1, 1]} : vector<8x32xf32> to vector<8x8xf32>
    %29 = arith.truncf %28 : vector<8x8xf32> to vector<8x8xbf16>
    %30 = vector.extract_strided_slice %22 {offsets = [0, 0], sizes = [8, 8], strides = [1, 1]} : vector<8x32xf32> to vector<8x8xf32>
    %31 = arith.truncf %30 : vector<8x8xf32> to vector<8x8xbf16>
    %32 = tpu.transpose %29, [1, 0] : vector<8x8xbf16> -> vector<8x8xbf16>
    %cst_12 = arith.constant dense<0.000000e+00> : vector<8x8xf32>
    %33 = tpu.matmul %27, %32, %cst_12 {dimension_numbers = #tpu.dot_dimension_numbers<[1], [0], [0], [1], [0, 0, 1, 1], [], []>} : vector<8x8xbf16>, vector<8x8xbf16>, vector<8x8xf32> -> vector<8x8xf32>
    %cst_13 = arith.constant dense<0xFF800000> : vector<8xf32>
    %34 = vector.multi_reduction <maximumf>, %33, %cst_13 [1] : vector<8x8xf32> to vector<8xf32>
    %35 = vector.shape_cast %34 : vector<8xf32> to vector<8x1xf32>
    %36 = vector.broadcast %35 : vector<8x1xf32> to vector<8x8xf32>
    %37 = arith.subf %33, %36 : vector<8x8xf32>
    %38 = math.exp %37 : vector<8x8xf32>
    %cst_14 = arith.constant dense<0.000000e+00> : vector<8xf32>
    %39 = vector.multi_reduction <add>, %38, %cst_14 [1] : vector<8x8xf32> to vector<8xf32>
    %40 = vector.shape_cast %39 : vector<8xf32> to vector<8x1xf32>
    %41 = tpu.reciprocal %40 {approx = true} : vector<8x1xf32> -> vector<8x1xf32>
    %42 = vector.broadcast %41 : vector<8x1xf32> to vector<8x8xf32>
    %43 = arith.mulf %38, %42 : vector<8x8xf32>
    %44 = arith.truncf %43 : vector<8x8xf32> to vector<8x8xbf16>
    %cst_15 = arith.constant dense<0.000000e+00> : vector<8x8xf32>
    %45 = tpu.matmul %44, %31, %cst_15 {dimension_numbers = #tpu.dot_dimension_numbers<[1], [0], [0], [1], [0, 0, 1, 1], [], []>} : vector<8x8xbf16>, vector<8x8xbf16>, vector<8x8xf32> -> vector<8x8xf32>
    %46 = arith.truncf %45 : vector<8x8xf32> to vector<8x8xbf16>
    %c0_16 = arith.constant 0 : index
    %c0_17 = arith.constant 0 : index
    %47 = vector.load %arg6[%c0_16, %c0_17] : memref<32x32xbf16, #tpu.memory_space<vmem>>, vector<8x32xbf16>
    %cst_18 = arith.constant dense<0.000000e+00> : vector<8x32xf32>
    %48 = tpu.matmul %46, %47, %cst_18 {dimension_numbers = #tpu.dot_dimension_numbers<[1], [0], [0], [1], [0, 0, 1, 1], [], []>} : vector<8x8xbf16>, vector<8x32xbf16>, vector<8x32xf32> -> vector<8x32xf32>
    %49 = arith.addf %23, %48 : vector<8x32xf32>
    %50 = vector.extract_strided_slice %20 {offsets = [0, 8], sizes = [8, 8], strides = [1, 1]} : vector<8x32xf32> to vector<8x8xf32>
    %cst_19 = arith.constant 0.353553385 : f32
    %51 = vector.broadcast %cst_19 : f32 to vector<8x8xf32>
    %52 = arith.mulf %50, %51 : vector<8x8xf32>
    %53 = arith.truncf %52 : vector<8x8xf32> to vector<8x8xbf16>
    %54 = vector.extract_strided_slice %21 {offsets = [0, 8], sizes = [8, 8], strides = [1, 1]} : vector<8x32xf32> to vector<8x8xf32>
    %55 = arith.truncf %54 : vector<8x8xf32> to vector<8x8xbf16>
    %56 = vector.extract_strided_slice %22 {offsets = [0, 8], sizes = [8, 8], strides = [1, 1]} : vector<8x32xf32> to vector<8x8xf32>
    %57 = arith.truncf %56 : vector<8x8xf32> to vector<8x8xbf16>
    %58 = tpu.transpose %55, [1, 0] : vector<8x8xbf16> -> vector<8x8xbf16>
    %cst_20 = arith.constant dense<0.000000e+00> : vector<8x8xf32>
    %59 = tpu.matmul %53, %58, %cst_20 {dimension_numbers = #tpu.dot_dimension_numbers<[1], [0], [0], [1], [0, 0, 1, 1], [], []>} : vector<8x8xbf16>, vector<8x8xbf16>, vector<8x8xf32> -> vector<8x8xf32>
    %cst_21 = arith.constant dense<0xFF800000> : vector<8xf32>
    %60 = vector.multi_reduction <maximumf>, %59, %cst_21 [1] : vector<8x8xf32> to vector<8xf32>
    %61 = vector.shape_cast %60 : vector<8xf32> to vector<8x1xf32>
    %62 = vector.broadcast %61 : vector<8x1xf32> to vector<8x8xf32>
    %63 = arith.subf %59, %62 : vector<8x8xf32>
    %64 = math.exp %63 : vector<8x8xf32>
    %cst_22 = arith.constant dense<0.000000e+00> : vector<8xf32>
    %65 = vector.multi_reduction <add>, %64, %cst_22 [1] : vector<8x8xf32> to vector<8xf32>
    %66 = vector.shape_cast %65 : vector<8xf32> to vector<8x1xf32>
    %67 = tpu.reciprocal %66 {approx = true} : vector<8x1xf32> -> vector<8x1xf32>
    %68 = vector.broadcast %67 : vector<8x1xf32> to vector<8x8xf32>
    %69 = arith.mulf %64, %68 : vector<8x8xf32>
    %70 = arith.truncf %69 : vector<8x8xf32> to vector<8x8xbf16>
    %cst_23 = arith.constant dense<0.000000e+00> : vector<8x8xf32>
    %71 = tpu.matmul %70, %57, %cst_23 {dimension_numbers = #tpu.dot_dimension_numbers<[1], [0], [0], [1], [0, 0, 1, 1], [], []>} : vector<8x8xbf16>, vector<8x8xbf16>, vector<8x8xf32> -> vector<8x8xf32>
    %72 = arith.truncf %71 : vector<8x8xf32> to vector<8x8xbf16>
    %c8 = arith.constant 8 : index
    %c0_24 = arith.constant 0 : index
    %73 = vector.load %arg6[%c8, %c0_24] : memref<32x32xbf16, #tpu.memory_space<vmem>>, vector<8x32xbf16>
    %cst_25 = arith.constant dense<0.000000e+00> : vector<8x32xf32>
    %74 = tpu.matmul %72, %73, %cst_25 {dimension_numbers = #tpu.dot_dimension_numbers<[1], [0], [0], [1], [0, 0, 1, 1], [], []>} : vector<8x8xbf16>, vector<8x32xbf16>, vector<8x32xf32> -> vector<8x32xf32>
    %75 = arith.addf %49, %74 : vector<8x32xf32>
    %76 = vector.extract_strided_slice %20 {offsets = [0, 16], sizes = [8, 8], strides = [1, 1]} : vector<8x32xf32> to vector<8x8xf32>
    %cst_26 = arith.constant 0.353553385 : f32
    %77 = vector.broadcast %cst_26 : f32 to vector<8x8xf32>
    %78 = arith.mulf %76, %77 : vector<8x8xf32>
    %79 = arith.truncf %78 : vector<8x8xf32> to vector<8x8xbf16>
    %80 = vector.extract_strided_slice %21 {offsets = [0, 16], sizes = [8, 8], strides = [1, 1]} : vector<8x32xf32> to vector<8x8xf32>
    %81 = arith.truncf %80 : vector<8x8xf32> to vector<8x8xbf16>
    %82 = vector.extract_strided_slice %22 {offsets = [0, 16], sizes = [8, 8], strides = [1, 1]} : vector<8x32xf32> to vector<8x8xf32>
    %83 = arith.truncf %82 : vector<8x8xf32> to vector<8x8xbf16>
    %84 = tpu.transpose %81, [1, 0] : vector<8x8xbf16> -> vector<8x8xbf16>
    %cst_27 = arith.constant dense<0.000000e+00> : vector<8x8xf32>
    %85 = tpu.matmul %79, %84, %cst_27 {dimension_numbers = #tpu.dot_dimension_numbers<[1], [0], [0], [1], [0, 0, 1, 1], [], []>} : vector<8x8xbf16>, vector<8x8xbf16>, vector<8x8xf32> -> vector<8x8xf32>
    %cst_28 = arith.constant dense<0xFF800000> : vector<8xf32>
    %86 = vector.multi_reduction <maximumf>, %85, %cst_28 [1] : vector<8x8xf32> to vector<8xf32>
    %87 = vector.shape_cast %86 : vector<8xf32> to vector<8x1xf32>
    %88 = vector.broadcast %87 : vector<8x1xf32> to vector<8x8xf32>
    %89 = arith.subf %85, %88 : vector<8x8xf32>
    %90 = math.exp %89 : vector<8x8xf32>
    %cst_29 = arith.constant dense<0.000000e+00> : vector<8xf32>
    %91 = vector.multi_reduction <add>, %90, %cst_29 [1] : vector<8x8xf32> to vector<8xf32>
    %92 = vector.shape_cast %91 : vector<8xf32> to vector<8x1xf32>
    %93 = tpu.reciprocal %92 {approx = true} : vector<8x1xf32> -> vector<8x1xf32>
    %94 = vector.broadcast %93 : vector<8x1xf32> to vector<8x8xf32>
    %95 = arith.mulf %90, %94 : vector<8x8xf32>
    %96 = arith.truncf %95 : vector<8x8xf32> to vector<8x8xbf16>
    %cst_30 = arith.constant dense<0.000000e+00> : vector<8x8xf32>
    %97 = tpu.matmul %96, %83, %cst_30 {dimension_numbers = #tpu.dot_dimension_numbers<[1], [0], [0], [1], [0, 0, 1, 1], [], []>} : vector<8x8xbf16>, vector<8x8xbf16>, vector<8x8xf32> -> vector<8x8xf32>
    %98 = arith.truncf %97 : vector<8x8xf32> to vector<8x8xbf16>
    %c16 = arith.constant 16 : index
    %c0_31 = arith.constant 0 : index
    %99 = vector.load %arg6[%c16, %c0_31] : memref<32x32xbf16, #tpu.memory_space<vmem>>, vector<8x32xbf16>
    %cst_32 = arith.constant dense<0.000000e+00> : vector<8x32xf32>
    %100 = tpu.matmul %98, %99, %cst_32 {dimension_numbers = #tpu.dot_dimension_numbers<[1], [0], [0], [1], [0, 0, 1, 1], [], []>} : vector<8x8xbf16>, vector<8x32xbf16>, vector<8x32xf32> -> vector<8x32xf32>
    %101 = arith.addf %75, %100 : vector<8x32xf32>
    %102 = vector.extract_strided_slice %20 {offsets = [0, 24], sizes = [8, 8], strides = [1, 1]} : vector<8x32xf32> to vector<8x8xf32>
    %cst_33 = arith.constant 0.353553385 : f32
    %103 = vector.broadcast %cst_33 : f32 to vector<8x8xf32>
    %104 = arith.mulf %102, %103 : vector<8x8xf32>
    %105 = arith.truncf %104 : vector<8x8xf32> to vector<8x8xbf16>
    %106 = vector.extract_strided_slice %21 {offsets = [0, 24], sizes = [8, 8], strides = [1, 1]} : vector<8x32xf32> to vector<8x8xf32>
    %107 = arith.truncf %106 : vector<8x8xf32> to vector<8x8xbf16>
    %108 = vector.extract_strided_slice %22 {offsets = [0, 24], sizes = [8, 8], strides = [1, 1]} : vector<8x32xf32> to vector<8x8xf32>
    %109 = arith.truncf %108 : vector<8x8xf32> to vector<8x8xbf16>
    %110 = tpu.transpose %107, [1, 0] : vector<8x8xbf16> -> vector<8x8xbf16>
    %cst_34 = arith.constant dense<0.000000e+00> : vector<8x8xf32>
    %111 = tpu.matmul %105, %110, %cst_34 {dimension_numbers = #tpu.dot_dimension_numbers<[1], [0], [0], [1], [0, 0, 1, 1], [], []>} : vector<8x8xbf16>, vector<8x8xbf16>, vector<8x8xf32> -> vector<8x8xf32>
    %cst_35 = arith.constant dense<0xFF800000> : vector<8xf32>
    %112 = vector.multi_reduction <maximumf>, %111, %cst_35 [1] : vector<8x8xf32> to vector<8xf32>
    %113 = vector.shape_cast %112 : vector<8xf32> to vector<8x1xf32>
    %114 = vector.broadcast %113 : vector<8x1xf32> to vector<8x8xf32>
    %115 = arith.subf %111, %114 : vector<8x8xf32>
    %116 = math.exp %115 : vector<8x8xf32>
    %cst_36 = arith.constant dense<0.000000e+00> : vector<8xf32>
    %117 = vector.multi_reduction <add>, %116, %cst_36 [1] : vector<8x8xf32> to vector<8xf32>
    %118 = vector.shape_cast %117 : vector<8xf32> to vector<8x1xf32>
    %119 = tpu.reciprocal %118 {approx = true} : vector<8x1xf32> -> vector<8x1xf32>
    %120 = vector.broadcast %119 : vector<8x1xf32> to vector<8x8xf32>
    %121 = arith.mulf %116, %120 : vector<8x8xf32>
    %122 = arith.truncf %121 : vector<8x8xf32> to vector<8x8xbf16>
    %cst_37 = arith.constant dense<0.000000e+00> : vector<8x8xf32>
    %123 = tpu.matmul %122, %109, %cst_37 {dimension_numbers = #tpu.dot_dimension_numbers<[1], [0], [0], [1], [0, 0, 1, 1], [], []>} : vector<8x8xbf16>, vector<8x8xbf16>, vector<8x8xf32> -> vector<8x8xf32>
    %124 = arith.truncf %123 : vector<8x8xf32> to vector<8x8xbf16>
    %c24 = arith.constant 24 : index
    %c0_38 = arith.constant 0 : index
    %125 = vector.load %arg6[%c24, %c0_38] : memref<32x32xbf16, #tpu.memory_space<vmem>>, vector<8x32xbf16>
    %cst_39 = arith.constant dense<0.000000e+00> : vector<8x32xf32>
    %126 = tpu.matmul %124, %125, %cst_39 {dimension_numbers = #tpu.dot_dimension_numbers<[1], [0], [0], [1], [0, 0, 1, 1], [], []>} : vector<8x8xbf16>, vector<8x32xbf16>, vector<8x32xf32> -> vector<8x32xf32>
    %127 = arith.addf %101, %126 : vector<8x32xf32>
    %c0_40 = arith.constant 0 : index
    %c0_41 = arith.constant 0 : index
    %128 = vector.load %arg7[%c0_40, %c0_41] : memref<1x32xf32, #tpu.memory_space<vmem>>, vector<1x32xf32>
    %129 = vector.shape_cast %128 : vector<1x32xf32> to vector<32xf32>
    %130 = vector.shape_cast %129 : vector<32xf32> to vector<1x32xf32>
    %131 = vector.broadcast %130 : vector<1x32xf32> to vector<8x32xf32>
    %132 = arith.addf %127, %131 : vector<8x32xf32>
    %133 = arith.truncf %132 : vector<8x32xf32> to vector<8x32xbf16>
    %c0_42 = arith.constant 0 : index
    %c0_43 = arith.constant 0 : index
    %134 = vector.load %arg8[%c0_42, %c0_43] : memref<32x128xbf16, #tpu.memory_space<vmem>>, vector<32x128xbf16>
    %cst_44 = arith.constant dense<0.000000e+00> : vector<8x128xf32>
    %135 = tpu.matmul %133, %134, %cst_44 {dimension_numbers = #tpu.dot_dimension_numbers<[1], [0], [0], [1], [0, 0, 1, 1], [], []>} : vector<8x32xbf16>, vector<32x128xbf16>, vector<8x128xf32> -> vector<8x128xf32>
    %c0_45 = arith.constant 0 : index
    %c0_46 = arith.constant 0 : index
    %136 = vector.load %arg9[%c0_45, %c0_46] : memref<1x128xf32, #tpu.memory_space<vmem>>, vector<1x128xf32>
    %137 = vector.shape_cast %136 : vector<1x128xf32> to vector<128xf32>
    %138 = vector.shape_cast %137 : vector<128xf32> to vector<1x128xf32>
    %139 = vector.broadcast %138 : vector<1x128xf32> to vector<8x128xf32>
    %140 = arith.addf %135, %139 : vector<8x128xf32>
    %cst_47 = arith.constant 0.000000e+00 : f32
    %141 = vector.broadcast %cst_47 : f32 to vector<8x128xf32>
    %142 = arith.maximumf %140, %141 : vector<8x128xf32>
    %143 = arith.truncf %142 : vector<8x128xf32> to vector<8x128xbf16>
    %c0_48 = arith.constant 0 : index
    %c0_49 = arith.constant 0 : index
    %144 = vector.load %arg10[%c0_48, %c0_49] : memref<128x32xbf16, #tpu.memory_space<vmem>>, vector<128x32xbf16>
    %cst_50 = arith.constant dense<0.000000e+00> : vector<8x32xf32>
    %145 = tpu.matmul %143, %144, %cst_50 {dimension_numbers = #tpu.dot_dimension_numbers<[1], [0], [0], [1], [0, 0, 1, 1], [], []>} : vector<8x128xbf16>, vector<128x32xbf16>, vector<8x32xf32> -> vector<8x32xf32>
    %c0_51 = arith.constant 0 : index
    %c0_52 = arith.constant 0 : index
    %146 = vector.load %arg11[%c0_51, %c0_52] : memref<1x32xf32, #tpu.memory_space<vmem>>, vector<1x32xf32>
    %147 = vector.shape_cast %146 : vector<1x32xf32> to vector<32xf32>
    %148 = vector.shape_cast %147 : vector<32xf32> to vector<1x32xf32>
    %149 = vector.broadcast %148 : vector<1x32xf32> to vector<8x32xf32>
    %150 = arith.addf %145, %149 : vector<8x32xf32>
    %cst_53 = arith.constant 1.000000e-01 : f32
    %151 = vector.broadcast %cst_53 : f32 to vector<8x32xf32>
    %152 = arith.mulf %151, %150 : vector<8x32xf32>
    %153 = arith.addf %132, %152 : vector<8x32xf32>
    %cst_54 = arith.constant dense<0.000000e+00> : vector<8xf32>
    %154 = vector.multi_reduction <add>, %153, %cst_54 [1] : vector<8x32xf32> to vector<8xf32>
    %155 = vector.shape_cast %154 : vector<8xf32> to vector<8x1xf32>
    %cst_55 = arith.constant 3.200000e+01 : f32
    %156 = vector.broadcast %cst_55 : f32 to vector<8x1xf32>
    %157 = arith.divf %155, %156 : vector<8x1xf32>
    %158 = vector.broadcast %157 : vector<8x1xf32> to vector<8x32xf32>
    %159 = arith.subf %153, %158 : vector<8x32xf32>
    %160 = arith.mulf %159, %159 : vector<8x32xf32>
    %cst_56 = arith.constant dense<0.000000e+00> : vector<8xf32>
    %161 = vector.multi_reduction <add>, %160, %cst_56 [1] : vector<8x32xf32> to vector<8xf32>
    %162 = vector.shape_cast %161 : vector<8xf32> to vector<8x1xf32>
    %cst_57 = arith.constant 3.200000e+01 : f32
    %163 = vector.broadcast %cst_57 : f32 to vector<8x1xf32>
    %164 = arith.divf %162, %163 : vector<8x1xf32>
    %cst_58 = arith.constant 9.99999996E-13 : f32
    %165 = vector.broadcast %cst_58 : f32 to vector<8x1xf32>
    %166 = arith.addf %164, %165 : vector<8x1xf32>
    %167 = math.rsqrt %166 : vector<8x1xf32>
    %168 = vector.broadcast %167 : vector<8x1xf32> to vector<8x32xf32>
    %169 = arith.mulf %159, %168 : vector<8x32xf32>
    %c0_59 = arith.constant 0 : index
    %c0_60 = arith.constant 0 : index
    %170 = vector.load %arg12[%c0_59, %c0_60] : memref<1x32xf32, #tpu.memory_space<vmem>>, vector<1x32xf32>
    %171 = vector.shape_cast %170 : vector<1x32xf32> to vector<32xf32>
    %172 = vector.shape_cast %171 : vector<32xf32> to vector<1x32xf32>
    %173 = vector.broadcast %172 : vector<1x32xf32> to vector<8x32xf32>
    %174 = arith.mulf %169, %173 : vector<8x32xf32>
    %c0_61 = arith.constant 0 : index
    %c0_62 = arith.constant 0 : index
    %175 = vector.load %arg13[%c0_61, %c0_62] : memref<1x32xf32, #tpu.memory_space<vmem>>, vector<1x32xf32>
    %176 = vector.shape_cast %175 : vector<1x32xf32> to vector<32xf32>
    %177 = vector.shape_cast %176 : vector<32xf32> to vector<1x32xf32>
    %178 = vector.broadcast %177 : vector<1x32xf32> to vector<8x32xf32>
    %179 = arith.addf %174, %178 : vector<8x32xf32>
    %180 = arith.truncf %179 : vector<8x32xf32> to vector<8x32xbf16>
    %c0_63 = arith.constant 0 : index
    %c0_64 = arith.constant 0 : index
    %181 = vector.load %arg14[%c0_63, %c0_64] : memref<32x256xbf16, #tpu.memory_space<vmem>>, vector<32x256xbf16>
    %cst_65 = arith.constant dense<0.000000e+00> : vector<8x256xf32>
    %182 = tpu.matmul %180, %181, %cst_65 {dimension_numbers = #tpu.dot_dimension_numbers<[1], [0], [0], [1], [0, 0, 1, 1], [], []>} : vector<8x32xbf16>, vector<32x256xbf16>, vector<8x256xf32> -> vector<8x256xf32>
    %c0_66 = arith.constant 0 : index
    %c0_67 = arith.constant 0 : index
    %183 = vector.load %arg15[%c0_66, %c0_67] : memref<1x256xf32, #tpu.memory_space<vmem>>, vector<1x256xf32>
    %184 = vector.shape_cast %183 : vector<1x256xf32> to vector<256xf32>
    %185 = vector.shape_cast %184 : vector<256xf32> to vector<1x256xf32>
    %186 = vector.broadcast %185 : vector<1x256xf32> to vector<8x256xf32>
    %187 = arith.addf %182, %186 : vector<8x256xf32>
    %188 = vector.extract_strided_slice %187 {offsets = [0, 0], sizes = [8, 128], strides = [1, 1]} : vector<8x256xf32> to vector<8x128xf32>
    %cst_68 = arith.constant 5.000000e-01 : f32
    %189 = vector.broadcast %cst_68 : f32 to vector<8x128xf32>
    %190 = arith.mulf %189, %188 : vector<8x128xf32>
    %cst_69 = arith.constant 0.707106769 : f32
    %191 = vector.broadcast %cst_69 : f32 to vector<8x128xf32>
    %192 = arith.mulf %188, %191 : vector<8x128xf32>
    %193 = math.absf %192 : vector<8x128xf32>
    %cst_70 = arith.constant 0.327591091 : f32
    %194 = vector.broadcast %cst_70 : f32 to vector<8x128xf32>
    %195 = arith.mulf %194, %193 : vector<8x128xf32>
    %cst_71 = arith.constant 1.000000e+00 : f32
    %196 = vector.broadcast %cst_71 : f32 to vector<8x128xf32>
    %197 = arith.addf %196, %195 : vector<8x128xf32>
    %cst_72 = arith.constant 1.000000e+00 : f32
    %198 = vector.broadcast %cst_72 : f32 to vector<8x128xf32>
    %199 = arith.divf %198, %197 : vector<8x128xf32>
    %cst_73 = arith.constant 1.06140542 : f32
    %200 = vector.broadcast %cst_73 : f32 to vector<8x128xf32>
    %201 = arith.mulf %200, %199 : vector<8x128xf32>
    %cst_74 = arith.constant -1.45315206 : f32
    %202 = vector.broadcast %cst_74 : f32 to vector<8x128xf32>
    %203 = arith.addf %201, %202 : vector<8x128xf32>
    %204 = arith.mulf %203, %199 : vector<8x128xf32>
    %cst_75 = arith.constant 1.42141378 : f32
    %205 = vector.broadcast %cst_75 : f32 to vector<8x128xf32>
    %206 = arith.addf %204, %205 : vector<8x128xf32>
    %207 = arith.mulf %206, %199 : vector<8x128xf32>
    %cst_76 = arith.constant -0.284496725 : f32
    %208 = vector.broadcast %cst_76 : f32 to vector<8x128xf32>
    %209 = arith.addf %207, %208 : vector<8x128xf32>
    %210 = arith.mulf %209, %199 : vector<8x128xf32>
    %cst_77 = arith.constant 0.254829586 : f32
    %211 = vector.broadcast %cst_77 : f32 to vector<8x128xf32>
    %212 = arith.addf %210, %211 : vector<8x128xf32>
    %213 = arith.mulf %212, %199 : vector<8x128xf32>
    %cst_78 = arith.constant 0.000000e+00 : f32
    %214 = vector.broadcast %cst_78 : f32 to vector<8x128xf32>
    %215 = arith.subf %214, %193 : vector<8x128xf32>
    %216 = arith.mulf %215, %193 : vector<8x128xf32>
    %217 = math.exp %216 : vector<8x128xf32>
    %218 = arith.mulf %213, %217 : vector<8x128xf32>
    %cst_79 = arith.constant 1.000000e+00 : f32
    %219 = vector.broadcast %cst_79 : f32 to vector<8x128xf32>
    %220 = arith.subf %219, %218 : vector<8x128xf32>
    %cst_80 = arith.constant 0.000000e+00 : f32
    %221 = vector.broadcast %cst_80 : f32 to vector<8x128xf32>
    %222 = arith.cmpf oge, %192, %221 : vector<8x128xf32>
    %cst_81 = arith.constant 0.000000e+00 : f32
    %223 = vector.broadcast %cst_81 : f32 to vector<8x128xf32>
    %224 = arith.subf %223, %220 : vector<8x128xf32>
    %225 = arith.select %222, %220, %224 : vector<8x128xi1>, vector<8x128xf32>
    %cst_82 = arith.constant 1.000000e+00 : f32
    %226 = vector.broadcast %cst_82 : f32 to vector<8x128xf32>
    %227 = arith.addf %226, %225 : vector<8x128xf32>
    %228 = arith.mulf %190, %227 : vector<8x128xf32>
    %229 = vector.extract_strided_slice %187 {offsets = [0, 128], sizes = [8, 128], strides = [1, 1]} : vector<8x256xf32> to vector<8x128xf32>
    %cst_83 = arith.constant 0.000000e+00 : f32
    %230 = vector.broadcast %cst_83 : f32 to vector<8x128xf32>
    %231 = arith.maximumf %229, %230 : vector<8x128xf32>
    %232 = arith.truncf %228 : vector<8x128xf32> to vector<8x128xbf16>
    %c0_84 = arith.constant 0 : index
    %c0_85 = arith.constant 0 : index
    %233 = vector.load %arg16[%c0_84, %c0_85] : memref<128x32xbf16, #tpu.memory_space<vmem>>, vector<128x32xbf16>
    %cst_86 = arith.constant dense<0.000000e+00> : vector<8x32xf32>
    %234 = tpu.matmul %232, %233, %cst_86 {dimension_numbers = #tpu.dot_dimension_numbers<[1], [0], [0], [1], [0, 0, 1, 1], [], []>} : vector<8x128xbf16>, vector<128x32xbf16>, vector<8x32xf32> -> vector<8x32xf32>
    %c0_87 = arith.constant 0 : index
    %c0_88 = arith.constant 0 : index
    %235 = vector.load %arg17[%c0_87, %c0_88] : memref<1x32xf32, #tpu.memory_space<vmem>>, vector<1x32xf32>
    %236 = vector.shape_cast %235 : vector<1x32xf32> to vector<32xf32>
    %237 = vector.shape_cast %236 : vector<32xf32> to vector<1x32xf32>
    %238 = vector.broadcast %237 : vector<1x32xf32> to vector<8x32xf32>
    %239 = arith.addf %234, %238 : vector<8x32xf32>
    %240 = arith.truncf %231 : vector<8x128xf32> to vector<8x128xbf16>
    %c0_89 = arith.constant 0 : index
    %c0_90 = arith.constant 0 : index
    %241 = vector.load %arg18[%c0_89, %c0_90] : memref<128x32xbf16, #tpu.memory_space<vmem>>, vector<128x32xbf16>
    %cst_91 = arith.constant dense<0.000000e+00> : vector<8x32xf32>
    %242 = tpu.matmul %240, %241, %cst_91 {dimension_numbers = #tpu.dot_dimension_numbers<[1], [0], [0], [1], [0, 0, 1, 1], [], []>} : vector<8x128xbf16>, vector<128x32xbf16>, vector<8x32xf32> -> vector<8x32xf32>
    %c0_92 = arith.constant 0 : index
    %c0_93 = arith.constant 0 : index
    %243 = vector.load %arg19[%c0_92, %c0_93] : memref<1x32xf32, #tpu.memory_space<vmem>>, vector<1x32xf32>
    %244 = vector.shape_cast %243 : vector<1x32xf32> to vector<32xf32>
    %245 = vector.shape_cast %244 : vector<32xf32> to vector<1x32xf32>
    %246 = vector.broadcast %245 : vector<1x32xf32> to vector<8x32xf32>
    %247 = arith.addf %242, %246 : vector<8x32xf32>
    %cst_94 = arith.constant 1.000000e-01 : f32
    %248 = vector.broadcast %cst_94 : f32 to vector<8x32xf32>
    %249 = arith.mulf %248, %247 : vector<8x32xf32>
    %250 = arith.addf %239, %249 : vector<8x32xf32>
    %c0_95 = arith.constant 0 : index
    %c0_96 = arith.constant 0 : index
    %c0_97 = arith.constant 0 : index
    %251 = vector.load %arg20[%c0_95, %c0_96, %c0_97] : memref<1x8x32xf32, #tpu.memory_space<vmem>>, vector<1x8x32xf32>
    %252 = vector.shape_cast %251 : vector<1x8x32xf32> to vector<8x32xf32>
    %253 = vector.shape_cast %250 : vector<8x32xf32> to vector<1x8x32xf32>
    tpu.vector_store %arg20[%c0_95, %c0_96, %c0_97], %253 {strides = array<i32>} : memref<1x8x32xf32, #tpu.memory_space<vmem>>, vector<1x8x32xf32>,
    return
  }
  func.func @transform_0(%arg0: i32) -> (i32, i32, i32) {
    %c0_i32 = arith.constant 0 : i32
    %c0_i32_0 = arith.constant 0 : i32
    %c0_i32_1 = arith.constant 0 : i32
    return %arg0, %c0_i32, %c0_i32_0 : i32, i32, i32
  }
  func.func @transform_1(%arg0: i32) -> (i32, i32) {
    %c0_i32 = arith.constant 0 : i32
    %c0_i32_0 = arith.constant 0 : i32
    %c0_i32_1 = arith.constant 0 : i32
    return %c0_i32, %c0_i32_0 : i32, i32
  }
  func.func @transform_2(%arg0: i32) -> (i32, i32) {
    %c0_i32 = arith.constant 0 : i32
    %c0_i32_0 = arith.constant 0 : i32
    %c0_i32_1 = arith.constant 0 : i32
    return %c0_i32, %c0_i32_0 : i32, i32
  }
  func.func @transform_3(%arg0: i32) -> (i32, i32) {
    %c0_i32 = arith.constant 0 : i32
    %c0_i32_0 = arith.constant 0 : i32
    %c0_i32_1 = arith.constant 0 : i32
    return %c0_i32, %c0_i32_0 : i32, i32
  }
  func.func @transform_4(%arg0: i32) -> (i32, i32) {
    %c0_i32 = arith.constant 0 : i32
    %c0_i32_0 = arith.constant 0 : i32
    %c0_i32_1 = arith.constant 0 : i32
    return %c0_i32, %c0_i32_0 : i32, i32
  }
  func.func @transform_5(%arg0: i32) -> (i32, i32) {
    %c0_i32 = arith.constant 0 : i32
    %c0_i32_0 = arith.constant 0 : i32
    %c0_i32_1 = arith.constant 0 : i32
    return %c0_i32, %c0_i32_0 : i32, i32
  }
  func.func @transform_6(%arg0: i32) -> (i32, i32) {
    %c0_i32 = arith.constant 0 : i32
    %c0_i32_0 = arith.constant 0 : i32
    %c0_i32_1 = arith.constant 0 : i32
    return %c0_i32, %c0_i32_0 : i32, i32
  }
  func.func @transform_7(%arg0: i32) -> (i32, i32) {
    %c0_i32 = arith.constant 0 : i32
    %c0_i32_0 = arith.constant 0 : i32
    %c0_i32_1 = arith.constant 0 : i32
    return %c0_i32, %c0_i32_0 : i32, i32
  }
  func.func @transform_8(%arg0: i32) -> (i32, i32) {
    %c0_i32 = arith.constant 0 : i32
    %c0_i32_0 = arith.constant 0 : i32
    %c0_i32_1 = arith.constant 0 : i32
    return %c0_i32, %c0_i32_0 : i32, i32
  }
  func.func @transform_9(%arg0: i32) -> (i32, i32) {
    %c0_i32 = arith.constant 0 : i32
    %c0_i32_0 = arith.constant 0 : i32
    %c0_i32_1 = arith.constant 0 : i32
    return %c0_i32, %c0_i32_0 : i32, i32
  }
  func.func @transform_10(%arg0: i32) -> (i32, i32) {
    %c0_i32 = arith.constant 0 : i32
    %c0_i32_0 = arith.constant 0 : i32
    %c0_i32_1 = arith.constant 0 : i32
    return %c0_i32, %c0_i32_0 : i32, i32
  }
  func.func @transform_11(%arg0: i32) -> (i32, i32) {
    %c0_i32 = arith.constant 0 : i32
    %c0_i32_0 = arith.constant 0 : i32
    %c0_i32_1 = arith.constant 0 : i32
    return %c0_i32, %c0_i32_0 : i32, i32
  }
  func.func @transform_12(%arg0: i32) -> (i32, i32) {
    %c0_i32 = arith.constant 0 : i32
    %c0_i32_0 = arith.constant 0 : i32
    %c0_i32_1 = arith.constant 0 : i32
    return %c0_i32, %c0_i32_0 : i32, i32
  }
  func.func @transform_13(%arg0: i32) -> (i32, i32) {
    %c0_i32 = arith.constant 0 : i32
    %c0_i32_0 = arith.constant 0 : i32
    %c0_i32_1 = arith.constant 0 : i32
    return %c0_i32, %c0_i32_0 : i32, i32
  }
  func.func @transform_14(%arg0: i32) -> (i32, i32) {
    %c0_i32 = arith.constant 0 : i32
    %c0_i32_0 = arith.constant 0 : i32
    %c0_i32_1 = arith.constant 0 : i32
    return %c0_i32, %c0_i32_0 : i32, i32
  }
  func.func @transform_15(%arg0: i32) -> (i32, i32) {
    %c0_i32 = arith.constant 0 : i32
    %c0_i32_0 = arith.constant 0 : i32
    %c0_i32_1 = arith.constant 0 : i32
    return %c0_i32, %c0_i32_0 : i32, i32
  }
  func.func @transform_16(%arg0: i32) -> (i32, i32) {
    %c0_i32 = arith.constant 0 : i32
    %c0_i32_0 = arith.constant 0 : i32
    %c0_i32_1 = arith.constant 0 : i32
    return %c0_i32, %c0_i32_0 : i32, i32
  }
  func.func @transform_17(%arg0: i32) -> (i32, i32) {
    %c0_i32 = arith.constant 0 : i32
    %c0_i32_0 = arith.constant 0 : i32
    %c0_i32_1 = arith.constant 0 : i32
    return %c0_i32, %c0_i32_0 : i32, i32
  }
  func.func @transform_18(%arg0: i32) -> (i32, i32) {
    %c0_i32 = arith.constant 0 : i32
    %c0_i32_0 = arith.constant 0 : i32
    %c0_i32_1 = arith.constant 0 : i32
    return %c0_i32, %c0_i32_0 : i32, i32
  }
  func.func @transform_19(%arg0: i32) -> (i32, i32, i32) {
    %c0_i32 = arith.constant 0 : i32
    %c0_i32_0 = arith.constant 0 : i32
    %c0_i32_1 = arith.constant 0 : i32
    return %arg0, %c0_i32, %c0_i32_0 : i32, i32, i32
  }
}

</mosaic_0001>

<bundles_post_ra>
// kernel: tpu_custom_call.1
= control target key start
LH: loop header
LB: loop body
LE: loop exit
PB: predicated region body
PF: predicated region fallthrough
CT: control target
= control target key end

     0   :  { %s2884_s0 = inlined_call_operand.vmem [shape: f32[2,8,32], index: 0, kind: input, shape index: {}]   ;;  %s2885_s1 = inlined_call_operand.vmem [shape: f32[1,32], index: 1, kind: input, shape index: {}]   ;;  %s2886_s2 = inlined_call_operand.vmem [shape: f32[1,32], index: 2, kind: input, shape index: {}]   ;;  %s2887_s3 = inlined_call_operand.vmem [shape: bf16[32,96], index: 3, kind: input, shape index: {}]   ;;  %s2888_s4 = inlined_call_operand.vmem [shape: f32[1,96], index: 4, kind: input, shape index: {}]   ;;  %s2889_s5 = inlined_call_operand.vmem [shape: bf16[32,32], index: 5, kind: input, shape index: {}]   ;;  %s2890_s6 = inlined_call_operand.vmem [shape: f32[1,32], index: 6, kind: input, shape index: {}]   ;;  %s2891_s7 = inlined_call_operand.vmem [shape: bf16[32,128], index: 7, kind: input, shape index: {}]   ;;  %s2892_s8 = inlined_call_operand.vmem [shape: f32[1,128], index: 8, kind: input, shape index: {}]   ;;  %s2893_s9 = inlined_call_operand.vmem [shape: bf16[128,32], index: 9, kind: input, shape index: {}]   ;;  %s2894_s10 = inlined_call_operand.vmem [shape: f32[1,32], index: 10, kind: input, shape index: {}]   ;;  %s2895_s11 = inlined_call_operand.vmem [shape: f32[1,32], index: 11, kind: input, shape index: {}]   ;;  %s2896_s12 = inlined_call_operand.vmem [shape: f32[1,32], index: 12, kind: input, shape index: {}]   ;;  %s2897_s13 = inlined_call_operand.vmem [shape: bf16[32,256], index: 13, kind: input, shape index: {}]   ;;  %s2898_s14 = inlined_call_operand.vmem [shape: f32[1,256], index: 14, kind: input, shape index: {}]   ;;  %s2899_s15 = inlined_call_operand.vmem [shape: bf16[128,32], index: 15, kind: input, shape index: {}]   ;;  %s2900_s16 = inlined_call_operand.vmem [shape: f32[1,32], index: 16, kind: input, shape index: {}]   ;;  %s2901_s17 = inlined_call_operand.vmem [shape: bf16[128,32], index: 17, kind: input, shape index: {}]   ;;  %s2902_s18 = inlined_call_operand.vmem [shape: f32[1,32], index: 18, kind: input, shape index: {}]   ;;  %s2903_s19 = inlined_call_operand.hbm [shape: f32[2,8,32], index: 19, kind: output, shape index: {}]  }
   0x1   :  { %2912 = sst [smem:[#allocation11_spill]] %s2884_s0 }
   0x2   :  { %2913 = sst [smem:[#allocation12_spill]] %s2885_s1 }
   0x3   :  { %2914 = sst [smem:[#allocation13_spill]] %s2886_s2 }
   0x4   :  { %2915 = sst [smem:[#allocation14_spill]] %s2887_s3 }
   0x5   :  { %24 = vsyncpa [#allocation3], 0 }
   0x6   :  { %26 = vsyncpa [#allocation3 + $0x1], 0  ;;  %s2512_s0 = smov 0   ;;  %s2514_s30 = smov 0  }
   0x7   :  { %s2516_s20 = smov 0   ;;  %s2518_s21 = smov 0  }
   0x8 LB: > { %2916 = sst [smem:[#allocation5_spill]] %s2383_s0  ;;  %s2533_s1 = sadd.s32 4294967295, %s2395_s21   ;;  %s2395_s21 = sphi %s2518_s21, %s2931_s21   ;;  %s2391_s20 = sphi %s2516_s20, %s2933_s20   ;;  %s2387_s30 = sphi %s2514_s30, %s2935_s30   ;;  %s2383_s0 = sphi %s2512_s0, %s2934_s0  }
   0x9   : > { %2917 = sst [smem:[#allocation6_spill]] %s2391_s20  ;;  %s1952_s22 = sadd.s32 4294967294, %s2395_s21  }
   0xa   : > { %2918 = sst [smem:[#allocation7_spill]] %s2395_s21  ;;  %s2537_s2 = sadd.s32 1, %s2395_s21  }
   0xb   : > { %2919 = sst [smem:[#allocation8_spill]] %s2537_s2  ;;  %s443_s23 = sadd.s32 1, %s2391_s20 }
   0xc   : > { %s440_s24 = ssub.s32 %s2395_s21, %s2537_s2  ;;  %p453_p0 = scmp.ne.s32.totalorder %s2391_s20, %s2387_s30 }
   0xd   : > { %p441_p1 = scmp.eq.s32.totalorder %s440_s24, 0  ;;  %p454_p2 = scmp.eq.s32.totalorder %s2533_s1, 1 }
   0xe   : > { %p459_p3 = scmp.ne.s32.totalorder %s2387_s30, %s2383_s0  ;;  %p460_p4 = scmp.eq.s32.totalorder %s1952_s22, 1 }
   0xf   : > { %s2548_s25 = scalar_select %p441_p1, %s2391_s20, %s443_s23  }
  0x10   : > { %p2550_p5 = por %p454_p2, %p453_p0  ;;  %p2554_p6 = por %p460_p4, %p459_p3 }
  0x11   : > { %2920 = sst [smem:[#allocation9_spill]] %s2548_s25  ;;  %p1955_p7 = scmp.ge.s32.totalorder %s2395_s21, 1 }
  0x12   : > { %s2922_s26 = scalar_select %p2554_p6, 1, 0 }
  0x13   : > { %p539_p8 = scmp.lt.s32.totalorder %s2395_s21, 3 }
  0x14   : > { %2923 = sst [smem:[#allocation10_spill]] %s2922_s26 }
  0x15   : > { %p540_p9 = pnand %p1955_p7, %p539_p8 }
  0x16   : > { %s2924_s29 = sld [smem:[#allocation14_spill]] (!%p540_p9)  ;;  %v2397_v1 = vmov (!%p540_p9), 0.0   ;;  %vm2398_vm0 = vmmov (!%p540_p9), 0   ;;  %p594_p10 = scmp.lt.s32.totalorder (!%p540_p9), %s2533_s1, 1  ;;  %vm640_vm1 = vcmask (!%p540_p9), 261120   ;;  %vm690_vm2 = vcmask (!%p540_p9), 64512  }
  0x17   : > { %543 = sbr.rel (%p540_p9) target bundleno = 3879 (0xf27), region = 96  ;;  %2076 = vmatprep.subr.bf16.mxu1 (!%p540_p9), %v2397_v1  ;;  %2090 = vmatprep.subr.bf16.mxu0 (!%p540_p9), %v2397_v1  ;;  %s2925_s25 = sld [smem:[#allocation12_spill]] (!%p540_p9)  ;;  %v1960_v9 = vld [vmem:[%s2888_s4] ss:$0 sm:$0xff] (!%p540_p9)  ;;  %vm754_vm3 = vcmask (!%p540_p9), 1043456  }
  0x18   : > { %2080 = vmatprep.mubr.msk.bf16.mxu1 (!%p540_p9), %vm2398_vm0, %v2397_v1  ;;  %2092 = vmatprep.mubr.msk.bf16.mxu0 (!%p540_p9), %vm2398_vm0, %v2397_v1  ;;  %s2926_s23 = sld [smem:[#allocation13_spill]] (!%p540_p9)  ;;  %s2927_s0 = sld [smem:[#allocation11_spill]] (!%p540_p9)  ;;  %v799_v55 = vld [vmem:[%s2889_s5] sm:$0xf] (!%p540_p9)  ;;  %v912_v57 = vld [vmem:[%s2889_s5 + $0x4] sm:$0xf] (!%p540_p9) }
  0x19   : > { %s2402_s2 = smov (!%p540_p9), 64   ;;  %s2403_s26 = smov (!%p540_p9), 56   ;;  %v963_v56 = vsel (!%p540_p9), %vm754_vm3, %v799_v55, 0  ;;  %v917_v58 = vsel (!%p540_p9), %vm754_vm3, %v912_v57, 0  ;;  %v1275_v57 = vld [vmem:[%s2889_s5 + $0xc] sm:$0xf] (!%p540_p9) }
  0x1a   : > { %s2405_s27 = smov (!%p540_p9), 80   ;;  %s591_s28 = sand.u32 (!%p540_p9), 1, %s2387_s30  }
  0x1c   : > { %v2277_v0 = vld [vmem:[%s2924_s29] sm:$0xff] (!%p540_p9)   ;;  %v2278_v2 = vld [vmem:[%s2924_s29 + $0x8] sm:$0xff] (!%p540_p9)   ;;  %s2404_s29 = smov (!%p540_p9), 112  }
  0x1d   : > { %2077 = vmatpush3.bf16.msra.mxu1 (!%p540_p9), %v2277_v0  ;;  %v1958_v3 = vld [vmem:[%s2925_s25] ss:$0 sm:$0xff] (!%p540_p9)  ;;  %s1956_s25 = sshll.u32 (!%p540_p9), %s591_s28, 3 }
  0x1e   : > { %2078 = vmatprep.subr.bf16.mxu1 %v2397_v1  ;;  %s595_s24 = scalar_select %p594_p10, %s2533_s1, 1  ;;  %v1959_v4 = vld [vmem:[%s2926_s23] ss:$0 sm:$0xff] }
  0x1f   : > { %s2411_s23 = smov [#allocation2]  }
  0x20   : > { %s1957_s20 = sshll.u32 %s595_s24, 3  ;;  %s2406_s24 = smov 72  }
  0x21   : > { %2079 = vmatpush3.bf16.msra.mxu1 %v2278_v2  ;;  %s597_s21 = scalar_lea.vmem %s2927_s0, %s1957_s20  ;;  %s2399_s0 = smov 96  }
  0x22   : > { %2084 = vmatprep.subr.bf16.mxu1 %v2397_v1  ;;  %v599_v5 = vld [vmem:[%s597_s21] sm:$0xff]  ;;  %s2400_s20 = smov 120   ;;  %s2401_s21 = smov 88  }
  0x23   : > { %v607_v6 = vmul.f32 %v1958_v3, %v599_v5 }
  0x25   : > { %v615_v7 = vadd.f32 %v1959_v4, %v607_v6 }
  0x27   : > { %v616_v8 = vpack.c.bf16 %v615_v7, %v615_v7 }
  0x29   : > { %2081 = vmatmul.mubr.msk.bf16.vlgmr.msra.gmra.mrb[0].mxu1 %vm640_vm1, %v616_v8 }
  0x2a   : > { %2086 = vmatprep.mubr.msk.bf16.mxu1 %vm2398_vm0, %v2397_v1 }
  0xfc   : > { %v678_v10 = vpop.f32.mrb[0].mxu1 }
  0xfd   : > { %v679_v11 = vadd.f32 %v1960_v9, %v678_v10  ;;  %v2082_v12 = vpop.f32.mrb[1].mxu1 }
  0xfe   : > { %v681_v13 = vpop.f32.mrb[2].mxu1 }
  0xff   : > { %v684_v14 = vmul.f32 0.35355338, %v679_v11  ;;  %v2591_v15 = vpack.c.bf16 %v679_v11, %v679_v11  ;;  %v2083_v16 = vpop.f32.mrb[3].mxu1 }
 0x101   : > { %v2593_v17 = vpack.c.bf16 %v684_v14, %v684_v14  ;;  %688 = vrot.lane.b32.xlu0 %v2591_v15, %s2399_s0  ;;  %s2407_s0 = smov 104  }
 0x103   : > { %801 = vrot.lane.b32.xlu1 %v2593_v17, %s2400_s20  ;;  %s2408_s20 = smov 48  }
 0x105   : > { %803 = vrot.lane.b32.xlu0 %v2591_v15, %s2401_s21  ;;  %s593_s21 = scalar_lea.vmem [#allocation2], %s1956_s25  ;;  %s2337_s25 = sshll.u32 %s2411_s23, 4  ;;  %s2338_s25 = int_to_ptr.vmem [resolvable:$false] %s2337_s25 }
 0x173   : > { %v689_v18 = vpop.permute.xlu0 %688 }
 0x174   : > { %v695_v19 = vsel %vm690_vm2, %v689_v18, 0 }
 0x175   : > { %2085 = vmatpush3.bf16.xpose.msra.mxu1 %v695_v19  ;;  %v802_v22 = vpop.permute.xlu1 %801 }
 0x176   : > { %2096 = vmatprep.subr.bf16.mxu1 %v2397_v1 }
 0x177   : > { %v804_v20 = vpop.permute.xlu0 %803 }
 0x178   : > { %v809_v21 = vsel %vm690_vm2, %v804_v20, 0 }
 0x17c   : > { %2087 = vmatmul.mubr.msk.bf16.vlgmr.msra.gmra.mrb[4].mxu1 %vm690_vm2, %v2593_v17 }
 0x17d   : > { %2097 = vmatpush3.bf16.xpose.msra.mxu1 %v809_v21  ;;  %2098 = vmatprep.mubr.msk.bf16.mxu1 %vm2398_vm0, %v2397_v1 }
 0x17e   : > { %2108 = vmatprep.subr.bf16.mxu1 %v2397_v1 }
 0x184   : > { %2099 = vmatmul.mubr.msk.bf16.vlgmr.msra.gmra.mrb[8].mxu1 %vm690_vm2, %v802_v22 }
 0x185   : > { %2110 = vmatprep.mubr.msk.bf16.mxu1 %vm2398_vm0, %v2397_v1  ;;  %2109 = vmatpush3.bf16.msra.mxu1 %v917_v58 }
 0x186   : > { %2120 = vmatprep.subr.bf16.mxu1 %v2397_v1 }
 0x24f   : > { %v731_v23 = vpop.f32.mrb[4].mxu1 }
 0x250   : > { %v2088_v24 = vpop.f32.mrb[5].mxu1  ;;  %v737_v25 = vsel %vm690_vm2, %v731_v23, -inf }
 0x251   : > { %738 = vmax.xlane.f32.xlu1 %v737_v25  ;;  %v734_v26 = vpop.f32.mrb[6].mxu1 }
 0x252   : > { %v2089_v27 = vpop.f32.mrb[7].mxu1 }
 0x257   : > { %v845_v28 = vpop.f32.mrb[8].mxu1 }
 0x258   : > { %v2100_v29 = vpop.f32.mrb[9].mxu1  ;;  %v851_v30 = vsel %vm690_vm2, %v845_v28, -inf }
 0x259   : > { %852 = vmax.xlane.f32.xlu0 %v851_v30  ;;  %v848_v31 = vpop.f32.mrb[10].mxu1 }
 0x25a   : > { %v2101_v32 = vpop.f32.mrb[11].mxu1 }
 0x2de   : > { %v739_v33 = vpop.xlane.xlu1 %738 }
 0x2df   : > { %v740_v34 = vsub.f32 %v731_v23, %v739_v33 }
 0x2e1   : > { %v741_v35 = vmul.f32 1.442695, %v740_v34 }
 0x2e3   : > { %2311 = vpow2.f32 %v741_v35 }
 0x2e6   : > { %v853_v36 = vpop.xlane.xlu0 %852 }
 0x2e7   : > { %v854_v37 = vsub.f32 %v845_v28, %v853_v36 }
 0x2e9   : > { %v855_v38 = vmul.f32 1.442695, %v854_v37 }
 0x2eb   : > { %2313 = vpow2.f32 %v855_v38  ;;  %v1116_v38 = vld [vmem:[%s2889_s5 + $0x8] sm:$0xf] }
 0x2ed   : > { %v2312_v39 = vpop.eup %2311 }
 0x2ee   : > { %v743_v40 = vsel %vm690_vm2, %v2312_v39, 0.0 }
 0x2ef   : > { %744 = vadd.xlane.f32.xlu0 %v743_v40 }
 0x2f5   : > { %v2314_v41 = vpop.eup %2313 }
 0x2f6   : > { %v857_v42 = vsel %vm690_vm2, %v2314_v41, 0.0 }
 0x2f7   : > { %858 = vadd.xlane.f32.xlu1 %v857_v42 }
 0x305   : > { %749 = vrot.lane.b32.xlu0 %v2591_v15, %s2402_s2  ;;  %s1893_s2 = sshll.u32 %s593_s21, 4  ;;  %s2843_s2 = int_to_ptr.vmem [resolvable:$true] %s1893_s2 }
 0x306   : > { %s2333_s22 = scalar_lea.vmem %s2843_s2, 128  ;;  %p2340_p0 = scmp.lt.s32.totalorder %s2843_s2, %s2338_s25 }
 0x307   : > { %p2334_p11 = scmp.ne.s32.totalorder %s2843_s2, %s2333_s22 }
 0x308   : > { %863 = vrot.lane.b32.xlu1 %v2591_v15, %s2403_s26  ;;  %s2409_s26 = smov 40  }
 0x309   : > { %1005 = vrot.lane.b32.xlu0 %v2593_v17, %s2404_s29  ;;  %p2335_p12 = pnand %p2334_p11, %p2550_p5 }
 0x30b   : > { %p2336_p13 = pneg %p2335_p12 }
 0x30c   : > { %1007 = vrot.lane.b32.xlu1 %v2591_v15, %s2405_s27 }
 0x37c   : > { %v745_v43 = vpop.xlane.xlu0 %744 }
 0x37d   : > { %2315 = vrcp.f32 %v745_v43 }
 0x380   : > { %v750_v44 = vpop.permute.xlu0 %749 }
 0x381   : > { %v756_v45 = vsel %vm754_vm3, %v750_v44, 0 }
 0x382   : > { %2091 = vmatpush3.bf16.msra.mxu0 %v756_v45 }
 0x383   : > { %2102 = vmatprep.subr.bf16.mxu0 %v2397_v1 }
 0x384   : > { %v859_v46 = vpop.xlane.xlu1 %858  ;;  %v1006_v8 = vpop.permute.xlu0 %1005 }
 0x385   : > { %2317 = vrcp.f32 %v859_v46 }
 0x387   : > { %v2316_v47 = vpop.eup %2315 }
 0x388   : > { %v747_v48 = vmul.f32 %v2316_v47, %v2312_v39  ;;  %v864_v49 = vpop.permute.xlu1 %863  ;;  %v1121_v39 = vsel %vm754_vm3, %v1116_v38, 0 }
 0x389   : > { %v869_v51 = vsel %vm754_vm3, %v864_v49, 0 }
 0x38a   : > { %v748_v50 = vpack.c.bf16 %v747_v48, %v747_v48 }
 0x38c   : > { %2093 = vmatmul.mubr.msk.bf16.vlgmr.msra.gmra.mrb[0].mxu0 %vm690_vm2, %v748_v50  ;;  %v1008_v0 = vpop.permute.xlu1 %1007 }
 0x38d   : > { %2103 = vmatpush3.bf16.msra.mxu0 %v869_v51  ;;  %2104 = vmatprep.mubr.msk.bf16.mxu0 %vm2398_vm0, %v2397_v1  ;;  %v1013_v6 = vsel %vm690_vm2, %v1008_v0, 0 }
 0x38e   : > { %2114 = vmatprep.subr.bf16.mxu0 %v2397_v1 }
 0x38f   : > { %v2318_v52 = vpop.eup %2317 }
 0x390   : > { %v861_v53 = vmul.f32 %v2318_v52, %v2314_v41 }
 0x392   : > { %v862_v54 = vpack.c.bf16 %v861_v53, %v861_v53 }
 0x394   : > { %2105 = vmatmul.mubr.msk.bf16.vlgmr.msra.gmra.mrb[4].mxu0 %vm690_vm2, %v862_v54 }
 0x395   : > { %2116 = vmatprep.mubr.msk.bf16.mxu0 %vm2398_vm0, %v2397_v1  ;;  %2115 = vmatpush3.bf16.msra.mxu0 %v963_v56 }
 0x396   : > { %2126 = vmatprep.subr.bf16.mxu0 %v2397_v1 }
 0x45f   : > { %v792_v59 = vpop.f32.mrb[0].mxu0 }
 0x460   : > { %v798_v60 = vpack.c.bf16 %v792_v59, %v792_v59  ;;  %v2094_v61 = vpop.f32.mrb[1].mxu0 }
 0x461   : > { %v795_v62 = vpop.f32.mrb[2].mxu0 }
 0x462   : > { %v2095_v63 = vpop.f32.mrb[3].mxu0  ;;  %2117 = vmatmul.mubr.msk.bf16.vlgmr.msra.gmra.mrb[8].mxu0 %vm690_vm2, %v798_v60 }
 0x463   : > { %2128 = vmatprep.mubr.msk.bf16.mxu0 %vm2398_vm0, %v2397_v1 }
 0x467   : > { %v905_v2 = vpop.f32.mrb[4].mxu0 }
 0x468   : > { %v911_v3 = vpack.c.bf16 %v905_v2, %v905_v2  ;;  %v2106_v4 = vpop.f32.mrb[5].mxu0 }
 0x469   : > { %v908_v5 = vpop.f32.mrb[6].mxu0 }
 0x46a   : > { %v2107_v7 = vpop.f32.mrb[7].mxu0  ;;  %2111 = vmatmul.mubr.msk.bf16.vlgmr.msra.gmra.mrb[12].mxu1 %vm690_vm2, %v911_v3 }
 0x46b   : > { %2121 = vmatpush3.bf16.xpose.msra.mxu1 %v1013_v6  ;;  %2122 = vmatprep.mubr.msk.bf16.mxu1 %vm2398_vm0, %v2397_v1 }
 0x46c   : > { %2132 = vmatprep.subr.bf16.mxu1 %v2397_v1 }
 0x472   : > { %2123 = vmatmul.mubr.msk.bf16.vlgmr.msra.gmra.mrb[16].mxu1 %vm690_vm2, %v1006_v8 }
 0x473   : > { %2134 = vmatprep.mubr.msk.bf16.mxu1 %vm2398_vm0, %v2397_v1  ;;  %2133 = vmatpush3.bf16.msra.mxu1 %v1121_v39 }
 0x474   : > { %2144 = vmatprep.subr.bf16.mxu1 %v2397_v1 }
 0x535   : > { %v999_v9 = vpop.f32.mrb[8].mxu0 }
 0x536   : > { %v2118_v10 = vpop.f32.mrb[9].mxu0 }
 0x537   : > { %v1002_v11 = vpop.f32.mrb[10].mxu0  ;;  %v2280_v10 = vld [vmem:[%s2891_s7 + $0x8] sm:$0xff]  }
 0x538   : > { %v2119_v12 = vpop.f32.mrb[11].mxu0  ;;  %v2281_v11 = vld [vmem:[%s2893_s9] sm:$0xff]  }
 0x539   : > { %v2282_v12 = vld [vmem:[%s2893_s9 + $0x8] sm:$0xff]  }
 0x53d   : > { %v953_v13 = vpop.f32.mrb[12].mxu1 }
 0x53e   : > { %v2648_v14 = vadd.f32 %v999_v9, %v953_v13  ;;  %v2112_v16 = vpop.f32.mrb[13].mxu1  ;;  %v2279_v9 = vld [vmem:[%s2891_s7] sm:$0xff]   ;;  %v2283_v13 = vld [vmem:[%s2893_s9 + $0x10] sm:$0xff]  }
 0x53f   : > { %v956_v18 = vpop.f32.mrb[14].mxu1  ;;  %v2285_v16 = vld [vmem:[%s2893_s9 + $0x20] sm:$0xff]  }
 0x540   : > { %v2113_v19 = vpop.f32.mrb[15].mxu1  ;;  %v2286_v18 = vld [vmem:[%s2893_s9 + $0x28] sm:$0xff]  }
 0x545   : > { %v1049_v20 = vpop.f32.mrb[16].mxu1 }
 0x546   : > { %v2124_v21 = vpop.f32.mrb[17].mxu1  ;;  %v1055_v22 = vsel %vm690_vm2, %v1049_v20, -inf }
 0x547   : > { %1056 = vmax.xlane.f32.xlu1 %v1055_v22  ;;  %v1052_v23 = vpop.f32.mrb[18].mxu1 }
 0x548   : > { %v2125_v24 = vpop.f32.mrb[19].mxu1 }
 0x558   : > { %1166 = vrot.lane.b32.xlu1 %v2591_v15, %s2406_s24  ;;  %s2339_s24 = scalar_lea.vmem %s2338_s25, 256 }
 0x559   : > { %p2341_p1 = scmp.lt.s32.totalorder %s2339_s24, %s2333_s22 }
 0x55b   : > { %p2342_p2 = por %p2341_p1, %p2340_p0 }
 0x55c   : > { %1164 = vrot.lane.b32.xlu1 %v2593_v17, %s2407_s0 }
 0x55d   : > { %p2343_p3 = pnand %p2342_p2, %p2336_p13 }
 0x5d4   : > { %v1057_v25 = vpop.xlane.xlu1 %1056 }
 0x5d5   : > { %v1058_v26 = vsub.f32 %v1049_v20, %v1057_v25  ;;  %v1976_v20 = vld [vmem:[%s2890_s6] ss:$0 sm:$0xff] }
 0x5d7   : > { %v1059_v27 = vmul.f32 1.442695, %v1058_v26 }
 0x5d8   : > { %v1167_v34 = vpop.permute.xlu1 %1166 }
 0x5d9   : > { %2319 = vpow2.f32 %v1059_v27  ;;  %v1172_v36 = vsel %vm690_vm2, %v1167_v34, 0  ;;  %v2287_v27 = vld [vmem:[%s2893_s9 + $0x30] sm:$0xff]  }
 0x5dc   : > { %v1165_v37 = vpop.permute.xlu1 %1164 }
 0x5e3   : > { %v2320_v28 = vpop.eup %2319 }
 0x5e4   : > { %v1061_v29 = vsel %vm690_vm2, %v2320_v28, 0.0 }
 0x5e5   : > { %1062 = vadd.xlane.f32.xlu0 %v1061_v29  ;;  %v1977_v29 = vld [vmem:[%s2892_s8] ss:$0 sm:$0xff] }
 0x5fb   : > { %1067 = vrot.lane.b32.xlu0 %v2591_v15, %s2408_s20  ;;  %s2016_s20 = sshll.u32 %s2533_s1, 7  ;;  %s1880_s1 = scalar_lea.sflag [#allocation3], %s591_s28 }
 0x5fc   : > { %s2841_s27 = scalar_lea.hbm %s2903_s19, %s2016_s20 }
 0x672   : > { %v1063_v30 = vpop.xlane.xlu0 %1062 }
 0x673   : > { %2321 = vrcp.f32 %v1063_v30 }
 0x676   : > { %v1068_v31 = vpop.permute.xlu0 %1067 }
 0x677   : > { %v1073_v32 = vsel %vm754_vm3, %v1068_v31, 0 }
 0x678   : > { %2127 = vmatpush3.bf16.msra.mxu0 %v1073_v32 }
 0x679   : > { %2138 = vmatprep.subr.bf16.mxu0 %v2397_v1 }
 0x67d   : > { %v2322_v17 = vpop.eup %2321 }
 0x67e   : > { %v1065_v33 = vmul.f32 %v2322_v17, %v2320_v28  ;;  %v2288_v28 = vld [vmem:[%s2893_s9 + $0x38] sm:$0xff]  }
 0x680   : > { %v1066_v35 = vpack.c.bf16 %v1065_v33, %v1065_v33 }
 0x682   : > { %2129 = vmatmul.mubr.msk.bf16.vlgmr.msra.gmra.mrb[12].mxu0 %vm690_vm2, %v1066_v35 }
 0x683   : > { %2139 = vmatpush3.bf16.xpose.msra.mxu0 %v1172_v36  ;;  %2140 = vmatprep.mubr.msk.bf16.mxu0 %vm2398_vm0, %v2397_v1  ;;  %v1981_v36 = vld [vmem:[%s2894_s10] ss:$0 sm:$0xff] }
 0x684   : > { %2150 = vmatprep.subr.bf16.mxu0 %v2397_v1 }
 0x68a   : > { %2141 = vmatmul.mubr.msk.bf16.vlgmr.msra.gmra.mrb[16].mxu0 %vm690_vm2, %v1165_v37 }
 0x68b   : > { %2152 = vmatprep.mubr.msk.bf16.mxu0 %vm2398_vm0, %v2397_v1 }
 0x755   : > { %v1109_v40 = vpop.f32.mrb[12].mxu0 }
 0x756   : > { %v1115_v41 = vpack.c.bf16 %v1109_v40, %v1109_v40  ;;  %v2130_v42 = vpop.f32.mrb[13].mxu0 }
 0x757   : > { %v1112_v43 = vpop.f32.mrb[14].mxu0 }
 0x758   : > { %v2131_v44 = vpop.f32.mrb[15].mxu0  ;;  %2135 = vmatmul.mubr.msk.bf16.vlgmr.msra.gmra.mrb[20].mxu1 %vm690_vm2, %v1115_v41 }
 0x759   : > { %2146 = vmatprep.mubr.msk.bf16.mxu1 %vm2398_vm0, %v2397_v1 }
 0x75d   : > { %v1208_v45 = vpop.f32.mrb[16].mxu0 }
 0x75e   : > { %v2142_v46 = vpop.f32.mrb[17].mxu0  ;;  %v1214_v47 = vsel %vm690_vm2, %v1208_v45, -inf }
 0x75f   : > { %1215 = vmax.xlane.f32.xlu0 %v1214_v47  ;;  %v1211_v48 = vpop.f32.mrb[18].mxu0 }
 0x760   : > { %v2143_v49 = vpop.f32.mrb[19].mxu0 }
 0x775   : > { %1226 = vrot.lane.b32.xlu0 %v2591_v15, %s2409_s26  ;;  %v1280_v15 = vsel %vm754_vm3, %v1275_v57, 0  ;;  %v2297_v57 = vld [vmem:[%s2901_s17 + $0x10] sm:$0xff]  }
 0x776   : > { %2151 = vmatpush3.bf16.msra.mxu0 %v1280_v15  ;;  %v2298_v15 = vld [vmem:[%s2901_s17 + $0x18] sm:$0xff]  }
 0x777   : > { %2164 = vmatprep.subr.bf16.mxu0 %v2397_v1 }
 0x7ec   : > { %v1216_v50 = vpop.xlane.xlu0 %1215 }
 0x7ed   : > { %v1217_v51 = vsub.f32 %v1208_v45, %v1216_v50  ;;  %v2291_v50 = vld [vmem:[%s2897_s13 + $0x4] ss:$8 sps:$4 sm:$0xff]  }
 0x7ef   : > { %v1218_v52 = vmul.f32 1.442695, %v1217_v51  ;;  %v2289_v51 = vld [vmem:[%s2897_s13] ss:$8 sps:$4 sm:$0xff]  }
 0x7f0   : > { %v1227_v53 = vpop.permute.xlu0 %1226 }
 0x7f1   : > { %2323 = vpow2.f32 %v1218_v52  ;;  %v1232_v54 = vsel %vm754_vm3, %v1227_v53, 0  ;;  %v2292_v52 = vld [vmem:[%s2897_s13 + $0x10] ss:$8 sps:$4 sm:$0xff]   ;;  %v2294_v53 = vld [vmem:[%s2897_s13 + $0x14] ss:$8 sps:$4 sm:$0xff]  }
 0x7f2   : > { %2145 = vmatpush3.bf16.msra.mxu1 %v1232_v54  ;;  %v2410_v54 = vmov 0  }
 0x7f3   : > { %2156 = vmatprep.subr.bf16.mxu1 %v2397_v1 }
 0x7fb   : > { %v2324_v55 = vpop.eup %2323 }
 0x7fc   : > { %v1220_v56 = vsel %vm690_vm2, %v2324_v55, 0.0 }
 0x7fd   : > { %1221 = vadd.xlane.f32.xlu1 %v1220_v56  ;;  %v2296_v56 = vld [vmem:[%s2901_s17 + $0x8] sm:$0xff]  }
 0x82b   : > { %v1157_v58 = vpop.f32.mrb[20].mxu1 }
 0x82c   : > { %v1163_v59 = vadd.f32 %v1157_v58, %v2648_v14  ;;  %v2136_v60 = vpop.f32.mrb[21].mxu1  ;;  %v2284_v14 = vld [vmem:[%s2893_s9 + $0x18] sm:$0xff]   ;;  %v2299_v58 = vld [vmem:[%s2901_s17 + $0x20] sm:$0xff]  }
 0x82d   : > { %v1160_v61 = vpop.f32.mrb[22].mxu1 }
 0x82e   : > { %v2137_v62 = vpop.f32.mrb[23].mxu1 }
 0x88a   : > { %v1222_v63 = vpop.xlane.xlu1 %1221 }
 0x88b   : > { %2325 = vrcp.f32 %v1222_v63 }
 0x895   : > { %v2326_v0 = vpop.eup %2325 }
 0x896   : > { %v1224_v2 = vmul.f32 %v2326_v0, %v2324_v55  ;;  %v2295_v55 = vld [vmem:[%s2901_s17] sm:$0xff]  }
 0x897   : > { %v1990_v0 = vld [vmem:[%s2895_s11] ss:$0 sm:$0xff] }
 0x898   : > { %v1225_v3 = vpack.c.bf16 %v1224_v2, %v1224_v2 }
 0x89a   : > { %2147 = vmatmul.mubr.msk.bf16.vlgmr.msra.gmra.mrb[24].mxu1 %vm690_vm2, %v1225_v3  ;;  %v1991_v3 = vld [vmem:[%s2896_s12] ss:$0 sm:$0xff] }
 0x89b   : > { %2160 = vmatprep.mubr.msk.bf16.mxu1 %vm2398_vm0, %v2397_v1  ;;  %2157 = vmatpush3.bf16.msra.mxu1 %v2279_v9  ;;  %v2303_v9 = vld [vmem:[%s2899_s15] sm:$0xff]  }
 0x89c   : > { %2158 = vmatprep.subr.bf16.mxu1 %v2397_v1 }
 0x89f   : > { %2159 = vmatpush3.bf16.msra.mxu1 %v2280_v10  ;;  %v2304_v10 = vld [vmem:[%s2899_s15 + $0x8] sm:$0xff]  }
 0x8a0   : > { %1583 = vmatprep.subr.bf16.mxu1 %v2291_v50 }
 0x96d   : > { %v1268_v4 = vpop.f32.mrb[24].mxu1 }
 0x96e   : > { %v1274_v5 = vpack.c.bf16 %v1268_v4, %v1268_v4  ;;  %v2148_v6 = vpop.f32.mrb[25].mxu1 }
 0x96f   : > { %v1271_v7 = vpop.f32.mrb[26].mxu1 }
 0x970   : > { %v2149_v8 = vpop.f32.mrb[27].mxu1  ;;  %2153 = vmatmul.mubr.msk.bf16.vlgmr.msra.gmra.mrb[20].mxu0 %vm690_vm2, %v1274_v5  ;;  %v2301_v7 = vld [vmem:[%s2901_s17 + $0x30] sm:$0xff]  }
 0x971   : > { %2180 = vmatprep.mubr.msk.bf16.mxu0 %vm2398_vm0, %v2397_v1  ;;  %2165 = vmatpush3.bf16.msra.mxu0 %v2281_v11  ;;  %v2302_v8 = vld [vmem:[%s2901_s17 + $0x38] sm:$0xff]   ;;  %v2305_v11 = vld [vmem:[%s2899_s15 + $0x10] sm:$0xff]  }
 0x972   : > { %2166 = vmatprep.subr.bf16.mxu0 %v2397_v1 }
 0x975   : > { %2167 = vmatpush3.bf16.msra.mxu0 %v2282_v12  ;;  %v2306_v12 = vld [vmem:[%s2899_s15 + $0x18] sm:$0xff]  }
 0x976   : > { %2168 = vmatprep.subr.bf16.mxu0 %v2397_v1 }
 0x979   : > { %2169 = vmatpush3.bf16.msra.mxu0 %v2283_v13  ;;  %v2307_v13 = vld [vmem:[%s2899_s15 + $0x20] sm:$0xff]  }
 0x97a   : > { %2170 = vmatprep.subr.bf16.mxu0 %v2397_v1 }
 0x97d   : > { %2171 = vmatpush3.bf16.msra.mxu0 %v2284_v14  ;;  %v2308_v14 = vld [vmem:[%s2899_s15 + $0x28] sm:$0xff]  }
 0x97e   : > { %2172 = vmatprep.subr.bf16.mxu0 %v2397_v1 }
 0x981   : > { %2173 = vmatpush3.bf16.msra.mxu0 %v2285_v16  ;;  %v2309_v16 = vld [vmem:[%s2899_s15 + $0x30] sm:$0xff]  }
 0x982   : > { %2174 = vmatprep.subr.bf16.mxu0 %v2397_v1 }
 0x985   : > { %2175 = vmatpush3.bf16.msra.mxu0 %v2286_v18  ;;  %v2310_v18 = vld [vmem:[%s2899_s15 + $0x38] sm:$0xff]  }
 0x986   : > { %2176 = vmatprep.subr.bf16.mxu0 %v2397_v1 }
 0x989   : > { %2177 = vmatpush3.bf16.msra.mxu0 %v2287_v27 }
 0x98a   : > { %2178 = vmatprep.subr.bf16.mxu0 %v2397_v1 }
 0x98d   : > { %2179 = vmatpush3.bf16.msra.mxu0 %v2288_v28 }
 0x98e   : > { %2204 = vmatprep.subr.bf16.mxu0 %v2397_v1 }
 0xa43   : > { %v1316_v19 = vpop.f32.mrb[20].mxu0 }
 0xa44   : > { %v1322_v21 = vadd.f32 %v1316_v19, %v1163_v59  ;;  %v2154_v22 = vpop.f32.mrb[21].mxu0  ;;  %v2300_v59 = vld [vmem:[%s2901_s17 + $0x28] sm:$0xff]   ;;  %v1550_v19 = vlaneseq }
 0xa45   : > { %v1319_v23 = vpop.f32.mrb[22].mxu0  ;;  %v1548_v22 = vld [vmem:[%s2898_s14] sm:$0x3] }
 0xa46   : > { %v1330_v24 = vadd.f32 %v1976_v20, %v1322_v21  ;;  %v2155_v25 = vpop.f32.mrb[23].mxu0  ;;  %v1551_v20 = vshrl.u32 %v1550_v19, 7 }
 0xa48   : > { %v1331_v26 = vpack.c.bf16 %v1330_v24, %v1330_v24  ;;  %v1552_v21 = vsub.s32 0, %v1551_v20  ;;  %v1556_v23 = vsub.s32 1, %v1551_v20 }
 0xa4a   : > { %2161 = vmatmul.mubr.msk.bf16.vlgmr.msra.gmra.mrb[28].mxu1 %vm640_vm1, %v1331_v26  ;;  %v1557_v25 = vrot.slane %v1548_v22, %v1556_v23 }
 0xa4b   : > { %1584 = vmatpush1.bf16.msra.mxu1 %v2289_v51  ;;  %1615 = vmatprep.mubr.bf16.mxu1 %v2410_v54 }
 0xa4c   : > { %1585 = vmatprep.subr.bf16.mxu1 %v2294_v53 }
 0xa4f   : > { %1586 = vmatpush1.bf16.msra.mxu1 %v2292_v52 }
 0xa50   : > { %2184 = vmatprep.subr.bf16.mxu1 %v2397_v1 }
 0xb1d   : > { %v1392_v30 = vpop.f32.mrb[28].mxu1 }
 0xb1e   : > { %v1393_v31 = vadd.f32 %v1977_v29, %v1392_v30  ;;  %v2162_v32 = vpop.f32.mrb[29].mxu1 }
 0xb1f   : > { %v1395_v17 = vpop.f32.mrb[30].mxu1 }
 0xb20   : > { %v1398_v33 = vmax.f32 %v1393_v31, 0.0  ;;  %v2163_v34 = vpop.f32.mrb[31].mxu1 }
 0xb22   : > { %v1399_v35 = vpack.c.bf16 %v1398_v33, %v1398_v33 }
 0xb24   : > { %2181 = vmatmul.mubr.bf16.vlgmr.msra.gmra.mrb[24].mxu0 %v1399_v35 }
 0xb25   : > { %2220 = vmatprep.mubr.msk.bf16.mxu0 %vm2398_vm0, %v2397_v1  ;;  %2205 = vmatpush3.bf16.msra.mxu0 %v2295_v55 }
 0xb26   : > { %2206 = vmatprep.subr.bf16.mxu0 %v2397_v1 }
 0xb29   : > { %2207 = vmatpush3.bf16.msra.mxu0 %v2296_v56 }
 0xb2a   : > { %2208 = vmatprep.subr.bf16.mxu0 %v2397_v1 }
 0xb2d   : > { %2209 = vmatpush3.bf16.msra.mxu0 %v2297_v57 }
 0xb2e   : > { %2210 = vmatprep.subr.bf16.mxu0 %v2397_v1 }
 0xb31   : > { %2211 = vmatpush3.bf16.msra.mxu0 %v2298_v15 }
 0xb32   : > { %2212 = vmatprep.subr.bf16.mxu0 %v2397_v1 }
 0xb35   : > { %2213 = vmatpush3.bf16.msra.mxu0 %v2299_v58 }
 0xb36   : > { %2214 = vmatprep.subr.bf16.mxu0 %v2397_v1 }
 0xb39   : > { %2215 = vmatpush3.bf16.msra.mxu0 %v2300_v59 }
 0xb3a   : > { %2216 = vmatprep.subr.bf16.mxu0 %v2397_v1 }
 0xb3d   : > { %2217 = vmatpush3.bf16.msra.mxu0 %v2301_v7 }
 0xb3e   : > { %2218 = vmatprep.subr.bf16.mxu0 %v2397_v1 }
 0xb41   : > { %2219 = vmatpush3.bf16.msra.mxu0 %v2302_v8 }
 0xbf7   : > { %v1505_v37 = vpop.f32.mrb[24].mxu0 }
 0xbf8   : > { %v1506_v38 = vadd.f32 %v1981_v36, %v1505_v37  ;;  %v2182_v39 = vpop.f32.mrb[25].mxu0 }
 0xbf9   : > { %v1508_v40 = vpop.f32.mrb[26].mxu0 }
 0xbfa   : > { %v1511_v41 = vmul.f32 0.1, %v1506_v38  ;;  %v2183_v42 = vpop.f32.mrb[27].mxu0 }
 0xbfc   : > { %v1512_v43 = vadd.f32 %v1511_v41, %v1330_v24  ;;  %v1553_v24 = vrot.slane %v1548_v22, %v1552_v21 }
 0xbfe   : > { %v1513_v44 = vsel %vm640_vm1, %v1512_v43, 0.0 }
 0xbff   : > { %1514 = vadd.xlane.f32.xlu1 %v1513_v44 }
 0xc8c   : > { %v1515_v45 = vpop.xlane.xlu1 %1514 }
 0xc8d   : > { %v1517_v46 = vmul.f32 0.03125, %v1515_v45 }
 0xc8f   : > { %v1518_v47 = vsub.f32 %v1512_v43, %v1517_v46 }
 0xc91   : > { %v1519_v48 = vmul.f32 %v1518_v47, %v1518_v47 }
 0xc93   : > { %v1520_v49 = vsel %vm640_vm1, %v1519_v48, 0.0 }
 0xc94   : > { %1521 = vadd.xlane.f32.xlu1 %v1520_v49 }
 0xd21   : > { %v1522_v60 = vpop.xlane.xlu1 %1521 }
 0xd22   : > { %v1523_v61 = vmul.f32 0.03125, %v1522_v60 }
 0xd24   : > { %v1524_v62 = vadd.f32 1e-12, %v1523_v61  ;;  %v2006_v61 = vld [vmem:[%s2902_s18] ss:$0 sm:$0xff] }
 0xd26   : > { %2327 = vrsqrt.f32 %v1524_v62 }
 0xd30   : > { %v2328_v63 = vpop.eup %2327 }
 0xd31   : > { %v1526_v2 = vmul.f32 %v2328_v63, %v1518_v47  ;;  %v1997_v63 = vld [vmem:[%s2900_s16] ss:$0 sm:$0xff] }
 0xd33   : > { %v1534_v4 = vmul.f32 %v1990_v0, %v1526_v2 }
 0xd35   : > { %v1542_v5 = vadd.f32 %v1991_v3, %v1534_v4 }
 0xd37   : > { %v1543_v6 = vpack.c.bf16 %v1542_v5, %v1542_v5 }
 0xd39   : > { %1996 = vmatmul.mubr.msk.bf16.vlgmr.msra.gmra.mrb[32].mxu1 %vm640_vm1, %v1543_v6 }
 0xd3a   : > { %2200 = vmatprep.mubr.msk.bf16.mxu1 %vm2398_vm0, %v2397_v1  ;;  %2185 = vmatpush3.bf16.msra.mxu1 %v2303_v9 }
 0xd3b   : > { %2186 = vmatprep.subr.bf16.mxu1 %v2397_v1 }
 0xd3e   : > { %2187 = vmatpush3.bf16.msra.mxu1 %v2304_v10 }
 0xd3f   : > { %2188 = vmatprep.subr.bf16.mxu1 %v2397_v1 }
 0xd42   : > { %2189 = vmatpush3.bf16.msra.mxu1 %v2305_v11 }
 0xd43   : > { %2190 = vmatprep.subr.bf16.mxu1 %v2397_v1 }
 0xd46   : > { %2191 = vmatpush3.bf16.msra.mxu1 %v2306_v12 }
 0xd47   : > { %2192 = vmatprep.subr.bf16.mxu1 %v2397_v1 }
 0xd4a   : > { %2193 = vmatpush3.bf16.msra.mxu1 %v2307_v13 }
 0xd4b   : > { %2194 = vmatprep.subr.bf16.mxu1 %v2397_v1 }
 0xd4e   : > { %2195 = vmatpush3.bf16.msra.mxu1 %v2308_v14 }
 0xd4f   : > { %2196 = vmatprep.subr.bf16.mxu1 %v2397_v1 }
 0xd52   : > { %2197 = vmatpush3.bf16.msra.mxu1 %v2309_v16 }
 0xd53   : > { %2198 = vmatprep.subr.bf16.mxu1 %v2397_v1 }
 0xd56   : > { %2199 = vmatpush3.bf16.msra.mxu1 %v2310_v18 }
 0xe0c   : > { %v1617_v26 = vpop.f32.mrb[32].mxu1 }
 0xe0d   : > { %v1618_v27 = vadd.f32 %v1617_v26, %v1553_v24  ;;  %v1619_v28 = vpop.f32.mrb[33].mxu1 }
 0xe0e   : > { %v1620_v29 = vadd.f32 %v1619_v28, %v1557_v25  ;;  %v1621_v1 = vpop.f32.mrb[34].mxu1 }
 0xe0f   : > { %v1625_v30 = vmul.f32 0.70710677, %v1618_v27  ;;  %v1622_v31 = vpop.f32.mrb[35].mxu1  ;;  %v1624_v54 = vmul.f32 0.5, %v1618_v27 }
 0xe10   : > { %v1651_v32 = vmax.f32 %v1620_v29, 0.0 }
 0xe11   : > { %v1626_v17 = vand.u32 2147483647, %v1625_v30  ;;  %vm1646_vm4 = vcmp.ge.f32.partialorder %v1625_v30, 0.0 }
 0xe12   : > { %v1764_v33 = vpack.c.bf16 %v1651_v32, %v1651_v32 }
 0xe13   : > { %v1627_v34 = vmul.f32 0.3275911, %v1626_v17  ;;  %v1640_v36 = vsub.f32 0.0, %v1626_v17 }
 0xe14   : > { %2221 = vmatmul.mubr.bf16.vlgmr.msra.gmra.mrb[28].mxu0 %v1764_v33 }
 0xe15   : > { %v1628_v35 = vadd.f32 1.0, %v1627_v34  ;;  %v1641_v38 = vmul.f32 %v1640_v36, %v1626_v17 }
 0xe17   : > { %2329 = vrcp.f32 %v1628_v35  ;;  %v1642_v41 = vmul.f32 1.442695, %v1641_v38 }
 0xe19   : > { %2331 = vpow2.f32 %v1642_v41 }
 0xe21   : > { %v2330_v37 = vpop.eup %2329 }
 0xe22   : > { %v1631_v39 = vmul.f32 1.0614054, %v2330_v37 }
 0xe23   : > { %v2332_v49 = vpop.eup %2331 }
 0xe24   : > { %v1632_v40 = vadd.f32 -1.4531521, %v1631_v39 }
 0xe26   : > { %v1633_v42 = vmul.f32 %v2330_v37, %v1632_v40 }
 0xe28   : > { %v1634_v43 = vadd.f32 1.4214138, %v1633_v42 }
 0xe2a   : > { %v1635_v44 = vmul.f32 %v2330_v37, %v1634_v43 }
 0xe2c   : > { %v1636_v45 = vadd.f32 -0.28449672, %v1635_v44 }
 0xe2e   : > { %v1637_v46 = vmul.f32 %v2330_v37, %v1636_v45 }
 0xe30   : > { %v1638_v47 = vadd.f32 0.2548296, %v1637_v46 }
 0xe32   : > { %v1639_v48 = vmul.f32 %v2330_v37, %v1638_v47 }
 0xe34   : > { %v1644_v50 = vmul.f32 %v2332_v49, %v1639_v48 }
 0xe36   : > { %v1645_v51 = vsub.f32 1.0, %v1644_v50 }
 0xe38   : > { %v1647_v52 = vsub.f32 0.0, %v1645_v51 }
 0xe3a   : > { %v1648_v53 = vsel %vm1646_vm4, %v1645_v51, %v1647_v52 }
 0xe3b   : > { %v1649_v55 = vadd.f32 1.0, %v1648_v53 }
 0xe3d   : > { %v1650_v56 = vmul.f32 %v1649_v55, %v1624_v54 }
 0xe3f   : > { %v1652_v57 = vpack.c.bf16 %v1650_v56, %v1650_v56 }
 0xe41   : > { %2201 = vmatmul.mubr.bf16.vlgmr.msra.gmra.mrb[36].mxu1 %v1652_v57 }
 0xee7   : > { %v1870_v15 = vpop.f32.mrb[28].mxu0 }
 0xee8   : > { %v2222_v58 = vpop.f32.mrb[29].mxu0  ;;  %v1871_v62 = vadd.f32 %v2006_v61, %v1870_v15 }
 0xee9   : > { %v1873_v59 = vpop.f32.mrb[30].mxu0 }
 0xeea   : > { %v2223_v60 = vpop.f32.mrb[31].mxu0  ;;  %v1876_v2 = vmul.f32 0.1, %v1871_v62 }
 0xf14   : > { %v1758_v0 = vpop.f32.mrb[36].mxu1 }
 0xf15   : > { %v1759_v3 = vadd.f32 %v1997_v63, %v1758_v0  ;;  %v2202_v4 = vpop.f32.mrb[37].mxu1 }
 0xf16   : > { %v1761_v5 = vpop.f32.mrb[38].mxu1 }
 0xf17   : > { %v1877_v6 = vadd.f32 %v1876_v2, %v1759_v3  ;;  %v2203_v7 = vpop.f32.mrb[39].mxu1 }
 0xf19   : > { %1878 = vst.msk [vmem:[%s593_s21] sm:$0xff] %vm640_vm1, %v1877_v6 }
 0xf1a   : > { %2346 = shalt.err (!%p2343_p3)
}
 0xf1b   : > { %s2347_s28 = scalar_lea.hbm %s2841_s27, 128  ;;  %s2351_s21 = scalar_lea.hbm %s2903_s19, 256 }
 0xf1c   : > { %p2348_p4 = scmp.ne.s32.totalorder %s2841_s27, %s2347_s28  ;;  %p2352_p9 = scmp.lt.u32.totalorder %s2841_s27, %s2903_s19 }
 0xf1d   : > { %p2353_p10 = scmp.lt.u32.totalorder %s2351_s21, %s2347_s28  ;;  %p2355_p12 = scmp.lt.u32.totalorder %s2347_s28, %s2841_s27 }
 0xf1e   : > { %p2349_p7 = pnand %p2348_p4, %p2550_p5 }
 0xf1f   : > { %p2354_p11 = por %p2353_p10, %p2352_p9 }
 0xf20   : > { %p2350_p8 = pneg %p2349_p7 }
 0xf21   : > { %p2356_p13 = por %p2355_p12, %p2354_p11 }
 0xf23   : > { %p2357_p0 = pnand %p2356_p13, %p2350_p8 }
 0xf25   : > { %2360 = shalt.err (!%p2357_p0)
}
 0xf26   : > { %2224 = dma.vmem_to_hbm [thread:$0]  (%p2550_p5), %s2843_s2, 128, %s2841_s27, %s1880_s1  }
 0xf27 PF: > { %s2928_s22 = sld [smem:[#allocation7_spill]]  ;;  %s2929_s23 = sld [smem:[#allocation5_spill]] }
 0xf2d   : > { %p2230_p1 = scmp.ge.s32.totalorder %s2928_s22, 2  ;;  %s1905_s24 = sand.u32 1, %s2929_s23  }
 0xf2e   : > { %s1906_s0 = scalar_lea.sflag [#allocation3], %s1905_s24 }
 0xf2f   : > { %p2227_p2 = pnand %p2230_p1, %p2554_p6 }
 0xf31   : > { %2378 = dma.done.wait (!%p2227_p2), %s1906_s0, 128  }
 0xf32   : > { %2380 = vsyncadd (!%p2227_p2), %s1906_s0, 4294967168  ;;  %s2931_s21 = sld [smem:[#allocation8_spill]]  ;;  %s2932_s28 = sld [smem:[#allocation6_spill]] }
 0xf33   : > { %s2933_s20 = sld [smem:[#allocation9_spill]]  ;;  %s2934_s0 = smov %s2387_s30 }
 0xf38   : > { %p29_p3 = scmp.ge.s32.totalorder %s2931_s21, 4   ;;  %s2935_s30 = smov %s2932_s28 }
 0xf3a   :  { %31 = sbr.rel (!%p29_p3) target bundleno = 8 (0x8), region = 131 }
 0xf41   :  { %1911 = vsyncpa [#allocation3], 1 }
 0xf42   :  { %1913 = vsyncpa [#allocation3 + $0x1], 1 }

// kernel: tpu_custom_call.1
= control target key start
LH: loop header
LB: loop body
LE: loop exit
PB: predicated region body
PF: predicated region fallthrough
CT: control target
= control target key end

     0   :  { %s2884_s0 = inlined_call_operand.vmem [shape: f32[2,8,32], index: 0, kind: input, shape index: {}]   ;;  %s2885_s1 = inlined_call_operand.vmem [shape: f32[1,32], index: 1, kind: input, shape index: {}]   ;;  %s2886_s2 = inlined_call_operand.vmem [shape: f32[1,32], index: 2, kind: input, shape index: {}]   ;;  %s2887_s3 = inlined_call_operand.vmem [shape: bf16[32,96], index: 3, kind: input, shape index: {}]   ;;  %s2888_s4 = inlined_call_operand.vmem [shape: f32[1,96], index: 4, kind: input, shape index: {}]   ;;  %s2889_s5 = inlined_call_operand.vmem [shape: bf16[32,32], index: 5, kind: input, shape index: {}]   ;;  %s2890_s6 = inlined_call_operand.vmem [shape: f32[1,32], index: 6, kind: input, shape index: {}]   ;;  %s2891_s7 = inlined_call_operand.vmem [shape: bf16[32,128], index: 7, kind: input, shape index: {}]   ;;  %s2892_s8 = inlined_call_operand.vmem [shape: f32[1,128], index: 8, kind: input, shape index: {}]   ;;  %s2893_s9 = inlined_call_operand.vmem [shape: bf16[128,32], index: 9, kind: input, shape index: {}]   ;;  %s2894_s10 = inlined_call_operand.vmem [shape: f32[1,32], index: 10, kind: input, shape index: {}]   ;;  %s2895_s11 = inlined_call_operand.vmem [shape: f32[1,32], index: 11, kind: input, shape index: {}]   ;;  %s2896_s12 = inlined_call_operand.vmem [shape: f32[1,32], index: 12, kind: input, shape index: {}]   ;;  %s2897_s13 = inlined_call_operand.vmem [shape: bf16[32,256], index: 13, kind: input, shape index: {}]   ;;  %s2898_s14 = inlined_call_operand.vmem [shape: f32[1,256], index: 14, kind: input, shape index: {}]   ;;  %s2899_s15 = inlined_call_operand.vmem [shape: bf16[128,32], index: 15, kind: input, shape index: {}]   ;;  %s2900_s16 = inlined_call_operand.vmem [shape: f32[1,32], index: 16, kind: input, shape index: {}]   ;;  %s2901_s17 = inlined_call_operand.vmem [shape: bf16[128,32], index: 17, kind: input, shape index: {}]   ;;  %s2902_s18 = inlined_call_operand.vmem [shape: f32[1,32], index: 18, kind: input, shape index: {}]   ;;  %s2903_s19 = inlined_call_operand.hbm [shape: f32[2,8,32], index: 19, kind: output, shape index: {}]  }
   0x1   :  { %2912 = sst [smem:[#allocation11_spill]] %s2884_s0 }
   0x2   :  { %2913 = sst [smem:[#allocation12_spill]] %s2885_s1 }
   0x3   :  { %2914 = sst [smem:[#allocation13_spill]] %s2886_s2 }
   0x4   :  { %2915 = sst [smem:[#allocation14_spill]] %s2887_s3 }
   0x5   :  { %24 = vsyncpa [#allocation3], 0 }
   0x6   :  { %26 = vsyncpa [#allocation3 + $0x1], 0  ;;  %s2512_s0 = smov 0   ;;  %s2514_s30 = smov 0  }
   0x7   :  { %s2516_s20 = smov 0   ;;  %s2518_s21 = smov 0  }
   0x8 LB: > { %2916 = sst [smem:[#allocation5_spill]] %s2383_s0  ;;  %s2533_s1 = sadd.s32 4294967295, %s2395_s21   ;;  %s2395_s21 = sphi %s2518_s21, %s2931_s21   ;;  %s2391_s20 = sphi %s2516_s20, %s2933_s20   ;;  %s2387_s30 = sphi %s2514_s30, %s2935_s30   ;;  %s2383_s0 = sphi %s2512_s0, %s2934_s0  }
   0x9   : > { %2917 = sst [smem:[#allocation6_spill]] %s2391_s20  ;;  %s1952_s22 = sadd.s32 4294967294, %s2395_s21  }
   0xa   : > { %2918 = sst [smem:[#allocation7_spill]] %s2395_s21  ;;  %s2537_s2 = sadd.s32 1, %s2395_s21  }
   0xb   : > { %2919 = sst [smem:[#allocation8_spill]] %s2537_s2  ;;  %s443_s23 = sadd.s32 1, %s2391_s20 }
   0xc   : > { %s440_s24 = ssub.s32 %s2395_s21, %s2537_s2  ;;  %p453_p0 = scmp.ne.s32.totalorder %s2391_s20, %s2387_s30 }
   0xd   : > { %p441_p1 = scmp.eq.s32.totalorder %s440_s24, 0  ;;  %p454_p2 = scmp.eq.s32.totalorder %s2533_s1, 1 }
   0xe   : > { %p459_p3 = scmp.ne.s32.totalorder %s2387_s30, %s2383_s0  ;;  %p460_p4 = scmp.eq.s32.totalorder %s1952_s22, 1 }
   0xf   : > { %s2548_s25 = scalar_select %p441_p1, %s2391_s20, %s443_s23  }
  0x10   : > { %p2550_p5 = por %p454_p2, %p453_p0  ;;  %p2554_p6 = por %p460_p4, %p459_p3 }
  0x11   : > { %2920 = sst [smem:[#allocation9_spill]] %s2548_s25  ;;  %p1955_p7 = scmp.ge.s32.totalorder %s2395_s21, 1 }
  0x12   : > { %s2922_s26 = scalar_select %p2554_p6, 1, 0 }
  0x13   : > { %p539_p8 = scmp.lt.s32.totalorder %s2395_s21, 3 }
  0x14   : > { %2923 = sst [smem:[#allocation10_spill]] %s2922_s26 }
  0x15   : > { %p540_p9 = pnand %p1955_p7, %p539_p8 }
  0x16   : > { %s2924_s29 = sld [smem:[#allocation14_spill]] (!%p540_p9)  ;;  %v2397_v1 = vmov (!%p540_p9), 0.0   ;;  %vm2398_vm0 = vmmov (!%p540_p9), 0   ;;  %p594_p10 = scmp.lt.s32.totalorder (!%p540_p9), %s2533_s1, 1  ;;  %vm640_vm1 = vcmask (!%p540_p9), 261120   ;;  %vm690_vm2 = vcmask (!%p540_p9), 64512  }
  0x17   : > { %543 = sbr.rel (%p540_p9) target bundleno = 3879 (0xf27), region = 96  ;;  %2076 = vmatprep.subr.bf16.mxu1 (!%p540_p9), %v2397_v1  ;;  %2090 = vmatprep.subr.bf16.mxu0 (!%p540_p9), %v2397_v1  ;;  %s2925_s25 = sld [smem:[#allocation12_spill]] (!%p540_p9)  ;;  %v1960_v9 = vld [vmem:[%s2888_s4] ss:$0 sm:$0xff] (!%p540_p9)  ;;  %vm754_vm3 = vcmask (!%p540_p9), 1043456  }
  0x18   : > { %2080 = vmatprep.mubr.msk.bf16.mxu1 (!%p540_p9), %vm2398_vm0, %v2397_v1  ;;  %2092 = vmatprep.mubr.msk.bf16.mxu0 (!%p540_p9), %vm2398_vm0, %v2397_v1  ;;  %s2926_s23 = sld [smem:[#allocation13_spill]] (!%p540_p9)  ;;  %s2927_s0 = sld [smem:[#allocation11_spill]] (!%p540_p9)  ;;  %v799_v55 = vld [vmem:[%s2889_s5] sm:$0xf] (!%p540_p9)  ;;  %v912_v57 = vld [vmem:[%s2889_s5 + $0x4] sm:$0xf] (!%p540_p9) }
  0x19   : > { %s2402_s2 = smov (!%p540_p9), 64   ;;  %s2403_s26 = smov (!%p540_p9), 56   ;;  %v963_v56 = vsel (!%p540_p9), %vm754_vm3, %v799_v55, 0  ;;  %v917_v58 = vsel (!%p540_p9), %vm754_vm3, %v912_v57, 0  ;;  %v1275_v57 = vld [vmem:[%s2889_s5 + $0xc] sm:$0xf] (!%p540_p9) }
  0x1a   : > { %s2405_s27 = smov (!%p540_p9), 80   ;;  %s591_s28 = sand.u32 (!%p540_p9), 1, %s2387_s30  }
  0x1c   : > { %v2277_v0 = vld [vmem:[%s2924_s29] sm:$0xff] (!%p540_p9)   ;;  %v2278_v2 = vld [vmem:[%s2924_s29 + $0x8] sm:$0xff] (!%p540_p9)   ;;  %s2404_s29 = smov (!%p540_p9), 112  }
  0x1d   : > { %2077 = vmatpush3.bf16.msra.mxu1 (!%p540_p9), %v2277_v0  ;;  %v1958_v3 = vld [vmem:[%s2925_s25] ss:$0 sm:$0xff] (!%p540_p9)  ;;  %s1956_s25 = sshll.u32 (!%p540_p9), %s591_s28, 3 }
  0x1e   : > { %2078 = vmatprep.subr.bf16.mxu1 %v2397_v1  ;;  %s595_s24 = scalar_select %p594_p10, %s2533_s1, 1  ;;  %v1959_v4 = vld [vmem:[%s2926_s23] ss:$0 sm:$0xff] }
  0x1f   : > { %s2411_s23 = smov [#allocation2]  }
  0x20   : > { %s1957_s20 = sshll.u32 %s595_s24, 3  ;;  %s2406_s24 = smov 72  }
  0x21   : > { %2079 = vmatpush3.bf16.msra.mxu1 %v2278_v2  ;;  %s597_s21 = scalar_lea.vmem %s2927_s0, %s1957_s20  ;;  %s2399_s0 = smov 96  }
  0x22   : > { %2084 = vmatprep.subr.bf16.mxu1 %v2397_v1  ;;  %v599_v5 = vld [vmem:[%s597_s21] sm:$0xff]  ;;  %s2400_s20 = smov 120   ;;  %s2401_s21 = smov 88  }
  0x23   : > { %v607_v6 = vmul.f32 %v1958_v3, %v599_v5 }
  0x25   : > { %v615_v7 = vadd.f32 %v1959_v4, %v607_v6 }
  0x27   : > { %v616_v8 = vpack.c.bf16 %v615_v7, %v615_v7 }
  0x29   : > { %2081 = vmatmul.mubr.msk.bf16.vlgmr.msra.gmra.mrb[0].mxu1 %vm640_vm1, %v616_v8 }
  0x2a   : > { %2086 = vmatprep.mubr.msk.bf16.mxu1 %vm2398_vm0, %v2397_v1 }
  0xfc   : > { %v678_v10 = vpop.f32.mrb[0].mxu1 }
  0xfd   : > { %v679_v11 = vadd.f32 %v1960_v9, %v678_v10  ;;  %v2082_v12 = vpop.f32.mrb[1].mxu1 }
  0xfe   : > { %v681_v13 = vpop.f32.mrb[2].mxu1 }
  0xff   : > { %v684_v14 = vmul.f32 0.35355338, %v679_v11  ;;  %v2591_v15 = vpack.c.bf16 %v679_v11, %v679_v11  ;;  %v2083_v16 = vpop.f32.mrb[3].mxu1 }
 0x101   : > { %v2593_v17 = vpack.c.bf16 %v684_v14, %v684_v14  ;;  %688 = vrot.lane.b32.xlu0 %v2591_v15, %s2399_s0  ;;  %s2407_s0 = smov 104  }
 0x103   : > { %801 = vrot.lane.b32.xlu1 %v2593_v17, %s2400_s20  ;;  %s2408_s20 = smov 48  }
 0x105   : > { %803 = vrot.lane.b32.xlu0 %v2591_v15, %s2401_s21  ;;  %s593_s21 = scalar_lea.vmem [#allocation2], %s1956_s25  ;;  %s2337_s25 = sshll.u32 %s2411_s23, 4  ;;  %s2338_s25 = int_to_ptr.vmem [resolvable:$false] %s2337_s25 }
 0x173   : > { %v689_v18 = vpop.permute.xlu0 %688 }
 0x174   : > { %v695_v19 = vsel %vm690_vm2, %v689_v18, 0 }
 0x175   : > { %2085 = vmatpush3.bf16.xpose.msra.mxu1 %v695_v19  ;;  %v802_v22 = vpop.permute.xlu1 %801 }
 0x176   : > { %2096 = vmatprep.subr.bf16.mxu1 %v2397_v1 }
 0x177   : > { %v804_v20 = vpop.permute.xlu0 %803 }
 0x178   : > { %v809_v21 = vsel %vm690_vm2, %v804_v20, 0 }
 0x17c   : > { %2087 = vmatmul.mubr.msk.bf16.vlgmr.msra.gmra.mrb[4].mxu1 %vm690_vm2, %v2593_v17 }
 0x17d   : > { %2097 = vmatpush3.bf16.xpose.msra.mxu1 %v809_v21  ;;  %2098 = vmatprep.mubr.msk.bf16.mxu1 %vm2398_vm0, %v2397_v1 }
 0x17e   : > { %2108 = vmatprep.subr.bf16.mxu1 %v2397_v1 }
 0x184   : > { %2099 = vmatmul.mubr.msk.bf16.vlgmr.msra.gmra.mrb[8].mxu1 %vm690_vm2, %v802_v22 }
 0x185   : > { %2110 = vmatprep.mubr.msk.bf16.mxu1 %vm2398_vm0, %v2397_v1  ;;  %2109 = vmatpush3.bf16.msra.mxu1 %v917_v58 }
 0x186   : > { %2120 = vmatprep.subr.bf16.mxu1 %v2397_v1 }
 0x24f   : > { %v731_v23 = vpop.f32.mrb[4].mxu1 }
 0x250   : > { %v2088_v24 = vpop.f32.mrb[5].mxu1  ;;  %v737_v25 = vsel %vm690_vm2, %v731_v23, -inf }
 0x251   : > { %738 = vmax.xlane.f32.xlu1 %v737_v25  ;;  %v734_v26 = vpop.f32.mrb[6].mxu1 }
 0x252   : > { %v2089_v27 = vpop.f32.mrb[7].mxu1 }
 0x257   : > { %v845_v28 = vpop.f32.mrb[8].mxu1 }
 0x258   : > { %v2100_v29 = vpop.f32.mrb[9].mxu1  ;;  %v851_v30 = vsel %vm690_vm2, %v845_v28, -inf }
 0x259   : > { %852 = vmax.xlane.f32.xlu0 %v851_v30  ;;  %v848_v31 = vpop.f32.mrb[10].mxu1 }
 0x25a   : > { %v2101_v32 = vpop.f32.mrb[11].mxu1 }
 0x2de   : > { %v739_v33 = vpop.xlane.xlu1 %738 }
 0x2df   : > { %v740_v34 = vsub.f32 %v731_v23, %v739_v33 }
 0x2e1   : > { %v741_v35 = vmul.f32 1.442695, %v740_v34 }
 0x2e3   : > { %2311 = vpow2.f32 %v741_v35 }
 0x2e6   : > { %v853_v36 = vpop.xlane.xlu0 %852 }
 0x2e7   : > { %v854_v37 = vsub.f32 %v845_v28, %v853_v36 }
 0x2e9   : > { %v855_v38 = vmul.f32 1.442695, %v854_v37 }
 0x2eb   : > { %2313 = vpow2.f32 %v855_v38  ;;  %v1116_v38 = vld [vmem:[%s2889_s5 + $0x8] sm:$0xf] }
 0x2ed   : > { %v2312_v39 = vpop.eup %2311 }
 0x2ee   : > { %v743_v40 = vsel %vm690_vm2, %v2312_v39, 0.0 }
 0x2ef   : > { %744 = vadd.xlane.f32.xlu0 %v743_v40 }
 0x2f5   : > { %v2314_v41 = vpop.eup %2313 }
 0x2f6   : > { %v857_v42 = vsel %vm690_vm2, %v2314_v41, 0.0 }
 0x2f7   : > { %858 = vadd.xlane.f32.xlu1 %v857_v42 }
 0x305   : > { %749 = vrot.lane.b32.xlu0 %v2591_v15, %s2402_s2  ;;  %s1893_s2 = sshll.u32 %s593_s21, 4  ;;  %s2843_s2 = int_to_ptr.vmem [resolvable:$true] %s1893_s2 }
 0x306   : > { %s2333_s22 = scalar_lea.vmem %s2843_s2, 128  ;;  %p2340_p0 = scmp.lt.s32.totalorder %s2843_s2, %s2338_s25 }
 0x307   : > { %p2334_p11 = scmp.ne.s32.totalorder %s2843_s2, %s2333_s22 }
 0x308   : > { %863 = vrot.lane.b32.xlu1 %v2591_v15, %s2403_s26  ;;  %s2409_s26 = smov 40  }
 0x309   : > { %1005 = vrot.lane.b32.xlu0 %v2593_v17, %s2404_s29  ;;  %p2335_p12 = pnand %p2334_p11, %p2550_p5 }
 0x30b   : > { %p2336_p13 = pneg %p2335_p12 }
 0x30c   : > { %1007 = vrot.lane.b32.xlu1 %v2591_v15, %s2405_s27 }
 0x37c   : > { %v745_v43 = vpop.xlane.xlu0 %744 }
 0x37d   : > { %2315 = vrcp.f32 %v745_v43 }
 0x380   : > { %v750_v44 = vpop.permute.xlu0 %749 }
 0x381   : > { %v756_v45 = vsel %vm754_vm3, %v750_v44, 0 }
 0x382   : > { %2091 = vmatpush3.bf16.msra.mxu0 %v756_v45 }
 0x383   : > { %2102 = vmatprep.subr.bf16.mxu0 %v2397_v1 }
 0x384   : > { %v859_v46 = vpop.xlane.xlu1 %858  ;;  %v1006_v8 = vpop.permute.xlu0 %1005 }
 0x385   : > { %2317 = vrcp.f32 %v859_v46 }
 0x387   : > { %v2316_v47 = vpop.eup %2315 }
 0x388   : > { %v747_v48 = vmul.f32 %v2316_v47, %v2312_v39  ;;  %v864_v49 = vpop.permute.xlu1 %863  ;;  %v1121_v39 = vsel %vm754_vm3, %v1116_v38, 0 }
 0x389   : > { %v869_v51 = vsel %vm754_vm3, %v864_v49, 0 }
 0x38a   : > { %v748_v50 = vpack.c.bf16 %v747_v48, %v747_v48 }
 0x38c   : > { %2093 = vmatmul.mubr.msk.bf16.vlgmr.msra.gmra.mrb[0].mxu0 %vm690_vm2, %v748_v50  ;;  %v1008_v0 = vpop.permute.xlu1 %1007 }
 0x38d   : > { %2103 = vmatpush3.bf16.msra.mxu0 %v869_v51  ;;  %2104 = vmatprep.mubr.msk.bf16.mxu0 %vm2398_vm0, %v2397_v1  ;;  %v1013_v6 = vsel %vm690_vm2, %v1008_v0, 0 }
 0x38e   : > { %2114 = vmatprep.subr.bf16.mxu0 %v2397_v1 }
 0x38f   : > { %v2318_v52 = vpop.eup %2317 }
 0x390   : > { %v861_v53 = vmul.f32 %v2318_v52, %v2314_v41 }
 0x392   : > { %v862_v54 = vpack.c.bf16 %v861_v53, %v861_v53 }
 0x394   : > { %2105 = vmatmul.mubr.msk.bf16.vlgmr.msra.gmra.mrb[4].mxu0 %vm690_vm2, %v862_v54 }
 0x395   : > { %2116 = vmatprep.mubr.msk.bf16.mxu0 %vm2398_vm0, %v2397_v1  ;;  %2115 = vmatpush3.bf16.msra.mxu0 %v963_v56 }
 0x396   : > { %2126 = vmatprep.subr.bf16.mxu0 %v2397_v1 }
 0x45f   : > { %v792_v59 = vpop.f32.mrb[0].mxu0 }
 0x460   : > { %v798_v60 = vpack.c.bf16 %v792_v59, %v792_v59  ;;  %v2094_v61 = vpop.f32.mrb[1].mxu0 }
 0x461   : > { %v795_v62 = vpop.f32.mrb[2].mxu0 }
 0x462   : > { %v2095_v63 = vpop.f32.mrb[3].mxu0  ;;  %2117 = vmatmul.mubr.msk.bf16.vlgmr.msra.gmra.mrb[8].mxu0 %vm690_vm2, %v798_v60 }
 0x463   : > { %2128 = vmatprep.mubr.msk.bf16.mxu0 %vm2398_vm0, %v2397_v1 }
 0x467   : > { %v905_v2 = vpop.f32.mrb[4].mxu0 }
 0x468   : > { %v911_v3 = vpack.c.bf16 %v905_v2, %v905_v2  ;;  %v2106_v4 = vpop.f32.mrb[5].mxu0 }
 0x469   : > { %v908_v5 = vpop.f32.mrb[6].mxu0 }
 0x46a   : > { %v2107_v7 = vpop.f32.mrb[7].mxu0  ;;  %2111 = vmatmul.mubr.msk.bf16.vlgmr.msra.gmra.mrb[12].mxu1 %vm690_vm2, %v911_v3 }
 0x46b   : > { %2121 = vmatpush3.bf16.xpose.msra.mxu1 %v1013_v6  ;;  %2122 = vmatprep.mubr.msk.bf16.mxu1 %vm2398_vm0, %v2397_v1 }
 0x46c   : > { %2132 = vmatprep.subr.bf16.mxu1 %v2397_v1 }
 0x472   : > { %2123 = vmatmul.mubr.msk.bf16.vlgmr.msra.gmra.mrb[16].mxu1 %vm690_vm2, %v1006_v8 }
 0x473   : > { %2134 = vmatprep.mubr.msk.bf16.mxu1 %vm2398_vm0, %v2397_v1  ;;  %2133 = vmatpush3.bf16.msra.mxu1 %v1121_v39 }
 0x474   : > { %2144 = vmatprep.subr.bf16.mxu1 %v2397_v1 }
 0x535   : > { %v999_v9 = vpop.f32.mrb[8].mxu0 }
 0x536   : > { %v2118_v10 = vpop.f32.mrb[9].mxu0 }
 0x537   : > { %v1002_v11 = vpop.f32.mrb[10].mxu0  ;;  %v2280_v10 = vld [vmem:[%s2891_s7 + $0x8] sm:$0xff]  }
 0x538   : > { %v2119_v12 = vpop.f32.mrb[11].mxu0  ;;  %v2281_v11 = vld [vmem:[%s2893_s9] sm:$0xff]  }
 0x539   : > { %v2282_v12 = vld [vmem:[%s2893_s9 + $0x8] sm:$0xff]  }
 0x53d   : > { %v953_v13 = vpop.f32.mrb[12].mxu1 }
 0x53e   : > { %v2648_v14 = vadd.f32 %v999_v9, %v953_v13  ;;  %v2112_v16 = vpop.f32.mrb[13].mxu1  ;;  %v2279_v9 = vld [vmem:[%s2891_s7] sm:$0xff]   ;;  %v2283_v13 = vld [vmem:[%s2893_s9 + $0x10] sm:$0xff]  }
 0x53f   : > { %v956_v18 = vpop.f32.mrb[14].mxu1  ;;  %v2285_v16 = vld [vmem:[%s2893_s9 + $0x20] sm:$0xff]  }
 0x540   : > { %v2113_v19 = vpop.f32.mrb[15].mxu1  ;;  %v2286_v18 = vld [vmem:[%s2893_s9 + $0x28] sm:$0xff]  }
 0x545   : > { %v1049_v20 = vpop.f32.mrb[16].mxu1 }
 0x546   : > { %v2124_v21 = vpop.f32.mrb[17].mxu1  ;;  %v1055_v22 = vsel %vm690_vm2, %v1049_v20, -inf }
 0x547   : > { %1056 = vmax.xlane.f32.xlu1 %v1055_v22  ;;  %v1052_v23 = vpop.f32.mrb[18].mxu1 }
 0x548   : > { %v2125_v24 = vpop.f32.mrb[19].mxu1 }
 0x558   : > { %1166 = vrot.lane.b32.xlu1 %v2591_v15, %s2406_s24  ;;  %s2339_s24 = scalar_lea.vmem %s2338_s25, 256 }
 0x559   : > { %p2341_p1 = scmp.lt.s32.totalorder %s2339_s24, %s2333_s22 }
 0x55b   : > { %p2342_p2 = por %p2341_p1, %p2340_p0 }
 0x55c   : > { %1164 = vrot.lane.b32.xlu1 %v2593_v17, %s2407_s0 }
 0x55d   : > { %p2343_p3 = pnand %p2342_p2, %p2336_p13 }
 0x5d4   : > { %v1057_v25 = vpop.xlane.xlu1 %1056 }
 0x5d5   : > { %v1058_v26 = vsub.f32 %v1049_v20, %v1057_v25  ;;  %v1976_v20 = vld [vmem:[%s2890_s6] ss:$0 sm:$0xff] }
 0x5d7   : > { %v1059_v27 = vmul.f32 1.442695, %v1058_v26 }
 0x5d8   : > { %v1167_v34 = vpop.permute.xlu1 %1166 }
 0x5d9   : > { %2319 = vpow2.f32 %v1059_v27  ;;  %v1172_v36 = vsel %vm690_vm2, %v1167_v34, 0  ;;  %v2287_v27 = vld [vmem:[%s2893_s9 + $0x30] sm:$0xff]  }
 0x5dc   : > { %v1165_v37 = vpop.permute.xlu1 %1164 }
 0x5e3   : > { %v2320_v28 = vpop.eup %2319 }
 0x5e4   : > { %v1061_v29 = vsel %vm690_vm2, %v2320_v28, 0.0 }
 0x5e5   : > { %1062 = vadd.xlane.f32.xlu0 %v1061_v29  ;;  %v1977_v29 = vld [vmem:[%s2892_s8] ss:$0 sm:$0xff] }
 0x5fb   : > { %1067 = vrot.lane.b32.xlu0 %v2591_v15, %s2408_s20  ;;  %s2016_s20 = sshll.u32 %s2533_s1, 7  ;;  %s1880_s1 = scalar_lea.sflag [#allocation3], %s591_s28 }
 0x5fc   : > { %s2841_s27 = scalar_lea.hbm %s2903_s19, %s2016_s20 }
 0x672   : > { %v1063_v30 = vpop.xlane.xlu0 %1062 }
 0x673   : > { %2321 = vrcp.f32 %v1063_v30 }
 0x676   : > { %v1068_v31 = vpop.permute.xlu0 %1067 }
 0x677   : > { %v1073_v32 = vsel %vm754_vm3, %v1068_v31, 0 }
 0x678   : > { %2127 = vmatpush3.bf16.msra.mxu0 %v1073_v32 }
 0x679   : > { %2138 = vmatprep.subr.bf16.mxu0 %v2397_v1 }
 0x67d   : > { %v2322_v17 = vpop.eup %2321 }
 0x67e   : > { %v1065_v33 = vmul.f32 %v2322_v17, %v2320_v28  ;;  %v2288_v28 = vld [vmem:[%s2893_s9 + $0x38] sm:$0xff]  }
 0x680   : > { %v1066_v35 = vpack.c.bf16 %v1065_v33, %v1065_v33 }
 0x682   : > { %2129 = vmatmul.mubr.msk.bf16.vlgmr.msra.gmra.mrb[12].mxu0 %vm690_vm2, %v1066_v35 }
 0x683   : > { %2139 = vmatpush3.bf16.xpose.msra.mxu0 %v1172_v36  ;;  %2140 = vmatprep.mubr.msk.bf16.mxu0 %vm2398_vm0, %v2397_v1  ;;  %v1981_v36 = vld [vmem:[%s2894_s10] ss:$0 sm:$0xff] }
 0x684   : > { %2150 = vmatprep.subr.bf16.mxu0 %v2397_v1 }
 0x68a   : > { %2141 = vmatmul.mubr.msk.bf16.vlgmr.msra.gmra.mrb[16].mxu0 %vm690_vm2, %v1165_v37 }
 0x68b   : > { %2152 = vmatprep.mubr.msk.bf16.mxu0 %vm2398_vm0, %v2397_v1 }
 0x755   : > { %v1109_v40 = vpop.f32.mrb[12].mxu0 }
 0x756   : > { %v1115_v41 = vpack.c.bf16 %v1109_v40, %v1109_v40  ;;  %v2130_v42 = vpop.f32.mrb[13].mxu0 }
 0x757   : > { %v1112_v43 = vpop.f32.mrb[14].mxu0 }
 0x758   : > { %v2131_v44 = vpop.f32.mrb[15].mxu0  ;;  %2135 = vmatmul.mubr.msk.bf16.vlgmr.msra.gmra.mrb[20].mxu1 %vm690_vm2, %v1115_v41 }
 0x759   : > { %2146 = vmatprep.mubr.msk.bf16.mxu1 %vm2398_vm0, %v2397_v1 }
 0x75d   : > { %v1208_v45 = vpop.f32.mrb[16].mxu0 }
 0x75e   : > { %v2142_v46 = vpop.f32.mrb[17].mxu0  ;;  %v1214_v47 = vsel %vm690_vm2, %v1208_v45, -inf }
 0x75f   : > { %1215 = vmax.xlane.f32.xlu0 %v1214_v47  ;;  %v1211_v48 = vpop.f32.mrb[18].mxu0 }
 0x760   : > { %v2143_v49 = vpop.f32.mrb[19].mxu0 }
 0x775   : > { %1226 = vrot.lane.b32.xlu0 %v2591_v15, %s2409_s26  ;;  %v1280_v15 = vsel %vm754_vm3, %v1275_v57, 0  ;;  %v2297_v57 = vld [vmem:[%s2901_s17 + $0x10] sm:$0xff]  }
 0x776   : > { %2151 = vmatpush3.bf16.msra.mxu0 %v1280_v15  ;;  %v2298_v15 = vld [vmem:[%s2901_s17 + $0x18] sm:$0xff]  }
 0x777   : > { %2164 = vmatprep.subr.bf16.mxu0 %v2397_v1 }
 0x7ec   : > { %v1216_v50 = vpop.xlane.xlu0 %1215 }
 0x7ed   : > { %v1217_v51 = vsub.f32 %v1208_v45, %v1216_v50  ;;  %v2291_v50 = vld [vmem:[%s2897_s13 + $0x4] ss:$8 sps:$4 sm:$0xff]  }
 0x7ef   : > { %v1218_v52 = vmul.f32 1.442695, %v1217_v51  ;;  %v2289_v51 = vld [vmem:[%s2897_s13] ss:$8 sps:$4 sm:$0xff]  }
 0x7f0   : > { %v1227_v53 = vpop.permute.xlu0 %1226 }
 0x7f1   : > { %2323 = vpow2.f32 %v1218_v52  ;;  %v1232_v54 = vsel %vm754_vm3, %v1227_v53, 0  ;;  %v2292_v52 = vld [vmem:[%s2897_s13 + $0x10] ss:$8 sps:$4 sm:$0xff]   ;;  %v2294_v53 = vld [vmem:[%s2897_s13 + $0x14] ss:$8 sps:$4 sm:$0xff]  }
 0x7f2   : > { %2145 = vmatpush3.bf16.msra.mxu1 %v1232_v54  ;;  %v2410_v54 = vmov 0  }
 0x7f3   : > { %2156 = vmatprep.subr.bf16.mxu1 %v2397_v1 }
 0x7fb   : > { %v2324_v55 = vpop.eup %2323 }
 0x7fc   : > { %v1220_v56 = vsel %vm690_vm2, %v2324_v55, 0.0 }
 0x7fd   : > { %1221 = vadd.xlane.f32.xlu1 %v1220_v56  ;;  %v2296_v56 = vld [vmem:[%s2901_s17 + $0x8] sm:$0xff]  }
 0x82b   : > { %v1157_v58 = vpop.f32.mrb[20].mxu1 }
 0x82c   : > { %v1163_v59 = vadd.f32 %v1157_v58, %v2648_v14  ;;  %v2136_v60 = vpop.f32.mrb[21].mxu1  ;;  %v2284_v14 = vld [vmem:[%s2893_s9 + $0x18] sm:$0xff]   ;;  %v2299_v58 = vld [vmem:[%s2901_s17 + $0x20] sm:$0xff]  }
 0x82d   : > { %v1160_v61 = vpop.f32.mrb[22].mxu1 }
 0x82e   : > { %v2137_v62 = vpop.f32.mrb[23].mxu1 }
 0x88a   : > { %v1222_v63 = vpop.xlane.xlu1 %1221 }
 0x88b   : > { %2325 = vrcp.f32 %v1222_v63 }
 0x895   : > { %v2326_v0 = vpop.eup %2325 }
 0x896   : > { %v1224_v2 = vmul.f32 %v2326_v0, %v2324_v55  ;;  %v2295_v55 = vld [vmem:[%s2901_s17] sm:$0xff]  }
 0x897   : > { %v1990_v0 = vld [vmem:[%s2895_s11] ss:$0 sm:$0xff] }
 0x898   : > { %v1225_v3 = vpack.c.bf16 %v1224_v2, %v1224_v2 }
 0x89a   : > { %2147 = vmatmul.mubr.msk.bf16.vlgmr.msra.gmra.mrb[24].mxu1 %vm690_vm2, %v1225_v3  ;;  %v1991_v3 = vld [vmem:[%s2896_s12] ss:$0 sm:$0xff] }
 0x89b   : > { %2160 = vmatprep.mubr.msk.bf16.mxu1 %vm2398_vm0, %v2397_v1  ;;  %2157 = vmatpush3.bf16.msra.mxu1 %v2279_v9  ;;  %v2303_v9 = vld [vmem:[%s2899_s15] sm:$0xff]  }
 0x89c   : > { %2158 = vmatprep.subr.bf16.mxu1 %v2397_v1 }
 0x89f   : > { %2159 = vmatpush3.bf16.msra.mxu1 %v2280_v10  ;;  %v2304_v10 = vld [vmem:[%s2899_s15 + $0x8] sm:$0xff]  }
 0x8a0   : > { %1583 = vmatprep.subr.bf16.mxu1 %v2291_v50 }
 0x96d   : > { %v1268_v4 = vpop.f32.mrb[24].mxu1 }
 0x96e   : > { %v1274_v5 = vpack.c.bf16 %v1268_v4, %v1268_v4  ;;  %v2148_v6 = vpop.f32.mrb[25].mxu1 }
 0x96f   : > { %v1271_v7 = vpop.f32.mrb[26].mxu1 }
 0x970   : > { %v2149_v8 = vpop.f32.mrb[27].mxu1  ;;  %2153 = vmatmul.mubr.msk.bf16.vlgmr.msra.gmra.mrb[20].mxu0 %vm690_vm2, %v1274_v5  ;;  %v2301_v7 = vld [vmem:[%s2901_s17 + $0x30] sm:$0xff]  }
 0x971   : > { %2180 = vmatprep.mubr.msk.bf16.mxu0 %vm2398_vm0, %v2397_v1  ;;  %2165 = vmatpush3.bf16.msra.mxu0 %v2281_v11  ;;  %v2302_v8 = vld [vmem:[%s2901_s17 + $0x38] sm:$0xff]   ;;  %v2305_v11 = vld [vmem:[%s2899_s15 + $0x10] sm:$0xff]  }
 0x972   : > { %2166 = vmatprep.subr.bf16.mxu0 %v2397_v1 }
 0x975   : > { %2167 = vmatpush3.bf16.msra.mxu0 %v2282_v12  ;;  %v2306_v12 = vld [vmem:[%s2899_s15 + $0x18] sm:$0xff]  }
 0x976   : > { %2168 = vmatprep.subr.bf16.mxu0 %v2397_v1 }
 0x979   : > { %2169 = vmatpush3.bf16.msra.mxu0 %v2283_v13  ;;  %v2307_v13 = vld [vmem:[%s2899_s15 + $0x20] sm:$0xff]  }
 0x97a   : > { %2170 = vmatprep.subr.bf16.mxu0 %v2397_v1 }
 0x97d   : > { %2171 = vmatpush3.bf16.msra.mxu0 %v2284_v14  ;;  %v2308_v14 = vld [vmem:[%s2899_s15 + $0x28] sm:$0xff]  }
 0x97e   : > { %2172 = vmatprep.subr.bf16.mxu0 %v2397_v1 }
 0x981   : > { %2173 = vmatpush3.bf16.msra.mxu0 %v2285_v16  ;;  %v2309_v16 = vld [vmem:[%s2899_s15 + $0x30] sm:$0xff]  }
 0x982   : > { %2174 = vmatprep.subr.bf16.mxu0 %v2397_v1 }
 0x985   : > { %2175 = vmatpush3.bf16.msra.mxu0 %v2286_v18  ;;  %v2310_v18 = vld [vmem:[%s2899_s15 + $0x38] sm:$0xff]  }
 0x986   : > { %2176 = vmatprep.subr.bf16.mxu0 %v2397_v1 }
 0x989   : > { %2177 = vmatpush3.bf16.msra.mxu0 %v2287_v27 }
 0x98a   : > { %2178 = vmatprep.subr.bf16.mxu0 %v2397_v1 }
 0x98d   : > { %2179 = vmatpush3.bf16.msra.mxu0 %v2288_v28 }
 0x98e   : > { %2204 = vmatprep.subr.bf16.mxu0 %v2397_v1 }
 0xa43   : > { %v1316_v19 = vpop.f32.mrb[20].mxu0 }
 0xa44   : > { %v1322_v21 = vadd.f32 %v1316_v19, %v1163_v59  ;;  %v2154_v22 = vpop.f32.mrb[21].mxu0  ;;  %v2300_v59 = vld [vmem:[%s2901_s17 + $0x28] sm:$0xff]   ;;  %v1550_v19 = vlaneseq }
 0xa45   : > { %v1319_v23 = vpop.f32.mrb[22].mxu0  ;;  %v1548_v22 = vld [vmem:[%s2898_s14] sm:$0x3] }
 0xa46   : > { %v1330_v24 = vadd.f32 %v1976_v20, %v1322_v21  ;;  %v2155_v25 = vpop.f32.mrb[23].mxu0  ;;  %v1551_v20 = vshrl.u32 %v1550_v19, 7 }
 0xa48   : > { %v1331_v26 = vpack.c.bf16 %v1330_v24, %v1330_v24  ;;  %v1552_v21 = vsub.s32 0, %v1551_v20  ;;  %v1556_v23 = vsub.s32 1, %v1551_v20 }
 0xa4a   : > { %2161 = vmatmul.mubr.msk.bf16.vlgmr.msra.gmra.mrb[28].mxu1 %vm640_vm1, %v1331_v26  ;;  %v1557_v25 = vrot.slane %v1548_v22, %v1556_v23 }
 0xa4b   : > { %1584 = vmatpush1.bf16.msra.mxu1 %v2289_v51  ;;  %1615 = vmatprep.mubr.bf16.mxu1 %v2410_v54 }
 0xa4c   : > { %1585 = vmatprep.subr.bf16.mxu1 %v2294_v53 }
 0xa4f   : > { %1586 = vmatpush1.bf16.msra.mxu1 %v2292_v52 }
 0xa50   : > { %2184 = vmatprep.subr.bf16.mxu1 %v2397_v1 }
 0xb1d   : > { %v1392_v30 = vpop.f32.mrb[28].mxu1 }
 0xb1e   : > { %v1393_v31 = vadd.f32 %v1977_v29, %v1392_v30  ;;  %v2162_v32 = vpop.f32.mrb[29].mxu1 }
 0xb1f   : > { %v1395_v17 = vpop.f32.mrb[30].mxu1 }
 0xb20   : > { %v1398_v33 = vmax.f32 %v1393_v31, 0.0  ;;  %v2163_v34 = vpop.f32.mrb[31].mxu1 }
 0xb22   : > { %v1399_v35 = vpack.c.bf16 %v1398_v33, %v1398_v33 }
 0xb24   : > { %2181 = vmatmul.mubr.bf16.vlgmr.msra.gmra.mrb[24].mxu0 %v1399_v35 }
 0xb25   : > { %2220 = vmatprep.mubr.msk.bf16.mxu0 %vm2398_vm0, %v2397_v1  ;;  %2205 = vmatpush3.bf16.msra.mxu0 %v2295_v55 }
 0xb26   : > { %2206 = vmatprep.subr.bf16.mxu0 %v2397_v1 }
 0xb29   : > { %2207 = vmatpush3.bf16.msra.mxu0 %v2296_v56 }
 0xb2a   : > { %2208 = vmatprep.subr.bf16.mxu0 %v2397_v1 }
 0xb2d   : > { %2209 = vmatpush3.bf16.msra.mxu0 %v2297_v57 }
 0xb2e   : > { %2210 = vmatprep.subr.bf16.mxu0 %v2397_v1 }
 0xb31   : > { %2211 = vmatpush3.bf16.msra.mxu0 %v2298_v15 }
 0xb32   : > { %2212 = vmatprep.subr.bf16.mxu0 %v2397_v1 }
 0xb35   : > { %2213 = vmatpush3.bf16.msra.mxu0 %v2299_v58 }
 0xb36   : > { %2214 = vmatprep.subr.bf16.mxu0 %v2397_v1 }
 0xb39   : > { %2215 = vmatpush3.bf16.msra.mxu0 %v2300_v59 }
 0xb3a   : > { %2216 = vmatprep.subr.bf16.mxu0 %v2397_v1 }
 0xb3d   : > { %2217 = vmatpush3.bf16.msra.mxu0 %v2301_v7 }
 0xb3e   : > { %2218 = vmatprep.subr.bf16.mxu0 %v2397_v1 }
 0xb41   : > { %2219 = vmatpush3.bf16.msra.mxu0 %v2302_v8 }
 0xbf7   : > { %v1505_v37 = vpop.f32.mrb[24].mxu0 }
 0xbf8   : > { %v1506_v38 = vadd.f32 %v1981_v36, %v1505_v37  ;;  %v2182_v39 = vpop.f32.mrb[25].mxu0 }
 0xbf9   : > { %v1508_v40 = vpop.f32.mrb[26].mxu0 }
 0xbfa   : > { %v1511_v41 = vmul.f32 0.1, %v1506_v38  ;;  %v2183_v42 = vpop.f32.mrb[27].mxu0 }
 0xbfc   : > { %v1512_v43 = vadd.f32 %v1511_v41, %v1330_v24  ;;  %v1553_v24 = vrot.slane %v1548_v22, %v1552_v21 }
 0xbfe   : > { %v1513_v44 = vsel %vm640_vm1, %v1512_v43, 0.0 }
 0xbff   : > { %1514 = vadd.xlane.f32.xlu1 %v1513_v44 }
 0xc8c   : > { %v1515_v45 = vpop.xlane.xlu1 %1514 }
 0xc8d   : > { %v1517_v46 = vmul.f32 0.03125, %v1515_v45 }
 0xc8f   : > { %v1518_v47 = vsub.f32 %v1512_v43, %v1517_v46 }
 0xc91   : > { %v1519_v48 = vmul.f32 %v1518_v47, %v1518_v47 }
 0xc93   : > { %v1520_v49 = vsel %vm640_vm1, %v1519_v48, 0.0 }
 0xc94   : > { %1521 = vadd.xlane.f32.xlu1 %v1520_v49 }
 0xd21   : > { %v1522_v60 = vpop.xlane.xlu1 %1521 }
 0xd22   : > { %v1523_v61 = vmul.f32 0.03125, %v1522_v60 }
 0xd24   : > { %v1524_v62 = vadd.f32 1e-12, %v1523_v61  ;;  %v2006_v61 = vld [vmem:[%s2902_s18] ss:$0 sm:$0xff] }
 0xd26   : > { %2327 = vrsqrt.f32 %v1524_v62 }
 0xd30   : > { %v2328_v63 = vpop.eup %2327 }
 0xd31   : > { %v1526_v2 = vmul.f32 %v2328_v63, %v1518_v47  ;;  %v1997_v63 = vld [vmem:[%s2900_s16] ss:$0 sm:$0xff] }
 0xd33   : > { %v1534_v4 = vmul.f32 %v1990_v0, %v1526_v2 }
 0xd35   : > { %v1542_v5 = vadd.f32 %v1991_v3, %v1534_v4 }
 0xd37   : > { %v1543_v6 = vpack.c.bf16 %v1542_v5, %v1542_v5 }
 0xd39   : > { %1996 = vmatmul.mubr.msk.bf16.vlgmr.msra.gmra.mrb[32].mxu1 %vm640_vm1, %v1543_v6 }
 0xd3a   : > { %2200 = vmatprep.mubr.msk.bf16.mxu1 %vm2398_vm0, %v2397_v1  ;;  %2185 = vmatpush3.bf16.msra.mxu1 %v2303_v9 }
 0xd3b   : > { %2186 = vmatprep.subr.bf16.mxu1 %v2397_v1 }
 0xd3e   : > { %2187 = vmatpush3.bf16.msra.mxu1 %v2304_v10 }
 0xd3f   : > { %2188 = vmatprep.subr.bf16.mxu1 %v2397_v1 }
 0xd42   : > { %2189 = vmatpush3.bf16.msra.mxu1 %v2305_v11 }
 0xd43   : > { %2190 = vmatprep.subr.bf16.mxu1 %v2397_v1 }
 0xd46   : > { %2191 = vmatpush3.bf16.msra.mxu1 %v2306_v12 }
 0xd47   : > { %2192 = vmatprep.subr.bf16.mxu1 %v2397_v1 }
 0xd4a   : > { %2193 = vmatpush3.bf16.msra.mxu1 %v2307_v13 }
 0xd4b   : > { %2194 = vmatprep.subr.bf16.mxu1 %v2397_v1 }
 0xd4e   : > { %2195 = vmatpush3.bf16.msra.mxu1 %v2308_v14 }
 0xd4f   : > { %2196 = vmatprep.subr.bf16.mxu1 %v2397_v1 }
 0xd52   : > { %2197 = vmatpush3.bf16.msra.mxu1 %v2309_v16 }
 0xd53   : > { %2198 = vmatprep.subr.bf16.mxu1 %v2397_v1 }
 0xd56   : > { %2199 = vmatpush3.bf16.msra.mxu1 %v2310_v18 }
 0xe0c   : > { %v1617_v26 = vpop.f32.mrb[32].mxu1 }
 0xe0d   : > { %v1618_v27 = vadd.f32 %v1617_v26, %v1553_v24  ;;  %v1619_v28 = vpop.f32.mrb[33].mxu1 }
 0xe0e   : > { %v1620_v29 = vadd.f32 %v1619_v28, %v1557_v25  ;;  %v1621_v1 = vpop.f32.mrb[34].mxu1 }
 0xe0f   : > { %v1625_v30 = vmul.f32 0.70710677, %v1618_v27  ;;  %v1622_v31 = vpop.f32.mrb[35].mxu1  ;;  %v1624_v54 = vmul.f32 0.5, %v1618_v27 }
 0xe10   : > { %v1651_v32 = vmax.f32 %v1620_v29, 0.0 }
 0xe11   : > { %v1626_v17 = vand.u32 2147483647, %v1625_v30  ;;  %vm1646_vm4 = vcmp.ge.f32.partialorder %v1625_v30, 0.0 }
 0xe12   : > { %v1764_v33 = vpack.c.bf16 %v1651_v32, %v1651_v32 }
 0xe13   : > { %v1627_v34 = vmul.f32 0.3275911, %v1626_v17  ;;  %v1640_v36 = vsub.f32 0.0, %v1626_v17 }
 0xe14   : > { %2221 = vmatmul.mubr.bf16.vlgmr.msra.gmra.mrb[28].mxu0 %v1764_v33 }
 0xe15   : > { %v1628_v35 = vadd.f32 1.0, %v1627_v34  ;;  %v1641_v38 = vmul.f32 %v1640_v36, %v1626_v17 }
 0xe17   : > { %2329 = vrcp.f32 %v1628_v35  ;;  %v1642_v41 = vmul.f32 1.442695, %v1641_v38 }
 0xe19   : > { %2331 = vpow2.f32 %v1642_v41 }
 0xe21   : > { %v2330_v37 = vpop.eup %2329 }
 0xe22   : > { %v1631_v39 = vmul.f32 1.0614054, %v2330_v37 }
 0xe23   : > { %v2332_v49 = vpop.eup %2331 }
 0xe24   : > { %v1632_v40 = vadd.f32 -1.4531521, %v1631_v39 }
 0xe26   : > { %v1633_v42 = vmul.f32 %v2330_v37, %v1632_v40 }
 0xe28   : > { %v1634_v43 = vadd.f32 1.4214138, %v1633_v42 }
 0xe2a   : > { %v1635_v44 = vmul.f32 %v2330_v37, %v1634_v43 }
 0xe2c   : > { %v1636_v45 = vadd.f32 -0.28449672, %v1635_v44 }
 0xe2e   : > { %v1637_v46 = vmul.f32 %v2330_v37, %v1636_v45 }
 0xe30   : > { %v1638_v47 = vadd.f32 0.2548296, %v1637_v46 }
 0xe32   : > { %v1639_v48 = vmul.f32 %v2330_v37, %v1638_v47 }
 0xe34   : > { %v1644_v50 = vmul.f32 %v2332_v49, %v1639_v48 }
 0xe36   : > { %v1645_v51 = vsub.f32 1.0, %v1644_v50 }
 0xe38   : > { %v1647_v52 = vsub.f32 0.0, %v1645_v51 }
 0xe3a   : > { %v1648_v53 = vsel %vm1646_vm4, %v1645_v51, %v1647_v52 }
 0xe3b   : > { %v1649_v55 = vadd.f32 1.0, %v1648_v53 }
 0xe3d   : > { %v1650_v56 = vmul.f32 %v1649_v55, %v1624_v54 }
 0xe3f   : > { %v1652_v57 = vpack.c.bf16 %v1650_v56, %v1650_v56 }
 0xe41   : > { %2201 = vmatmul.mubr.bf16.vlgmr.msra.gmra.mrb[36].mxu1 %v1652_v57 }
 0xee7   : > { %v1870_v15 = vpop.f32.mrb[28].mxu0 }
 0xee8   : > { %v2222_v58 = vpop.f32.mrb[29].mxu0  ;;  %v1871_v62 = vadd.f32 %v2006_v61, %v1870_v15 }
 0xee9   : > { %v1873_v59 = vpop.f32.mrb[30].mxu0 }
 0xeea   : > { %v2223_v60 = vpop.f32.mrb[31].mxu0  ;;  %v1876_v2 = vmul.f32 0.1, %v1871_v62 }
 0xf14   : > { %v1758_v0 = vpop.f32.mrb[36].mxu1 }
 0xf15   : > { %v1759_v3 = vadd.f32 %v1997_v63, %v1758_v0  ;;  %v2202_v4 = vpop.f32.mrb[37].mxu1 }
 0xf16   : > { %v1761_v5 = vpop.f32.mrb[38].mxu1 }
 0xf17   : > { %v1877_v6 = vadd.f32 %v1876_v2, %v1759_v3  ;;  %v2203_v7 = vpop.f32.mrb[39].mxu1 }
 0xf19   : > { %1878 = vst.msk [vmem:[%s593_s21] sm:$0xff] %vm640_vm1, %v1877_v6 }
 0xf1a   : > { %2346 = shalt.err (!%p2343_p3)
}
 0xf1b   : > { %s2347_s28 = scalar_lea.hbm %s2841_s27, 128  ;;  %s2351_s21 = scalar_lea.hbm %s2903_s19, 256 }
 0xf1c   : > { %p2348_p4 = scmp.ne.s32.totalorder %s2841_s27, %s2347_s28  ;;  %p2352_p9 = scmp.lt.u32.totalorder %s2841_s27, %s2903_s19 }
 0xf1d   : > { %p2353_p10 = scmp.lt.u32.totalorder %s2351_s21, %s2347_s28  ;;  %p2355_p12 = scmp.lt.u32.totalorder %s2347_s28, %s2841_s27 }
 0xf1e   : > { %p2349_p7 = pnand %p2348_p4, %p2550_p5 }
 0xf1f   : > { %p2354_p11 = por %p2353_p10, %p2352_p9 }
 0xf20   : > { %p2350_p8 = pneg %p2349_p7 }
 0xf21   : > { %p2356_p13 = por %p2355_p12, %p2354_p11 }
 0xf23   : > { %p2357_p0 = pnand %p2356_p13, %p2350_p8 }
 0xf25   : > { %2360 = shalt.err (!%p2357_p0)
}
 0xf26   : > { %2224 = dma.vmem_to_hbm [thread:$0]  (%p2550_p5), %s2843_s2, 128, %s2841_s27, %s1880_s1  }
 0xf27 PF: > { %s2928_s22 = sld [smem:[#allocation7_spill]]  ;;  %s2929_s23 = sld [smem:[#allocation5_spill]] }
 0xf2d   : > { %p2230_p1 = scmp.ge.s32.totalorder %s2928_s22, 2  ;;  %s1905_s24 = sand.u32 1, %s2929_s23  }
 0xf2e   : > { %s1906_s0 = scalar_lea.sflag [#allocation3], %s1905_s24 }
 0xf2f   : > { %p2227_p2 = pnand %p2230_p1, %p2554_p6 }
 0xf31   : > { %2378 = dma.done.wait (!%p2227_p2), %s1906_s0, 128  }
 0xf32   : > { %2380 = vsyncadd (!%p2227_p2), %s1906_s0, 4294967168  ;;  %s2931_s21 = sld [smem:[#allocation8_spill]]  ;;  %s2932_s28 = sld [smem:[#allocation6_spill]] }
 0xf33   : > { %s2933_s20 = sld [smem:[#allocation9_spill]]  ;;  %s2934_s0 = smov %s2387_s30 }
 0xf38   : > { %p29_p3 = scmp.ge.s32.totalorder %s2931_s21, 4   ;;  %s2935_s30 = smov %s2932_s28 }
 0xf3a   :  { %31 = sbr.rel (!%p29_p3) target bundleno = 8 (0x8), region = 131 }
 0xf41   :  { %1911 = vsyncpa [#allocation3], 1 }
 0xf42   :  { %1913 = vsyncpa [#allocation3 + $0x1], 1 }

</bundles_post_ra>
